<compile_context>
chip_gen: v7x
topology: tpu7x:2x2x1
jax: 0.10.0
libtpu: 0.0.40
codegen_flags: <defaults>
</compile_context>

<pallas_src>
import jax
import jax.numpy as jnp
from jax import lax
from jax.experimental import pallas as pl
from jax.experimental.pallas import tpu as pltpu

F32 = jnp.float32
BF16 = jnp.bfloat16
_VMEM = pl.BlockSpec(memory_space=pltpu.MemorySpace.VMEM)

# ---------------------------------------------------------------- config ----
VOCAB = 32
EMB = 16
LSTM_UNITS = 16          # bi-LSTM output dim = 32
LSTM_LAYERS = 2
CNN_FILTERS = 8
CNN_KERNEL_SIZES = [3, 5]
DENSE_HIDDEN = 32
ENG_DIM = 4
BATCH = 2
SEQ = 8

H = LSTM_UNITS
D = 2 * H
NF = CNN_FILTERS
K3, K5 = CNN_KERNEL_SIZES
COMB = 2 * NF + D + ENG_DIM                  # fc1 input dim = 52

# row offsets inside the packed LSTM-weight slab (all multiples of 8)
_L0_WIH, _L0_WHH = 0, EMB
_L1_WIH, _L1_WHH = EMB + D, EMB + 2 * D
_LSTM_ROWS = EMB + 3 * D                     # 112

# row indices inside the packed 1-row-vector slab
(_VB0, _VB1, _VCNNB, _VLNG, _VLNB, _VATTB, _VATTV,
 _VFC1B, _VMLPG, _VMLPB, _VFC2B) = range(11)
_VEC_ROWS = 16

# row offsets inside the packed head-matrix slab (width = DENSE_HIDDEN)
_H_ATTWA = 0                                 # (D, D)      rows   0:32
_H_FC1 = D                                   # (COMB, 32)  rows  32:84
_H_FC2 = 88                                  # (32, 1)     rows  88:120 (col 0)
_HEAD_ROWS = _H_FC2 + DENSE_HIDDEN


# --------------------------------------------------------- fused kernel -----
def _fused_forward_kernel(tok_ref, eng_ref, embcnn_ref, lstm_ref, vec_ref,
                          head_ref, out_ref):
    B, T = tok_ref.shape
    BT = B * T

    tok = tok_ref[...]                                          # (B, T) int32

    # ---- embedding lookup: int-domain one-hot matmul (padding row 0 = 0) ----
    iota_v = lax.broadcasted_iota(jnp.int32, (B, T, VOCAB), 2)
    onehot = (tok[:, :, None] == iota_v).astype(F32).reshape(BT, VOCAB)
    emb_w = embcnn_ref[0:VOCAB, :]                              # (V, E)
    emb_flat = jnp.dot(onehot, emb_w, preferred_element_type=F32)  # (BT, E)

    # ---- CNN branches: im2col via zero-pad + static time shifts -------------
    padded = jnp.concatenate(
        [emb_flat, jnp.zeros((K5 - 1, EMB), F32)], axis=0)      # (BT+K5-1, E)
    cols = jnp.concatenate([padded[k:k + BT, :] for k in range(K5)],
                           axis=-1)                             # (BT, K5*E)
    cnn_w = embcnn_ref[VOCAB:VOCAB + K5 * EMB, :]               # (K5*E, 2F)
    cnn_b = vec_ref[_VCNNB:_VCNNB + 1, 0:2 * NF]                # (1, 2F)
    act = jnp.maximum(
        jnp.dot(cols, cnn_w, preferred_element_type=F32) + cnn_b, 0.0)
    act = act.reshape(B, T, 2 * NF)
    t_pos = lax.broadcasted_iota(jnp.int32, act.shape, 1)
    f_pos = lax.broadcasted_iota(jnp.int32, act.shape, 2)
    valid_len = jnp.where(f_pos < NF, T - K3 + 1, T - K5 + 1)
    # relu output >= 0, so filling invalid positions with 0 preserves the max
    cnn_feat = jnp.max(jnp.where(t_pos < valid_len, act, 0.0), axis=1)  # (B,2F)

    # ---- fused bidirectional LSTM (2 layers), register-resident -------------
    # gate columns: [i_f,i_b | f_f,f_b | o_f,o_b | g_f,g_b]  (sigmoid | tanh)
    col = lax.broadcasted_iota(jnp.int32, (B, 8 * H), 1)
    is_fwd_col = (col % (2 * H)) < H
    half3 = lax.broadcasted_iota(jnp.int32, (B, T, 2 * H), 2) < H

    def bilstm_layer(x_flat, wih, whh, b):
        # hoisted input projection for BOTH directions: one 128-lane matmul
        xproj = (jnp.dot(x_flat, wih, preferred_element_type=F32)
                 + b).reshape(B, T, 8 * H)
        whh_bf = whh.astype(BF16)                               # cast once/layer
        h = jnp.zeros((B, 2 * H), F32)
        c = jnp.zeros((B, 2 * H), F32)
        hs = []
        for s in range(T):                                      # static unroll
            # fwd half consumes time s, bwd half consumes time T-1-s
            xg = jnp.where(is_fwd_col, xproj[:, s, :], xproj[:, T - 1 - s, :])
            gates = jnp.dot(h.astype(BF16), whh_bf,
                            preferred_element_type=F32) + xg
            sig = jax.nn.sigmoid(gates[:, 0:6 * H])             # i, f, o
            g = jnp.tanh(gates[:, 6 * H:8 * H])                 # g
            i = sig[:, 0:2 * H]
            f = sig[:, 2 * H:4 * H]
            o = sig[:, 4 * H:6 * H]
            c = f * c + i * g
            h = o * jnp.tanh(c)
            hs.append(h)                                        # (B, 2H)
        # assemble (B,T,2H): fwd half from step t, bwd half from step T-1-t
        y_time = jnp.stack(hs, axis=1)
        y_rev = jnp.stack(hs[::-1], axis=1)
        return jnp.where(half3, y_time, y_rev)

    wih0 = lstm_ref[_L0_WIH:_L0_WIH + EMB, :]
    whh0 = lstm_ref[_L0_WHH:_L0_WHH + D, :]
    wih1 = lstm_ref[_L1_WIH:_L1_WIH + D, :]
    whh1 = lstm_ref[_L1_WHH:_L1_WHH + D, :]
    b0 = vec_ref[_VB0:_VB0 + 1, :]
    b1 = vec_ref[_VB1:_VB1 + 1, :]

    y0 = bilstm_layer(emb_flat, wih0, whh0, b0)
    y1 = bilstm_layer(y0.reshape(BT, D), wih1, whh1, b1)

    # ---- LayerNorm + paper attention with key-padding mask ------------------
    ln_g = vec_ref[_VLNG:_VLNG + 1, 0:D]
    ln_b = vec_ref[_VLNB:_VLNB + 1, 0:D]
    mean = jnp.mean(y1, axis=-1, keepdims=True)
    var = jnp.mean((y1 - mean) ** 2, axis=-1, keepdims=True)
    yn = (y1 - mean) * lax.rsqrt(var + 1e-5) * ln_g + ln_b      # (B, T, D)

    att_wa = head_ref[_H_ATTWA:_H_ATTWA + D, :]
    att_ba = vec_ref[_VATTB:_VATTB + 1, 0:D]
    att_v = vec_ref[_VATTV:_VATTV + 1, 0:D]
    mu = jnp.tanh(jnp.dot(yn.reshape(BT, D), att_wa,
                          preferred_element_type=F32) + att_ba)
    scores = jnp.sum(mu.reshape(B, T, D) * att_v, axis=-1)      # (B, T)
    scores = jnp.where(tok == 0, -1e30, scores)                 # masked_fill(-inf)
    scores = scores - jnp.max(scores, axis=1, keepdims=True)
    e = jnp.exp(scores)
    alpha = e / jnp.sum(e, axis=1, keepdims=True)               # softmax over T
    ctx = jnp.sum(alpha[:, :, None] * yn, axis=1)               # (B, D)

    # ---- merge + MLP head (fc1 / LayerNorm / ReLU / fc2) --------------------
    fc1_w = head_ref[_H_FC1:_H_FC1 + COMB, :]
    fc1_b = vec_ref[_VFC1B:_VFC1B + 1, 0:DENSE_HIDDEN]
    mlp_g = vec_ref[_VMLPG:_VMLPG + 1, 0:DENSE_HIDDEN]
    mlp_b = vec_ref[_VMLPB:_VMLPB + 1, 0:DENSE_HIDDEN]
    fc2_w = head_ref[_H_FC2:_H_FC2 + DENSE_HIDDEN, 0:1]
    fc2_b = vec_ref[_VFC2B:_VFC2B + 1, 0:1]

    merged = jnp.concatenate([cnn_feat, ctx, eng_ref[...]], axis=-1)  # (B, 52)
    h1 = jnp.dot(merged, fc1_w, preferred_element_type=F32) + fc1_b
    m1 = jnp.mean(h1, axis=-1, keepdims=True)
    v1 = jnp.mean((h1 - m1) ** 2, axis=-1, keepdims=True)
    hn = (h1 - m1) * lax.rsqrt(v1 + 1e-5) * mlp_g + mlp_b
    a1 = jnp.maximum(hn, 0.0)
    out_ref[...] = jnp.dot(a1, fc2_w, preferred_element_type=F32) + fc2_b


# ------------------------------------------------------------ wrapper -------
def enhanced_cnn_bilstm_forward(params, text_input, engineered_features):
    args = (text_input, engineered_features, params["embcnn"],
            params["lstm"], params["vec"], params["head"])
    B = text_input.shape[0]
    return pl.pallas_call(
        _fused_forward_kernel,
        out_shape=jax.ShapeDtypeStruct((B, 1), F32),
        in_specs=[_VMEM] * len(args),
        out_specs=_VMEM,
    )(*args)


# --------------------------------------------------------- parameter init ---
def init_params(key):
    keys = jax.random.split(key, 64)
    it = iter(keys)

    def nrm(shape, scale=0.1):
        return (scale * jax.random.normal(next(it), shape)).astype(F32)

    # ---- embedding (padding_idx=0 row zeroed) + fused CNN weights -----------
    emb = nrm((VOCAB, EMB)).at[0].set(0.0)

    w3, b3 = nrm((K3, EMB, NF)), nrm((1, NF))
    w5, b5 = nrm((K5, EMB, NF)), nrm((1, NF))
    cnn_w = jnp.zeros((K5 * EMB, 2 * NF), F32)
    cnn_w = cnn_w.at[:K3 * EMB, :NF].set(w3.reshape(K3 * EMB, NF))
    cnn_w = cnn_w.at[:, NF:].set(w5.reshape(K5 * EMB, NF))
    cnn_b = jnp.concatenate([b3, b5], axis=1)                    # (1, 2F)

    embcnn = jnp.concatenate([emb, cnn_w], axis=0)               # (112, 16)

    # ---- LSTM: per-direction i,f,g,o params -> fused interleaved layout -----
    # column blocks [i_f,i_b | f_f,f_b | o_f,o_b | g_f,g_b]; fused bias is
    # b_ih + b_hh when mapping a real PyTorch checkpoint.
    GATE_ORDER = (0, 1, 3, 2)          # pytorch gates i,f,g,o placed as i,f,o,g

    def combine(wih_f, whh_f, b_f, wih_b, whh_b, b_b):
        wih_cols, b_cols = [], []
        whh = jnp.zeros((2 * H, 8 * H), F32)
        for p, gt in enumerate(GATE_ORDER):
            sl = slice(gt * H, (gt + 1) * H)
            wih_cols += [wih_f[:, sl], wih_b[:, sl]]
            b_cols += [b_f[:, sl], b_b[:, sl]]
            whh = whh.at[:H, (2 * p) * H:(2 * p + 1) * H].set(whh_f[:, sl])
            whh = whh.at[H:, (2 * p + 1) * H:(2 * p + 2) * H].set(whh_b[:, sl])
        return jnp.concatenate(wih_cols, 1), whh, jnp.concatenate(b_cols, 1)

    lstm_rows, lstm_biases = [], []
    for layer in range(LSTM_LAYERS):
        din = EMB if layer == 0 else D
        wf, hf, bf = nrm((din, 4 * H)), nrm((H, 4 * H)), nrm((1, 4 * H))
        wb, hb, bb = nrm((din, 4 * H)), nrm((H, 4 * H)), nrm((1, 4 * H))
        wih, whh, b = combine(wf, hf, bf, wb, hb, bb)
        lstm_rows += [wih, whh]
        lstm_biases.append(b)
    lstm = jnp.concatenate(lstm_rows, axis=0)                    # (112, 128)

    # ---- attention + MLP head ------------------------------------------------
    att_wa, att_ba, att_v = nrm((D, D)), nrm((1, D)), nrm((1, D))
    fc1_w, fc1_b = nrm((COMB, DENSE_HIDDEN)), nrm((1, DENSE_HIDDEN))
    fc2_w, fc2_b = nrm((DENSE_HIDDEN, 1)), nrm((1, 1))

    head = jnp.zeros((_HEAD_ROWS, DENSE_HIDDEN), F32)
    head = head.at[_H_ATTWA:_H_ATTWA + D, :].set(att_wa)
    head = head.at[_H_FC1:_H_FC1 + COMB, :].set(fc1_w)
    head = head.at[_H_FC2:_H_FC2 + DENSE_HIDDEN, 0:1].set(fc2_w)

    # ---- all 1-row vectors packed into one (16, 128) slab --------------------
    vec = jnp.zeros((_VEC_ROWS, 128), F32)
    vec = vec.at[_VB0, :].set(lstm_biases[0][0])
    vec = vec.at[_VB1, :].set(lstm_biases[1][0])
    vec = vec.at[_VCNNB, :2 * NF].set(cnn_b[0])
    vec = vec.at[_VLNG, :D].set(jnp.ones((D,), F32))             # lstm_norm gamma
    vec = vec.at[_VLNB, :D].set(jnp.zeros((D,), F32))            # lstm_norm beta
    vec = vec.at[_VATTB, :D].set(att_ba[0])
    vec = vec.at[_VATTV, :D].set(att_v[0])
    vec = vec.at[_VFC1B, :DENSE_HIDDEN].set(fc1_b[0])
    vec = vec.at[_VMLPG, :DENSE_HIDDEN].set(jnp.ones((DENSE_HIDDEN,), F32))
    vec = vec.at[_VMLPB, :DENSE_HIDDEN].set(jnp.zeros((DENSE_HIDDEN,), F32))
    vec = vec.at[_VFC2B, 0].set(fc2_b[0, 0])

    return {"embcnn": embcnn, "lstm": lstm, "vec": vec, "head": head}


if __name__ == "__main__":
    key = jax.random.PRNGKey(0)
    pkey, tkey, ekey = jax.random.split(key, 3)
    params = init_params(pkey)

    tokens = jax.random.randint(tkey, (BATCH, SEQ), 1, VOCAB, dtype=jnp.int32)
    tokens = tokens.at[:, -2:].set(0)   # trailing padding to exercise the mask
    eng = (0.1 * jax.random.normal(ekey, (BATCH, ENG_DIM))).astype(F32)

    fwd = jax.jit(lambda t, e: enhanced_cnn_bilstm_forward(params, t, e))
    out = jax.block_until_ready(fwd(tokens, eng))

    assert out.shape == (BATCH, 1), out.shape
    assert bool(jnp.all(jnp.isfinite(out)))
    print("KERNEL_OK")
</pallas_src>

<mosaic_0001>
module attributes {stable_mosaic.version = 11 : i64} {
  func.func @_fused_forward_kernel(%arg0: memref<2x8xi32, #tpu.memory_space<vmem>>, %arg1: memref<2x4xf32, #tpu.memory_space<vmem>>, %arg2: memref<112x16xf32, #tpu.memory_space<vmem>>, %arg3: memref<112x128xf32, #tpu.memory_space<vmem>>, %arg4: memref<16x128xf32, #tpu.memory_space<vmem>>, %arg5: memref<120x32xf32, #tpu.memory_space<vmem>>, %arg6: memref<2x1xf32, #tpu.memory_space<vmem>>) attributes {dimension_semantics = [], scalar_prefetch = 0 : i64, scratch_operands = 0 : i64, tpu.core_type = #tpu.core_type<tc>} {
    %c0 = arith.constant 0 : index
    %c0_0 = arith.constant 0 : index
    %0 = vector.load %arg0[%c0, %c0_0] : memref<2x8xi32, #tpu.memory_space<vmem>>, vector<2x8xi32>
    %1 = tpu.iota {dimensions = array<i32: 2>} : vector<2x8x32xi32>
    %2 = vector.shape_cast %0 : vector<2x8xi32> to vector<2x8x1xi32>
    %3 = vector.broadcast %2 : vector<2x8x1xi32> to vector<2x8x32xi32>
    %4 = arith.cmpi eq, %3, %1 : vector<2x8x32xi32>
    %5 = arith.extui %4 : vector<2x8x32xi1> to vector<2x8x32xi32>
    %6 = arith.sitofp %5 : vector<2x8x32xi32> to vector<2x8x32xf32>
    %7 = vector.shape_cast %6 : vector<2x8x32xf32> to vector<16x32xf32>
    %c0_1 = arith.constant 0 : index
    %c0_2 = arith.constant 0 : index
    %8 = vector.load %arg2[%c0_1, %c0_2] : memref<112x16xf32, #tpu.memory_space<vmem>>, vector<32x16xf32>
    %cst = arith.constant dense<0.000000e+00> : vector<16x16xf32>
    %9 = tpu.matmul %7, %8, %cst {dimension_numbers = #tpu.dot_dimension_numbers<[1], [0], [0], [1], [0, 0, 1, 1], [], []>} : vector<16x32xf32>, vector<32x16xf32>, vector<16x16xf32> -> vector<16x16xf32>
    %cst_3 = arith.constant 0.000000e+00 : f32
    %10 = vector.broadcast %cst_3 : f32 to vector<4x16xf32>
    %11 = tpu.concatenate %9, %10 in 0 : vector<16x16xf32>, vector<4x16xf32> -> vector<20x16xf32>
    %12 = vector.extract_strided_slice %11 {offsets = [0, 0], sizes = [16, 16], strides = [1, 1]} : vector<20x16xf32> to vector<16x16xf32>
    %13 = vector.extract_strided_slice %11 {offsets = [1, 0], sizes = [16, 16], strides = [1, 1]} : vector<20x16xf32> to vector<16x16xf32>
    %14 = vector.extract_strided_slice %11 {offsets = [2, 0], sizes = [16, 16], strides = [1, 1]} : vector<20x16xf32> to vector<16x16xf32>
    %15 = vector.extract_strided_slice %11 {offsets = [3, 0], sizes = [16, 16], strides = [1, 1]} : vector<20x16xf32> to vector<16x16xf32>
    %16 = vector.extract_strided_slice %11 {offsets = [4, 0], sizes = [16, 16], strides = [1, 1]} : vector<20x16xf32> to vector<16x16xf32>
    %17 = tpu.concatenate %12, %13, %14, %15, %16 in 1 : vector<16x16xf32>, vector<16x16xf32>, vector<16x16xf32>, vector<16x16xf32>, vector<16x16xf32> -> vector<16x80xf32>
    %c32 = arith.constant 32 : index
    %c0_4 = arith.constant 0 : index
    %18 = vector.load %arg2[%c32, %c0_4] : memref<112x16xf32, #tpu.memory_space<vmem>>, vector<80x16xf32>
    %c2 = arith.constant 2 : index
    %c0_5 = arith.constant 0 : index
    %19 = vector.load %arg4[%c2, %c0_5] : memref<16x128xf32, #tpu.memory_space<vmem>>, vector<1x16xf32>
    %cst_6 = arith.constant dense<0.000000e+00> : vector<16x16xf32>
    %20 = tpu.matmul %17, %18, %cst_6 {dimension_numbers = #tpu.dot_dimension_numbers<[1], [0], [0], [1], [0, 0, 1, 1], [], []>} : vector<16x80xf32>, vector<80x16xf32>, vector<16x16xf32> -> vector<16x16xf32>
    %21 = vector.broadcast %19 : vector<1x16xf32> to vector<16x16xf32>
    %22 = arith.addf %20, %21 : vector<16x16xf32>
    %cst_7 = arith.constant 0.000000e+00 : f32
    %23 = vector.broadcast %cst_7 : f32 to vector<16x16xf32>
    %24 = arith.maximumf %22, %23 : vector<16x16xf32>
    %25 = vector.shape_cast %24 : vector<16x16xf32> to vector<2x8x16xf32>
    %26 = tpu.iota {dimensions = array<i32: 1>} : vector<2x8x16xi32>
    %27 = tpu.iota {dimensions = array<i32: 2>} : vector<2x8x16xi32>
    %c8_i32 = arith.constant 8 : i32
    %28 = vector.broadcast %c8_i32 : i32 to vector<2x8x16xi32>
    %29 = arith.cmpi slt, %27, %28 : vector<2x8x16xi32>
    %c6_i32 = arith.constant 6 : i32
    %c4_i32 = arith.constant 4 : i32
    %30 = vector.broadcast %c6_i32 : i32 to vector<2x8x16xi32>
    %31 = vector.broadcast %c4_i32 : i32 to vector<2x8x16xi32>
    %32 = arith.select %29, %30, %31 : vector<2x8x16xi1>, vector<2x8x16xi32>
    %33 = arith.cmpi slt, %26, %32 : vector<2x8x16xi32>
    %cst_8 = arith.constant 0.000000e+00 : f32
    %34 = vector.broadcast %cst_8 : f32 to vector<2x8x16xf32>
    %35 = arith.select %33, %25, %34 : vector<2x8x16xi1>, vector<2x8x16xf32>
    %cst_9 = arith.constant dense<0xFF800000> : vector<2x16xf32>
    %36 = vector.multi_reduction <maximumf>, %35, %cst_9 [1] : vector<2x8x16xf32> to vector<2x16xf32>
    %37 = tpu.iota {dimensions = array<i32: 1>} : vector<2x128xi32>
    %c32_i32 = arith.constant 32 : i32
    %c0_i32 = arith.constant 0 : i32
    %38 = arith.cmpi eq, %c32_i32, %c0_i32 : i32
    %c1_i32 = arith.constant 1 : i32
    %39 = arith.select %38, %c1_i32, %c32_i32 : i32
    %40 = vector.broadcast %39 : i32 to vector<2x128xi32>
    %41 = arith.remsi %37, %40 : vector<2x128xi32>
    %c0_i32_10 = arith.constant 0 : i32
    %42 = vector.broadcast %c0_i32_10 : i32 to vector<2x128xi32>
    %43 = arith.cmpi ne, %41, %42 : vector<2x128xi32>
    %c0_i32_11 = arith.constant 0 : i32
    %44 = vector.broadcast %c0_i32_11 : i32 to vector<2x128xi32>
    %45 = arith.cmpi slt, %41, %44 : vector<2x128xi32>
    %c0_i32_12 = arith.constant 0 : i32
    %46 = arith.cmpi slt, %39, %c0_i32_12 : i32
    %47 = vector.broadcast %46 : i1 to vector<2x128xi1>
    %48 = vector.broadcast %47 : vector<2x128xi1> to vector<2x128xi1>
    %49 = arith.xori %45, %48 : vector<2x128xi1>
    %50 = arith.andi %49, %43 : vector<2x128xi1>
    %51 = vector.broadcast %39 : i32 to vector<2x128xi32>
    %52 = arith.addi %41, %51 : vector<2x128xi32>
    %53 = arith.select %50, %52, %41 : vector<2x128xi1>, vector<2x128xi32>
    %c16_i32 = arith.constant 16 : i32
    %54 = vector.broadcast %c16_i32 : i32 to vector<2x128xi32>
    %55 = arith.cmpi slt, %53, %54 : vector<2x128xi32>
    %56 = tpu.iota {dimensions = array<i32: 2>} : vector<2x8x32xi32>
    %c16_i32_13 = arith.constant 16 : i32
    %57 = vector.broadcast %c16_i32_13 : i32 to vector<2x8x32xi32>
    %58 = arith.cmpi slt, %56, %57 : vector<2x8x32xi32>
    %c0_14 = arith.constant 0 : index
    %c0_15 = arith.constant 0 : index
    %59 = vector.load %arg3[%c0_14, %c0_15] : memref<112x128xf32, #tpu.memory_space<vmem>>, vector<16x128xf32>
    %c16 = arith.constant 16 : index
    %c0_16 = arith.constant 0 : index
    %60 = vector.load %arg3[%c16, %c0_16] : memref<112x128xf32, #tpu.memory_space<vmem>>, vector<32x128xf32>
    %c48 = arith.constant 48 : index
    %c0_17 = arith.constant 0 : index
    %61 = vector.load %arg3[%c48, %c0_17] : memref<112x128xf32, #tpu.memory_space<vmem>>, vector<32x128xf32>
    %c80 = arith.constant 80 : index
    %c0_18 = arith.constant 0 : index
    %62 = vector.load %arg3[%c80, %c0_18] : memref<112x128xf32, #tpu.memory_space<vmem>>, vector<32x128xf32>
    %c0_19 = arith.constant 0 : index
    %c0_20 = arith.constant 0 : index
    %63 = vector.load %arg4[%c0_19, %c0_20] : memref<16x128xf32, #tpu.memory_space<vmem>>, vector<1x128xf32>
    %c1 = arith.constant 1 : index
    %c0_21 = arith.constant 0 : index
    %64 = vector.load %arg4[%c1, %c0_21] : memref<16x128xf32, #tpu.memory_space<vmem>>, vector<1x128xf32>
    %cst_22 = arith.constant dense<0.000000e+00> : vector<16x128xf32>
    %65 = tpu.matmul %9, %59, %cst_22 {dimension_numbers = #tpu.dot_dimension_numbers<[1], [0], [0], [1], [0, 0, 1, 1], [], []>} : vector<16x16xf32>, vector<16x128xf32>, vector<16x128xf32> -> vector<16x128xf32>
    %66 = vector.broadcast %63 : vector<1x128xf32> to vector<16x128xf32>
    %67 = arith.addf %65, %66 : vector<16x128xf32>
    %68 = vector.shape_cast %67 : vector<16x128xf32> to vector<2x8x128xf32>
    %69 = arith.truncf %60 : vector<32x128xf32> to vector<32x128xbf16>
    %cst_23 = arith.constant 0.000000e+00 : f32
    %70 = vector.broadcast %cst_23 : f32 to vector<2x32xf32>
    %cst_24 = arith.constant 0.000000e+00 : f32
    %71 = vector.broadcast %cst_24 : f32 to vector<2x32xf32>
    %72 = vector.extract_strided_slice %68 {offsets = [0, 0, 0], sizes = [2, 1, 128], strides = [1, 1, 1]} : vector<2x8x128xf32> to vector<2x1x128xf32>
    %73 = vector.shape_cast %72 : vector<2x1x128xf32> to vector<2x128xf32>
    %74 = vector.extract_strided_slice %68 {offsets = [0, 7, 0], sizes = [2, 1, 128], strides = [1, 1, 1]} : vector<2x8x128xf32> to vector<2x1x128xf32>
    %75 = vector.shape_cast %74 : vector<2x1x128xf32> to vector<2x128xf32>
    %76 = arith.select %55, %73, %75 : vector<2x128xi1>, vector<2x128xf32>
    %77 = arith.truncf %70 : vector<2x32xf32> to vector<2x32xbf16>
    %cst_25 = arith.constant dense<0.000000e+00> : vector<2x128xf32>
    %78 = tpu.matmul %77, %69, %cst_25 {dimension_numbers = #tpu.dot_dimension_numbers<[1], [0], [0], [1], [0, 0, 1, 1], [], []>} : vector<2x32xbf16>, vector<32x128xbf16>, vector<2x128xf32> -> vector<2x128xf32>
    %79 = arith.addf %78, %76 : vector<2x128xf32>
    %80 = vector.extract_strided_slice %79 {offsets = [0, 0], sizes = [2, 96], strides = [1, 1]} : vector<2x128xf32> to vector<2x96xf32>
    %81 = arith.negf %80 : vector<2x96xf32>
    %82 = math.exp %81 : vector<2x96xf32>
    %cst_26 = arith.constant 1.000000e+00 : f32
    %83 = vector.broadcast %cst_26 : f32 to vector<2x96xf32>
    %84 = arith.addf %83, %82 : vector<2x96xf32>
    %85 = arith.divf %83, %84 : vector<2x96xf32>
    %86 = vector.extract_strided_slice %79 {offsets = [0, 96], sizes = [2, 32], strides = [1, 1]} : vector<2x128xf32> to vector<2x32xf32>
    %87 = math.tanh %86 : vector<2x32xf32>
    %88 = vector.extract_strided_slice %85 {offsets = [0, 0], sizes = [2, 32], strides = [1, 1]} : vector<2x96xf32> to vector<2x32xf32>
    %89 = vector.extract_strided_slice %85 {offsets = [0, 32], sizes = [2, 32], strides = [1, 1]} : vector<2x96xf32> to vector<2x32xf32>
    %90 = vector.extract_strided_slice %85 {offsets = [0, 64], sizes = [2, 32], strides = [1, 1]} : vector<2x96xf32> to vector<2x32xf32>
    %91 = arith.mulf %89, %71 : vector<2x32xf32>
    %92 = arith.mulf %88, %87 : vector<2x32xf32>
    %93 = arith.addf %91, %92 : vector<2x32xf32>
    %94 = math.tanh %93 : vector<2x32xf32>
    %95 = arith.mulf %90, %94 : vector<2x32xf32>
    %96 = vector.extract_strided_slice %68 {offsets = [0, 1, 0], sizes = [2, 1, 128], strides = [1, 1, 1]} : vector<2x8x128xf32> to vector<2x1x128xf32>
    %97 = vector.shape_cast %96 : vector<2x1x128xf32> to vector<2x128xf32>
    %98 = vector.extract_strided_slice %68 {offsets = [0, 6, 0], sizes = [2, 1, 128], strides = [1, 1, 1]} : vector<2x8x128xf32> to vector<2x1x128xf32>
    %99 = vector.shape_cast %98 : vector<2x1x128xf32> to vector<2x128xf32>
    %100 = arith.select %55, %97, %99 : vector<2x128xi1>, vector<2x128xf32>
    %101 = arith.truncf %95 : vector<2x32xf32> to vector<2x32xbf16>
    %cst_27 = arith.constant dense<0.000000e+00> : vector<2x128xf32>
    %102 = tpu.matmul %101, %69, %cst_27 {dimension_numbers = #tpu.dot_dimension_numbers<[1], [0], [0], [1], [0, 0, 1, 1], [], []>} : vector<2x32xbf16>, vector<32x128xbf16>, vector<2x128xf32> -> vector<2x128xf32>
    %103 = arith.addf %102, %100 : vector<2x128xf32>
    %104 = vector.extract_strided_slice %103 {offsets = [0, 0], sizes = [2, 96], strides = [1, 1]} : vector<2x128xf32> to vector<2x96xf32>
    %105 = arith.negf %104 : vector<2x96xf32>
    %106 = math.exp %105 : vector<2x96xf32>
    %cst_28 = arith.constant 1.000000e+00 : f32
    %107 = vector.broadcast %cst_28 : f32 to vector<2x96xf32>
    %108 = arith.addf %107, %106 : vector<2x96xf32>
    %109 = arith.divf %107, %108 : vector<2x96xf32>
    %110 = vector.extract_strided_slice %103 {offsets = [0, 96], sizes = [2, 32], strides = [1, 1]} : vector<2x128xf32> to vector<2x32xf32>
    %111 = math.tanh %110 : vector<2x32xf32>
    %112 = vector.extract_strided_slice %109 {offsets = [0, 0], sizes = [2, 32], strides = [1, 1]} : vector<2x96xf32> to vector<2x32xf32>
    %113 = vector.extract_strided_slice %109 {offsets = [0, 32], sizes = [2, 32], strides = [1, 1]} : vector<2x96xf32> to vector<2x32xf32>
    %114 = vector.extract_strided_slice %109 {offsets = [0, 64], sizes = [2, 32], strides = [1, 1]} : vector<2x96xf32> to vector<2x32xf32>
    %115 = arith.mulf %113, %93 : vector<2x32xf32>
    %116 = arith.mulf %112, %111 : vector<2x32xf32>
    %117 = arith.addf %115, %116 : vector<2x32xf32>
    %118 = math.tanh %117 : vector<2x32xf32>
    %119 = arith.mulf %114, %118 : vector<2x32xf32>
    %120 = vector.extract_strided_slice %68 {offsets = [0, 2, 0], sizes = [2, 1, 128], strides = [1, 1, 1]} : vector<2x8x128xf32> to vector<2x1x128xf32>
    %121 = vector.shape_cast %120 : vector<2x1x128xf32> to vector<2x128xf32>
    %122 = vector.extract_strided_slice %68 {offsets = [0, 5, 0], sizes = [2, 1, 128], strides = [1, 1, 1]} : vector<2x8x128xf32> to vector<2x1x128xf32>
    %123 = vector.shape_cast %122 : vector<2x1x128xf32> to vector<2x128xf32>
    %124 = arith.select %55, %121, %123 : vector<2x128xi1>, vector<2x128xf32>
    %125 = arith.truncf %119 : vector<2x32xf32> to vector<2x32xbf16>
    %cst_29 = arith.constant dense<0.000000e+00> : vector<2x128xf32>
    %126 = tpu.matmul %125, %69, %cst_29 {dimension_numbers = #tpu.dot_dimension_numbers<[1], [0], [0], [1], [0, 0, 1, 1], [], []>} : vector<2x32xbf16>, vector<32x128xbf16>, vector<2x128xf32> -> vector<2x128xf32>
    %127 = arith.addf %126, %124 : vector<2x128xf32>
    %128 = vector.extract_strided_slice %127 {offsets = [0, 0], sizes = [2, 96], strides = [1, 1]} : vector<2x128xf32> to vector<2x96xf32>
    %129 = arith.negf %128 : vector<2x96xf32>
    %130 = math.exp %129 : vector<2x96xf32>
    %cst_30 = arith.constant 1.000000e+00 : f32
    %131 = vector.broadcast %cst_30 : f32 to vector<2x96xf32>
    %132 = arith.addf %131, %130 : vector<2x96xf32>
    %133 = arith.divf %131, %132 : vector<2x96xf32>
    %134 = vector.extract_strided_slice %127 {offsets = [0, 96], sizes = [2, 32], strides = [1, 1]} : vector<2x128xf32> to vector<2x32xf32>
    %135 = math.tanh %134 : vector<2x32xf32>
    %136 = vector.extract_strided_slice %133 {offsets = [0, 0], sizes = [2, 32], strides = [1, 1]} : vector<2x96xf32> to vector<2x32xf32>
    %137 = vector.extract_strided_slice %133 {offsets = [0, 32], sizes = [2, 32], strides = [1, 1]} : vector<2x96xf32> to vector<2x32xf32>
    %138 = vector.extract_strided_slice %133 {offsets = [0, 64], sizes = [2, 32], strides = [1, 1]} : vector<2x96xf32> to vector<2x32xf32>
    %139 = arith.mulf %137, %117 : vector<2x32xf32>
    %140 = arith.mulf %136, %135 : vector<2x32xf32>
    %141 = arith.addf %139, %140 : vector<2x32xf32>
    %142 = math.tanh %141 : vector<2x32xf32>
    %143 = arith.mulf %138, %142 : vector<2x32xf32>
    %144 = vector.extract_strided_slice %68 {offsets = [0, 3, 0], sizes = [2, 1, 128], strides = [1, 1, 1]} : vector<2x8x128xf32> to vector<2x1x128xf32>
    %145 = vector.shape_cast %144 : vector<2x1x128xf32> to vector<2x128xf32>
    %146 = vector.extract_strided_slice %68 {offsets = [0, 4, 0], sizes = [2, 1, 128], strides = [1, 1, 1]} : vector<2x8x128xf32> to vector<2x1x128xf32>
    %147 = vector.shape_cast %146 : vector<2x1x128xf32> to vector<2x128xf32>
    %148 = arith.select %55, %145, %147 : vector<2x128xi1>, vector<2x128xf32>
    %149 = arith.truncf %143 : vector<2x32xf32> to vector<2x32xbf16>
    %cst_31 = arith.constant dense<0.000000e+00> : vector<2x128xf32>
    %150 = tpu.matmul %149, %69, %cst_31 {dimension_numbers = #tpu.dot_dimension_numbers<[1], [0], [0], [1], [0, 0, 1, 1], [], []>} : vector<2x32xbf16>, vector<32x128xbf16>, vector<2x128xf32> -> vector<2x128xf32>
    %151 = arith.addf %150, %148 : vector<2x128xf32>
    %152 = vector.extract_strided_slice %151 {offsets = [0, 0], sizes = [2, 96], strides = [1, 1]} : vector<2x128xf32> to vector<2x96xf32>
    %153 = arith.negf %152 : vector<2x96xf32>
    %154 = math.exp %153 : vector<2x96xf32>
    %cst_32 = arith.constant 1.000000e+00 : f32
    %155 = vector.broadcast %cst_32 : f32 to vector<2x96xf32>
    %156 = arith.addf %155, %154 : vector<2x96xf32>
    %157 = arith.divf %155, %156 : vector<2x96xf32>
    %158 = vector.extract_strided_slice %151 {offsets = [0, 96], sizes = [2, 32], strides = [1, 1]} : vector<2x128xf32> to vector<2x32xf32>
    %159 = math.tanh %158 : vector<2x32xf32>
    %160 = vector.extract_strided_slice %157 {offsets = [0, 0], sizes = [2, 32], strides = [1, 1]} : vector<2x96xf32> to vector<2x32xf32>
    %161 = vector.extract_strided_slice %157 {offsets = [0, 32], sizes = [2, 32], strides = [1, 1]} : vector<2x96xf32> to vector<2x32xf32>
    %162 = vector.extract_strided_slice %157 {offsets = [0, 64], sizes = [2, 32], strides = [1, 1]} : vector<2x96xf32> to vector<2x32xf32>
    %163 = arith.mulf %161, %141 : vector<2x32xf32>
    %164 = arith.mulf %160, %159 : vector<2x32xf32>
    %165 = arith.addf %163, %164 : vector<2x32xf32>
    %166 = math.tanh %165 : vector<2x32xf32>
    %167 = arith.mulf %162, %166 : vector<2x32xf32>
    %168 = vector.extract_strided_slice %68 {offsets = [0, 4, 0], sizes = [2, 1, 128], strides = [1, 1, 1]} : vector<2x8x128xf32> to vector<2x1x128xf32>
    %169 = vector.shape_cast %168 : vector<2x1x128xf32> to vector<2x128xf32>
    %170 = vector.extract_strided_slice %68 {offsets = [0, 3, 0], sizes = [2, 1, 128], strides = [1, 1, 1]} : vector<2x8x128xf32> to vector<2x1x128xf32>
    %171 = vector.shape_cast %170 : vector<2x1x128xf32> to vector<2x128xf32>
    %172 = arith.select %55, %169, %171 : vector<2x128xi1>, vector<2x128xf32>
    %173 = arith.truncf %167 : vector<2x32xf32> to vector<2x32xbf16>
    %cst_33 = arith.constant dense<0.000000e+00> : vector<2x128xf32>
    %174 = tpu.matmul %173, %69, %cst_33 {dimension_numbers = #tpu.dot_dimension_numbers<[1], [0], [0], [1], [0, 0, 1, 1], [], []>} : vector<2x32xbf16>, vector<32x128xbf16>, vector<2x128xf32> -> vector<2x128xf32>
    %175 = arith.addf %174, %172 : vector<2x128xf32>
    %176 = vector.extract_strided_slice %175 {offsets = [0, 0], sizes = [2, 96], strides = [1, 1]} : vector<2x128xf32> to vector<2x96xf32>
    %177 = arith.negf %176 : vector<2x96xf32>
    %178 = math.exp %177 : vector<2x96xf32>
    %cst_34 = arith.constant 1.000000e+00 : f32
    %179 = vector.broadcast %cst_34 : f32 to vector<2x96xf32>
    %180 = arith.addf %179, %178 : vector<2x96xf32>
    %181 = arith.divf %179, %180 : vector<2x96xf32>
    %182 = vector.extract_strided_slice %175 {offsets = [0, 96], sizes = [2, 32], strides = [1, 1]} : vector<2x128xf32> to vector<2x32xf32>
    %183 = math.tanh %182 : vector<2x32xf32>
    %184 = vector.extract_strided_slice %181 {offsets = [0, 0], sizes = [2, 32], strides = [1, 1]} : vector<2x96xf32> to vector<2x32xf32>
    %185 = vector.extract_strided_slice %181 {offsets = [0, 32], sizes = [2, 32], strides = [1, 1]} : vector<2x96xf32> to vector<2x32xf32>
    %186 = vector.extract_strided_slice %181 {offsets = [0, 64], sizes = [2, 32], strides = [1, 1]} : vector<2x96xf32> to vector<2x32xf32>
    %187 = arith.mulf %185, %165 : vector<2x32xf32>
    %188 = arith.mulf %184, %183 : vector<2x32xf32>
    %189 = arith.addf %187, %188 : vector<2x32xf32>
    %190 = math.tanh %189 : vector<2x32xf32>
    %191 = arith.mulf %186, %190 : vector<2x32xf32>
    %192 = vector.extract_strided_slice %68 {offsets = [0, 5, 0], sizes = [2, 1, 128], strides = [1, 1, 1]} : vector<2x8x128xf32> to vector<2x1x128xf32>
    %193 = vector.shape_cast %192 : vector<2x1x128xf32> to vector<2x128xf32>
    %194 = vector.extract_strided_slice %68 {offsets = [0, 2, 0], sizes = [2, 1, 128], strides = [1, 1, 1]} : vector<2x8x128xf32> to vector<2x1x128xf32>
    %195 = vector.shape_cast %194 : vector<2x1x128xf32> to vector<2x128xf32>
    %196 = arith.select %55, %193, %195 : vector<2x128xi1>, vector<2x128xf32>
    %197 = arith.truncf %191 : vector<2x32xf32> to vector<2x32xbf16>
    %cst_35 = arith.constant dense<0.000000e+00> : vector<2x128xf32>
    %198 = tpu.matmul %197, %69, %cst_35 {dimension_numbers = #tpu.dot_dimension_numbers<[1], [0], [0], [1], [0, 0, 1, 1], [], []>} : vector<2x32xbf16>, vector<32x128xbf16>, vector<2x128xf32> -> vector<2x128xf32>
    %199 = arith.addf %198, %196 : vector<2x128xf32>
    %200 = vector.extract_strided_slice %199 {offsets = [0, 0], sizes = [2, 96], strides = [1, 1]} : vector<2x128xf32> to vector<2x96xf32>
    %201 = arith.negf %200 : vector<2x96xf32>
    %202 = math.exp %201 : vector<2x96xf32>
    %cst_36 = arith.constant 1.000000e+00 : f32
    %203 = vector.broadcast %cst_36 : f32 to vector<2x96xf32>
    %204 = arith.addf %203, %202 : vector<2x96xf32>
    %205 = arith.divf %203, %204 : vector<2x96xf32>
    %206 = vector.extract_strided_slice %199 {offsets = [0, 96], sizes = [2, 32], strides = [1, 1]} : vector<2x128xf32> to vector<2x32xf32>
    %207 = math.tanh %206 : vector<2x32xf32>
    %208 = vector.extract_strided_slice %205 {offsets = [0, 0], sizes = [2, 32], strides = [1, 1]} : vector<2x96xf32> to vector<2x32xf32>
    %209 = vector.extract_strided_slice %205 {offsets = [0, 32], sizes = [2, 32], strides = [1, 1]} : vector<2x96xf32> to vector<2x32xf32>
    %210 = vector.extract_strided_slice %205 {offsets = [0, 64], sizes = [2, 32], strides = [1, 1]} : vector<2x96xf32> to vector<2x32xf32>
    %211 = arith.mulf %209, %189 : vector<2x32xf32>
    %212 = arith.mulf %208, %207 : vector<2x32xf32>
    %213 = arith.addf %211, %212 : vector<2x32xf32>
    %214 = math.tanh %213 : vector<2x32xf32>
    %215 = arith.mulf %210, %214 : vector<2x32xf32>
    %216 = vector.extract_strided_slice %68 {offsets = [0, 6, 0], sizes = [2, 1, 128], strides = [1, 1, 1]} : vector<2x8x128xf32> to vector<2x1x128xf32>
    %217 = vector.shape_cast %216 : vector<2x1x128xf32> to vector<2x128xf32>
    %218 = vector.extract_strided_slice %68 {offsets = [0, 1, 0], sizes = [2, 1, 128], strides = [1, 1, 1]} : vector<2x8x128xf32> to vector<2x1x128xf32>
    %219 = vector.shape_cast %218 : vector<2x1x128xf32> to vector<2x128xf32>
    %220 = arith.select %55, %217, %219 : vector<2x128xi1>, vector<2x128xf32>
    %221 = arith.truncf %215 : vector<2x32xf32> to vector<2x32xbf16>
    %cst_37 = arith.constant dense<0.000000e+00> : vector<2x128xf32>
    %222 = tpu.matmul %221, %69, %cst_37 {dimension_numbers = #tpu.dot_dimension_numbers<[1], [0], [0], [1], [0, 0, 1, 1], [], []>} : vector<2x32xbf16>, vector<32x128xbf16>, vector<2x128xf32> -> vector<2x128xf32>
    %223 = arith.addf %222, %220 : vector<2x128xf32>
    %224 = vector.extract_strided_slice %223 {offsets = [0, 0], sizes = [2, 96], strides = [1, 1]} : vector<2x128xf32> to vector<2x96xf32>
    %225 = arith.negf %224 : vector<2x96xf32>
    %226 = math.exp %225 : vector<2x96xf32>
    %cst_38 = arith.constant 1.000000e+00 : f32
    %227 = vector.broadcast %cst_38 : f32 to vector<2x96xf32>
    %228 = arith.addf %227, %226 : vector<2x96xf32>
    %229 = arith.divf %227, %228 : vector<2x96xf32>
    %230 = vector.extract_strided_slice %223 {offsets = [0, 96], sizes = [2, 32], strides = [1, 1]} : vector<2x128xf32> to vector<2x32xf32>
    %231 = math.tanh %230 : vector<2x32xf32>
    %232 = vector.extract_strided_slice %229 {offsets = [0, 0], sizes = [2, 32], strides = [1, 1]} : vector<2x96xf32> to vector<2x32xf32>
    %233 = vector.extract_strided_slice %229 {offsets = [0, 32], sizes = [2, 32], strides = [1, 1]} : vector<2x96xf32> to vector<2x32xf32>
    %234 = vector.extract_strided_slice %229 {offsets = [0, 64], sizes = [2, 32], strides = [1, 1]} : vector<2x96xf32> to vector<2x32xf32>
    %235 = arith.mulf %233, %213 : vector<2x32xf32>
    %236 = arith.mulf %232, %231 : vector<2x32xf32>
    %237 = arith.addf %235, %236 : vector<2x32xf32>
    %238 = math.tanh %237 : vector<2x32xf32>
    %239 = arith.mulf %234, %238 : vector<2x32xf32>
    %240 = vector.extract_strided_slice %68 {offsets = [0, 7, 0], sizes = [2, 1, 128], strides = [1, 1, 1]} : vector<2x8x128xf32> to vector<2x1x128xf32>
    %241 = vector.shape_cast %240 : vector<2x1x128xf32> to vector<2x128xf32>
    %242 = vector.extract_strided_slice %68 {offsets = [0, 0, 0], sizes = [2, 1, 128], strides = [1, 1, 1]} : vector<2x8x128xf32> to vector<2x1x128xf32>
    %243 = vector.shape_cast %242 : vector<2x1x128xf32> to vector<2x128xf32>
    %244 = arith.select %55, %241, %243 : vector<2x128xi1>, vector<2x128xf32>
    %245 = arith.truncf %239 : vector<2x32xf32> to vector<2x32xbf16>
    %cst_39 = arith.constant dense<0.000000e+00> : vector<2x128xf32>
    %246 = tpu.matmul %245, %69, %cst_39 {dimension_numbers = #tpu.dot_dimension_numbers<[1], [0], [0], [1], [0, 0, 1, 1], [], []>} : vector<2x32xbf16>, vector<32x128xbf16>, vector<2x128xf32> -> vector<2x128xf32>
    %247 = arith.addf %246, %244 : vector<2x128xf32>
    %248 = vector.extract_strided_slice %247 {offsets = [0, 0], sizes = [2, 96], strides = [1, 1]} : vector<2x128xf32> to vector<2x96xf32>
    %249 = arith.negf %248 : vector<2x96xf32>
    %250 = math.exp %249 : vector<2x96xf32>
    %cst_40 = arith.constant 1.000000e+00 : f32
    %251 = vector.broadcast %cst_40 : f32 to vector<2x96xf32>
    %252 = arith.addf %251, %250 : vector<2x96xf32>
    %253 = arith.divf %251, %252 : vector<2x96xf32>
    %254 = vector.extract_strided_slice %247 {offsets = [0, 96], sizes = [2, 32], strides = [1, 1]} : vector<2x128xf32> to vector<2x32xf32>
    %255 = math.tanh %254 : vector<2x32xf32>
    %256 = vector.extract_strided_slice %253 {offsets = [0, 0], sizes = [2, 32], strides = [1, 1]} : vector<2x96xf32> to vector<2x32xf32>
    %257 = vector.extract_strided_slice %253 {offsets = [0, 32], sizes = [2, 32], strides = [1, 1]} : vector<2x96xf32> to vector<2x32xf32>
    %258 = vector.extract_strided_slice %253 {offsets = [0, 64], sizes = [2, 32], strides = [1, 1]} : vector<2x96xf32> to vector<2x32xf32>
    %259 = arith.mulf %257, %237 : vector<2x32xf32>
    %260 = arith.mulf %256, %255 : vector<2x32xf32>
    %261 = arith.addf %259, %260 : vector<2x32xf32>
    %262 = math.tanh %261 : vector<2x32xf32>
    %263 = arith.mulf %258, %262 : vector<2x32xf32>
    %264 = vector.shape_cast %95 : vector<2x32xf32> to vector<2x1x32xf32>
    %265 = vector.shape_cast %119 : vector<2x32xf32> to vector<2x1x32xf32>
    %266 = vector.shape_cast %143 : vector<2x32xf32> to vector<2x1x32xf32>
    %267 = vector.shape_cast %167 : vector<2x32xf32> to vector<2x1x32xf32>
    %268 = vector.shape_cast %191 : vector<2x32xf32> to vector<2x1x32xf32>
    %269 = vector.shape_cast %215 : vector<2x32xf32> to vector<2x1x32xf32>
    %270 = vector.shape_cast %239 : vector<2x32xf32> to vector<2x1x32xf32>
    %271 = vector.shape_cast %263 : vector<2x32xf32> to vector<2x1x32xf32>
    %272 = tpu.concatenate %264, %265, %266, %267, %268, %269, %270, %271 in 1 : vector<2x1x32xf32>, vector<2x1x32xf32>, vector<2x1x32xf32>, vector<2x1x32xf32>, vector<2x1x32xf32>, vector<2x1x32xf32>, vector<2x1x32xf32>, vector<2x1x32xf32> -> vector<2x8x32xf32>
    %273 = vector.shape_cast %263 : vector<2x32xf32> to vector<2x1x32xf32>
    %274 = vector.shape_cast %239 : vector<2x32xf32> to vector<2x1x32xf32>
    %275 = vector.shape_cast %215 : vector<2x32xf32> to vector<2x1x32xf32>
    %276 = vector.shape_cast %191 : vector<2x32xf32> to vector<2x1x32xf32>
    %277 = vector.shape_cast %167 : vector<2x32xf32> to vector<2x1x32xf32>
    %278 = vector.shape_cast %143 : vector<2x32xf32> to vector<2x1x32xf32>
    %279 = vector.shape_cast %119 : vector<2x32xf32> to vector<2x1x32xf32>
    %280 = vector.shape_cast %95 : vector<2x32xf32> to vector<2x1x32xf32>
    %281 = tpu.concatenate %273, %274, %275, %276, %277, %278, %279, %280 in 1 : vector<2x1x32xf32>, vector<2x1x32xf32>, vector<2x1x32xf32>, vector<2x1x32xf32>, vector<2x1x32xf32>, vector<2x1x32xf32>, vector<2x1x32xf32>, vector<2x1x32xf32> -> vector<2x8x32xf32>
    %282 = arith.select %58, %272, %281 : vector<2x8x32xi1>, vector<2x8x32xf32>
    %283 = vector.shape_cast %282 : vector<2x8x32xf32> to vector<16x32xf32>
    %cst_41 = arith.constant dense<0.000000e+00> : vector<16x128xf32>
    %284 = tpu.matmul %283, %61, %cst_41 {dimension_numbers = #tpu.dot_dimension_numbers<[1], [0], [0], [1], [0, 0, 1, 1], [], []>} : vector<16x32xf32>, vector<32x128xf32>, vector<16x128xf32> -> vector<16x128xf32>
    %285 = vector.broadcast %64 : vector<1x128xf32> to vector<16x128xf32>
    %286 = arith.addf %284, %285 : vector<16x128xf32>
    %287 = vector.shape_cast %286 : vector<16x128xf32> to vector<2x8x128xf32>
    %288 = arith.truncf %62 : vector<32x128xf32> to vector<32x128xbf16>
    %cst_42 = arith.constant 0.000000e+00 : f32
    %289 = vector.broadcast %cst_42 : f32 to vector<2x32xf32>
    %cst_43 = arith.constant 0.000000e+00 : f32
    %290 = vector.broadcast %cst_43 : f32 to vector<2x32xf32>
    %291 = vector.extract_strided_slice %287 {offsets = [0, 0, 0], sizes = [2, 1, 128], strides = [1, 1, 1]} : vector<2x8x128xf32> to vector<2x1x128xf32>
    %292 = vector.shape_cast %291 : vector<2x1x128xf32> to vector<2x128xf32>
    %293 = vector.extract_strided_slice %287 {offsets = [0, 7, 0], sizes = [2, 1, 128], strides = [1, 1, 1]} : vector<2x8x128xf32> to vector<2x1x128xf32>
    %294 = vector.shape_cast %293 : vector<2x1x128xf32> to vector<2x128xf32>
    %295 = arith.select %55, %292, %294 : vector<2x128xi1>, vector<2x128xf32>
    %296 = arith.truncf %289 : vector<2x32xf32> to vector<2x32xbf16>
    %cst_44 = arith.constant dense<0.000000e+00> : vector<2x128xf32>
    %297 = tpu.matmul %296, %288, %cst_44 {dimension_numbers = #tpu.dot_dimension_numbers<[1], [0], [0], [1], [0, 0, 1, 1], [], []>} : vector<2x32xbf16>, vector<32x128xbf16>, vector<2x128xf32> -> vector<2x128xf32>
    %298 = arith.addf %297, %295 : vector<2x128xf32>
    %299 = vector.extract_strided_slice %298 {offsets = [0, 0], sizes = [2, 96], strides = [1, 1]} : vector<2x128xf32> to vector<2x96xf32>
    %300 = arith.negf %299 : vector<2x96xf32>
    %301 = math.exp %300 : vector<2x96xf32>
    %cst_45 = arith.constant 1.000000e+00 : f32
    %302 = vector.broadcast %cst_45 : f32 to vector<2x96xf32>
    %303 = arith.addf %302, %301 : vector<2x96xf32>
    %304 = arith.divf %302, %303 : vector<2x96xf32>
    %305 = vector.extract_strided_slice %298 {offsets = [0, 96], sizes = [2, 32], strides = [1, 1]} : vector<2x128xf32> to vector<2x32xf32>
    %306 = math.tanh %305 : vector<2x32xf32>
    %307 = vector.extract_strided_slice %304 {offsets = [0, 0], sizes = [2, 32], strides = [1, 1]} : vector<2x96xf32> to vector<2x32xf32>
    %308 = vector.extract_strided_slice %304 {offsets = [0, 32], sizes = [2, 32], strides = [1, 1]} : vector<2x96xf32> to vector<2x32xf32>
    %309 = vector.extract_strided_slice %304 {offsets = [0, 64], sizes = [2, 32], strides = [1, 1]} : vector<2x96xf32> to vector<2x32xf32>
    %310 = arith.mulf %308, %290 : vector<2x32xf32>
    %311 = arith.mulf %307, %306 : vector<2x32xf32>
    %312 = arith.addf %310, %311 : vector<2x32xf32>
    %313 = math.tanh %312 : vector<2x32xf32>
    %314 = arith.mulf %309, %313 : vector<2x32xf32>
    %315 = vector.extract_strided_slice %287 {offsets = [0, 1, 0], sizes = [2, 1, 128], strides = [1, 1, 1]} : vector<2x8x128xf32> to vector<2x1x128xf32>
    %316 = vector.shape_cast %315 : vector<2x1x128xf32> to vector<2x128xf32>
    %317 = vector.extract_strided_slice %287 {offsets = [0, 6, 0], sizes = [2, 1, 128], strides = [1, 1, 1]} : vector<2x8x128xf32> to vector<2x1x128xf32>
    %318 = vector.shape_cast %317 : vector<2x1x128xf32> to vector<2x128xf32>
    %319 = arith.select %55, %316, %318 : vector<2x128xi1>, vector<2x128xf32>
    %320 = arith.truncf %314 : vector<2x32xf32> to vector<2x32xbf16>
    %cst_46 = arith.constant dense<0.000000e+00> : vector<2x128xf32>
    %321 = tpu.matmul %320, %288, %cst_46 {dimension_numbers = #tpu.dot_dimension_numbers<[1], [0], [0], [1], [0, 0, 1, 1], [], []>} : vector<2x32xbf16>, vector<32x128xbf16>, vector<2x128xf32> -> vector<2x128xf32>
    %322 = arith.addf %321, %319 : vector<2x128xf32>
    %323 = vector.extract_strided_slice %322 {offsets = [0, 0], sizes = [2, 96], strides = [1, 1]} : vector<2x128xf32> to vector<2x96xf32>
    %324 = arith.negf %323 : vector<2x96xf32>
    %325 = math.exp %324 : vector<2x96xf32>
    %cst_47 = arith.constant 1.000000e+00 : f32
    %326 = vector.broadcast %cst_47 : f32 to vector<2x96xf32>
    %327 = arith.addf %326, %325 : vector<2x96xf32>
    %328 = arith.divf %326, %327 : vector<2x96xf32>
    %329 = vector.extract_strided_slice %322 {offsets = [0, 96], sizes = [2, 32], strides = [1, 1]} : vector<2x128xf32> to vector<2x32xf32>
    %330 = math.tanh %329 : vector<2x32xf32>
    %331 = vector.extract_strided_slice %328 {offsets = [0, 0], sizes = [2, 32], strides = [1, 1]} : vector<2x96xf32> to vector<2x32xf32>
    %332 = vector.extract_strided_slice %328 {offsets = [0, 32], sizes = [2, 32], strides = [1, 1]} : vector<2x96xf32> to vector<2x32xf32>
    %333 = vector.extract_strided_slice %328 {offsets = [0, 64], sizes = [2, 32], strides = [1, 1]} : vector<2x96xf32> to vector<2x32xf32>
    %334 = arith.mulf %332, %312 : vector<2x32xf32>
    %335 = arith.mulf %331, %330 : vector<2x32xf32>
    %336 = arith.addf %334, %335 : vector<2x32xf32>
    %337 = math.tanh %336 : vector<2x32xf32>
    %338 = arith.mulf %333, %337 : vector<2x32xf32>
    %339 = vector.extract_strided_slice %287 {offsets = [0, 2, 0], sizes = [2, 1, 128], strides = [1, 1, 1]} : vector<2x8x128xf32> to vector<2x1x128xf32>
    %340 = vector.shape_cast %339 : vector<2x1x128xf32> to vector<2x128xf32>
    %341 = vector.extract_strided_slice %287 {offsets = [0, 5, 0], sizes = [2, 1, 128], strides = [1, 1, 1]} : vector<2x8x128xf32> to vector<2x1x128xf32>
    %342 = vector.shape_cast %341 : vector<2x1x128xf32> to vector<2x128xf32>
    %343 = arith.select %55, %340, %342 : vector<2x128xi1>, vector<2x128xf32>
    %344 = arith.truncf %338 : vector<2x32xf32> to vector<2x32xbf16>
    %cst_48 = arith.constant dense<0.000000e+00> : vector<2x128xf32>
    %345 = tpu.matmul %344, %288, %cst_48 {dimension_numbers = #tpu.dot_dimension_numbers<[1], [0], [0], [1], [0, 0, 1, 1], [], []>} : vector<2x32xbf16>, vector<32x128xbf16>, vector<2x128xf32> -> vector<2x128xf32>
    %346 = arith.addf %345, %343 : vector<2x128xf32>
    %347 = vector.extract_strided_slice %346 {offsets = [0, 0], sizes = [2, 96], strides = [1, 1]} : vector<2x128xf32> to vector<2x96xf32>
    %348 = arith.negf %347 : vector<2x96xf32>
    %349 = math.exp %348 : vector<2x96xf32>
    %cst_49 = arith.constant 1.000000e+00 : f32
    %350 = vector.broadcast %cst_49 : f32 to vector<2x96xf32>
    %351 = arith.addf %350, %349 : vector<2x96xf32>
    %352 = arith.divf %350, %351 : vector<2x96xf32>
    %353 = vector.extract_strided_slice %346 {offsets = [0, 96], sizes = [2, 32], strides = [1, 1]} : vector<2x128xf32> to vector<2x32xf32>
    %354 = math.tanh %353 : vector<2x32xf32>
    %355 = vector.extract_strided_slice %352 {offsets = [0, 0], sizes = [2, 32], strides = [1, 1]} : vector<2x96xf32> to vector<2x32xf32>
    %356 = vector.extract_strided_slice %352 {offsets = [0, 32], sizes = [2, 32], strides = [1, 1]} : vector<2x96xf32> to vector<2x32xf32>
    %357 = vector.extract_strided_slice %352 {offsets = [0, 64], sizes = [2, 32], strides = [1, 1]} : vector<2x96xf32> to vector<2x32xf32>
    %358 = arith.mulf %356, %336 : vector<2x32xf32>
    %359 = arith.mulf %355, %354 : vector<2x32xf32>
    %360 = arith.addf %358, %359 : vector<2x32xf32>
    %361 = math.tanh %360 : vector<2x32xf32>
    %362 = arith.mulf %357, %361 : vector<2x32xf32>
    %363 = vector.extract_strided_slice %287 {offsets = [0, 3, 0], sizes = [2, 1, 128], strides = [1, 1, 1]} : vector<2x8x128xf32> to vector<2x1x128xf32>
    %364 = vector.shape_cast %363 : vector<2x1x128xf32> to vector<2x128xf32>
    %365 = vector.extract_strided_slice %287 {offsets = [0, 4, 0], sizes = [2, 1, 128], strides = [1, 1, 1]} : vector<2x8x128xf32> to vector<2x1x128xf32>
    %366 = vector.shape_cast %365 : vector<2x1x128xf32> to vector<2x128xf32>
    %367 = arith.select %55, %364, %366 : vector<2x128xi1>, vector<2x128xf32>
    %368 = arith.truncf %362 : vector<2x32xf32> to vector<2x32xbf16>
    %cst_50 = arith.constant dense<0.000000e+00> : vector<2x128xf32>
    %369 = tpu.matmul %368, %288, %cst_50 {dimension_numbers = #tpu.dot_dimension_numbers<[1], [0], [0], [1], [0, 0, 1, 1], [], []>} : vector<2x32xbf16>, vector<32x128xbf16>, vector<2x128xf32> -> vector<2x128xf32>
    %370 = arith.addf %369, %367 : vector<2x128xf32>
    %371 = vector.extract_strided_slice %370 {offsets = [0, 0], sizes = [2, 96], strides = [1, 1]} : vector<2x128xf32> to vector<2x96xf32>
    %372 = arith.negf %371 : vector<2x96xf32>
    %373 = math.exp %372 : vector<2x96xf32>
    %cst_51 = arith.constant 1.000000e+00 : f32
    %374 = vector.broadcast %cst_51 : f32 to vector<2x96xf32>
    %375 = arith.addf %374, %373 : vector<2x96xf32>
    %376 = arith.divf %374, %375 : vector<2x96xf32>
    %377 = vector.extract_strided_slice %370 {offsets = [0, 96], sizes = [2, 32], strides = [1, 1]} : vector<2x128xf32> to vector<2x32xf32>
    %378 = math.tanh %377 : vector<2x32xf32>
    %379 = vector.extract_strided_slice %376 {offsets = [0, 0], sizes = [2, 32], strides = [1, 1]} : vector<2x96xf32> to vector<2x32xf32>
    %380 = vector.extract_strided_slice %376 {offsets = [0, 32], sizes = [2, 32], strides = [1, 1]} : vector<2x96xf32> to vector<2x32xf32>
    %381 = vector.extract_strided_slice %376 {offsets = [0, 64], sizes = [2, 32], strides = [1, 1]} : vector<2x96xf32> to vector<2x32xf32>
    %382 = arith.mulf %380, %360 : vector<2x32xf32>
    %383 = arith.mulf %379, %378 : vector<2x32xf32>
    %384 = arith.addf %382, %383 : vector<2x32xf32>
    %385 = math.tanh %384 : vector<2x32xf32>
    %386 = arith.mulf %381, %385 : vector<2x32xf32>
    %387 = vector.extract_strided_slice %287 {offsets = [0, 4, 0], sizes = [2, 1, 128], strides = [1, 1, 1]} : vector<2x8x128xf32> to vector<2x1x128xf32>
    %388 = vector.shape_cast %387 : vector<2x1x128xf32> to vector<2x128xf32>
    %389 = vector.extract_strided_slice %287 {offsets = [0, 3, 0], sizes = [2, 1, 128], strides = [1, 1, 1]} : vector<2x8x128xf32> to vector<2x1x128xf32>
    %390 = vector.shape_cast %389 : vector<2x1x128xf32> to vector<2x128xf32>
    %391 = arith.select %55, %388, %390 : vector<2x128xi1>, vector<2x128xf32>
    %392 = arith.truncf %386 : vector<2x32xf32> to vector<2x32xbf16>
    %cst_52 = arith.constant dense<0.000000e+00> : vector<2x128xf32>
    %393 = tpu.matmul %392, %288, %cst_52 {dimension_numbers = #tpu.dot_dimension_numbers<[1], [0], [0], [1], [0, 0, 1, 1], [], []>} : vector<2x32xbf16>, vector<32x128xbf16>, vector<2x128xf32> -> vector<2x128xf32>
    %394 = arith.addf %393, %391 : vector<2x128xf32>
    %395 = vector.extract_strided_slice %394 {offsets = [0, 0], sizes = [2, 96], strides = [1, 1]} : vector<2x128xf32> to vector<2x96xf32>
    %396 = arith.negf %395 : vector<2x96xf32>
    %397 = math.exp %396 : vector<2x96xf32>
    %cst_53 = arith.constant 1.000000e+00 : f32
    %398 = vector.broadcast %cst_53 : f32 to vector<2x96xf32>
    %399 = arith.addf %398, %397 : vector<2x96xf32>
    %400 = arith.divf %398, %399 : vector<2x96xf32>
    %401 = vector.extract_strided_slice %394 {offsets = [0, 96], sizes = [2, 32], strides = [1, 1]} : vector<2x128xf32> to vector<2x32xf32>
    %402 = math.tanh %401 : vector<2x32xf32>
    %403 = vector.extract_strided_slice %400 {offsets = [0, 0], sizes = [2, 32], strides = [1, 1]} : vector<2x96xf32> to vector<2x32xf32>
    %404 = vector.extract_strided_slice %400 {offsets = [0, 32], sizes = [2, 32], strides = [1, 1]} : vector<2x96xf32> to vector<2x32xf32>
    %405 = vector.extract_strided_slice %400 {offsets = [0, 64], sizes = [2, 32], strides = [1, 1]} : vector<2x96xf32> to vector<2x32xf32>
    %406 = arith.mulf %404, %384 : vector<2x32xf32>
    %407 = arith.mulf %403, %402 : vector<2x32xf32>
    %408 = arith.addf %406, %407 : vector<2x32xf32>
    %409 = math.tanh %408 : vector<2x32xf32>
    %410 = arith.mulf %405, %409 : vector<2x32xf32>
    %411 = vector.extract_strided_slice %287 {offsets = [0, 5, 0], sizes = [2, 1, 128], strides = [1, 1, 1]} : vector<2x8x128xf32> to vector<2x1x128xf32>
    %412 = vector.shape_cast %411 : vector<2x1x128xf32> to vector<2x128xf32>
    %413 = vector.extract_strided_slice %287 {offsets = [0, 2, 0], sizes = [2, 1, 128], strides = [1, 1, 1]} : vector<2x8x128xf32> to vector<2x1x128xf32>
    %414 = vector.shape_cast %413 : vector<2x1x128xf32> to vector<2x128xf32>
    %415 = arith.select %55, %412, %414 : vector<2x128xi1>, vector<2x128xf32>
    %416 = arith.truncf %410 : vector<2x32xf32> to vector<2x32xbf16>
    %cst_54 = arith.constant dense<0.000000e+00> : vector<2x128xf32>
    %417 = tpu.matmul %416, %288, %cst_54 {dimension_numbers = #tpu.dot_dimension_numbers<[1], [0], [0], [1], [0, 0, 1, 1], [], []>} : vector<2x32xbf16>, vector<32x128xbf16>, vector<2x128xf32> -> vector<2x128xf32>
    %418 = arith.addf %417, %415 : vector<2x128xf32>
    %419 = vector.extract_strided_slice %418 {offsets = [0, 0], sizes = [2, 96], strides = [1, 1]} : vector<2x128xf32> to vector<2x96xf32>
    %420 = arith.negf %419 : vector<2x96xf32>
    %421 = math.exp %420 : vector<2x96xf32>
    %cst_55 = arith.constant 1.000000e+00 : f32
    %422 = vector.broadcast %cst_55 : f32 to vector<2x96xf32>
    %423 = arith.addf %422, %421 : vector<2x96xf32>
    %424 = arith.divf %422, %423 : vector<2x96xf32>
    %425 = vector.extract_strided_slice %418 {offsets = [0, 96], sizes = [2, 32], strides = [1, 1]} : vector<2x128xf32> to vector<2x32xf32>
    %426 = math.tanh %425 : vector<2x32xf32>
    %427 = vector.extract_strided_slice %424 {offsets = [0, 0], sizes = [2, 32], strides = [1, 1]} : vector<2x96xf32> to vector<2x32xf32>
    %428 = vector.extract_strided_slice %424 {offsets = [0, 32], sizes = [2, 32], strides = [1, 1]} : vector<2x96xf32> to vector<2x32xf32>
    %429 = vector.extract_strided_slice %424 {offsets = [0, 64], sizes = [2, 32], strides = [1, 1]} : vector<2x96xf32> to vector<2x32xf32>
    %430 = arith.mulf %428, %408 : vector<2x32xf32>
    %431 = arith.mulf %427, %426 : vector<2x32xf32>
    %432 = arith.addf %430, %431 : vector<2x32xf32>
    %433 = math.tanh %432 : vector<2x32xf32>
    %434 = arith.mulf %429, %433 : vector<2x32xf32>
    %435 = vector.extract_strided_slice %287 {offsets = [0, 6, 0], sizes = [2, 1, 128], strides = [1, 1, 1]} : vector<2x8x128xf32> to vector<2x1x128xf32>
    %436 = vector.shape_cast %435 : vector<2x1x128xf32> to vector<2x128xf32>
    %437 = vector.extract_strided_slice %287 {offsets = [0, 1, 0], sizes = [2, 1, 128], strides = [1, 1, 1]} : vector<2x8x128xf32> to vector<2x1x128xf32>
    %438 = vector.shape_cast %437 : vector<2x1x128xf32> to vector<2x128xf32>
    %439 = arith.select %55, %436, %438 : vector<2x128xi1>, vector<2x128xf32>
    %440 = arith.truncf %434 : vector<2x32xf32> to vector<2x32xbf16>
    %cst_56 = arith.constant dense<0.000000e+00> : vector<2x128xf32>
    %441 = tpu.matmul %440, %288, %cst_56 {dimension_numbers = #tpu.dot_dimension_numbers<[1], [0], [0], [1], [0, 0, 1, 1], [], []>} : vector<2x32xbf16>, vector<32x128xbf16>, vector<2x128xf32> -> vector<2x128xf32>
    %442 = arith.addf %441, %439 : vector<2x128xf32>
    %443 = vector.extract_strided_slice %442 {offsets = [0, 0], sizes = [2, 96], strides = [1, 1]} : vector<2x128xf32> to vector<2x96xf32>
    %444 = arith.negf %443 : vector<2x96xf32>
    %445 = math.exp %444 : vector<2x96xf32>
    %cst_57 = arith.constant 1.000000e+00 : f32
    %446 = vector.broadcast %cst_57 : f32 to vector<2x96xf32>
    %447 = arith.addf %446, %445 : vector<2x96xf32>
    %448 = arith.divf %446, %447 : vector<2x96xf32>
    %449 = vector.extract_strided_slice %442 {offsets = [0, 96], sizes = [2, 32], strides = [1, 1]} : vector<2x128xf32> to vector<2x32xf32>
    %450 = math.tanh %449 : vector<2x32xf32>
    %451 = vector.extract_strided_slice %448 {offsets = [0, 0], sizes = [2, 32], strides = [1, 1]} : vector<2x96xf32> to vector<2x32xf32>
    %452 = vector.extract_strided_slice %448 {offsets = [0, 32], sizes = [2, 32], strides = [1, 1]} : vector<2x96xf32> to vector<2x32xf32>
    %453 = vector.extract_strided_slice %448 {offsets = [0, 64], sizes = [2, 32], strides = [1, 1]} : vector<2x96xf32> to vector<2x32xf32>
    %454 = arith.mulf %452, %432 : vector<2x32xf32>
    %455 = arith.mulf %451, %450 : vector<2x32xf32>
    %456 = arith.addf %454, %455 : vector<2x32xf32>
    %457 = math.tanh %456 : vector<2x32xf32>
    %458 = arith.mulf %453, %457 : vector<2x32xf32>
    %459 = vector.extract_strided_slice %287 {offsets = [0, 7, 0], sizes = [2, 1, 128], strides = [1, 1, 1]} : vector<2x8x128xf32> to vector<2x1x128xf32>
    %460 = vector.shape_cast %459 : vector<2x1x128xf32> to vector<2x128xf32>
    %461 = vector.extract_strided_slice %287 {offsets = [0, 0, 0], sizes = [2, 1, 128], strides = [1, 1, 1]} : vector<2x8x128xf32> to vector<2x1x128xf32>
    %462 = vector.shape_cast %461 : vector<2x1x128xf32> to vector<2x128xf32>
    %463 = arith.select %55, %460, %462 : vector<2x128xi1>, vector<2x128xf32>
    %464 = arith.truncf %458 : vector<2x32xf32> to vector<2x32xbf16>
    %cst_58 = arith.constant dense<0.000000e+00> : vector<2x128xf32>
    %465 = tpu.matmul %464, %288, %cst_58 {dimension_numbers = #tpu.dot_dimension_numbers<[1], [0], [0], [1], [0, 0, 1, 1], [], []>} : vector<2x32xbf16>, vector<32x128xbf16>, vector<2x128xf32> -> vector<2x128xf32>
    %466 = arith.addf %465, %463 : vector<2x128xf32>
    %467 = vector.extract_strided_slice %466 {offsets = [0, 0], sizes = [2, 96], strides = [1, 1]} : vector<2x128xf32> to vector<2x96xf32>
    %468 = arith.negf %467 : vector<2x96xf32>
    %469 = math.exp %468 : vector<2x96xf32>
    %cst_59 = arith.constant 1.000000e+00 : f32
    %470 = vector.broadcast %cst_59 : f32 to vector<2x96xf32>
    %471 = arith.addf %470, %469 : vector<2x96xf32>
    %472 = arith.divf %470, %471 : vector<2x96xf32>
    %473 = vector.extract_strided_slice %466 {offsets = [0, 96], sizes = [2, 32], strides = [1, 1]} : vector<2x128xf32> to vector<2x32xf32>
    %474 = math.tanh %473 : vector<2x32xf32>
    %475 = vector.extract_strided_slice %472 {offsets = [0, 0], sizes = [2, 32], strides = [1, 1]} : vector<2x96xf32> to vector<2x32xf32>
    %476 = vector.extract_strided_slice %472 {offsets = [0, 32], sizes = [2, 32], strides = [1, 1]} : vector<2x96xf32> to vector<2x32xf32>
    %477 = vector.extract_strided_slice %472 {offsets = [0, 64], sizes = [2, 32], strides = [1, 1]} : vector<2x96xf32> to vector<2x32xf32>
    %478 = arith.mulf %476, %456 : vector<2x32xf32>
    %479 = arith.mulf %475, %474 : vector<2x32xf32>
    %480 = arith.addf %478, %479 : vector<2x32xf32>
    %481 = math.tanh %480 : vector<2x32xf32>
    %482 = arith.mulf %477, %481 : vector<2x32xf32>
    %483 = vector.shape_cast %314 : vector<2x32xf32> to vector<2x1x32xf32>
    %484 = vector.shape_cast %338 : vector<2x32xf32> to vector<2x1x32xf32>
    %485 = vector.shape_cast %362 : vector<2x32xf32> to vector<2x1x32xf32>
    %486 = vector.shape_cast %386 : vector<2x32xf32> to vector<2x1x32xf32>
    %487 = vector.shape_cast %410 : vector<2x32xf32> to vector<2x1x32xf32>
    %488 = vector.shape_cast %434 : vector<2x32xf32> to vector<2x1x32xf32>
    %489 = vector.shape_cast %458 : vector<2x32xf32> to vector<2x1x32xf32>
    %490 = vector.shape_cast %482 : vector<2x32xf32> to vector<2x1x32xf32>
    %491 = tpu.concatenate %483, %484, %485, %486, %487, %488, %489, %490 in 1 : vector<2x1x32xf32>, vector<2x1x32xf32>, vector<2x1x32xf32>, vector<2x1x32xf32>, vector<2x1x32xf32>, vector<2x1x32xf32>, vector<2x1x32xf32>, vector<2x1x32xf32> -> vector<2x8x32xf32>
    %492 = vector.shape_cast %482 : vector<2x32xf32> to vector<2x1x32xf32>
    %493 = vector.shape_cast %458 : vector<2x32xf32> to vector<2x1x32xf32>
    %494 = vector.shape_cast %434 : vector<2x32xf32> to vector<2x1x32xf32>
    %495 = vector.shape_cast %410 : vector<2x32xf32> to vector<2x1x32xf32>
    %496 = vector.shape_cast %386 : vector<2x32xf32> to vector<2x1x32xf32>
    %497 = vector.shape_cast %362 : vector<2x32xf32> to vector<2x1x32xf32>
    %498 = vector.shape_cast %338 : vector<2x32xf32> to vector<2x1x32xf32>
    %499 = vector.shape_cast %314 : vector<2x32xf32> to vector<2x1x32xf32>
    %500 = tpu.concatenate %492, %493, %494, %495, %496, %497, %498, %499 in 1 : vector<2x1x32xf32>, vector<2x1x32xf32>, vector<2x1x32xf32>, vector<2x1x32xf32>, vector<2x1x32xf32>, vector<2x1x32xf32>, vector<2x1x32xf32>, vector<2x1x32xf32> -> vector<2x8x32xf32>
    %501 = arith.select %58, %491, %500 : vector<2x8x32xi1>, vector<2x8x32xf32>
    %c3 = arith.constant 3 : index
    %c0_60 = arith.constant 0 : index
    %502 = vector.load %arg4[%c3, %c0_60] : memref<16x128xf32, #tpu.memory_space<vmem>>, vector<1x32xf32>
    %c4 = arith.constant 4 : index
    %c0_61 = arith.constant 0 : index
    %503 = vector.load %arg4[%c4, %c0_61] : memref<16x128xf32, #tpu.memory_space<vmem>>, vector<1x32xf32>
    %cst_62 = arith.constant dense<0.000000e+00> : vector<2x8xf32>
    %504 = vector.multi_reduction <add>, %501, %cst_62 [2] : vector<2x8x32xf32> to vector<2x8xf32>
    %505 = vector.shape_cast %504 : vector<2x8xf32> to vector<2x8x1xf32>
    %cst_63 = arith.constant 3.200000e+01 : f32
    %506 = vector.broadcast %cst_63 : f32 to vector<2x8x1xf32>
    %507 = arith.divf %505, %506 : vector<2x8x1xf32>
    %508 = vector.broadcast %507 : vector<2x8x1xf32> to vector<2x8x32xf32>
    %509 = arith.subf %501, %508 : vector<2x8x32xf32>
    %510 = arith.mulf %509, %509 : vector<2x8x32xf32>
    %cst_64 = arith.constant dense<0.000000e+00> : vector<2x8xf32>
    %511 = vector.multi_reduction <add>, %510, %cst_64 [2] : vector<2x8x32xf32> to vector<2x8xf32>
    %512 = vector.shape_cast %511 : vector<2x8xf32> to vector<2x8x1xf32>
    %cst_65 = arith.constant 3.200000e+01 : f32
    %513 = vector.broadcast %cst_65 : f32 to vector<2x8x1xf32>
    %514 = arith.divf %512, %513 : vector<2x8x1xf32>
    %515 = vector.broadcast %507 : vector<2x8x1xf32> to vector<2x8x32xf32>
    %516 = arith.subf %501, %515 : vector<2x8x32xf32>
    %cst_66 = arith.constant 9.99999974E-6 : f32
    %517 = vector.broadcast %cst_66 : f32 to vector<2x8x1xf32>
    %518 = arith.addf %514, %517 : vector<2x8x1xf32>
    %519 = math.rsqrt %518 : vector<2x8x1xf32>
    %520 = vector.broadcast %519 : vector<2x8x1xf32> to vector<2x8x32xf32>
    %521 = arith.mulf %516, %520 : vector<2x8x32xf32>
    %522 = vector.shape_cast %502 : vector<1x32xf32> to vector<1x1x32xf32>
    %523 = vector.broadcast %522 : vector<1x1x32xf32> to vector<2x8x32xf32>
    %524 = arith.mulf %521, %523 : vector<2x8x32xf32>
    %525 = vector.shape_cast %503 : vector<1x32xf32> to vector<1x1x32xf32>
    %526 = vector.broadcast %525 : vector<1x1x32xf32> to vector<2x8x32xf32>
    %527 = arith.addf %524, %526 : vector<2x8x32xf32>
    %c0_67 = arith.constant 0 : index
    %c0_68 = arith.constant 0 : index
    %528 = vector.load %arg5[%c0_67, %c0_68] : memref<120x32xf32, #tpu.memory_space<vmem>>, vector<32x32xf32>
    %c5 = arith.constant 5 : index
    %c0_69 = arith.constant 0 : index
    %529 = vector.load %arg4[%c5, %c0_69] : memref<16x128xf32, #tpu.memory_space<vmem>>, vector<1x32xf32>
    %c6 = arith.constant 6 : index
    %c0_70 = arith.constant 0 : index
    %530 = vector.load %arg4[%c6, %c0_70] : memref<16x128xf32, #tpu.memory_space<vmem>>, vector<1x32xf32>
    %531 = vector.shape_cast %527 : vector<2x8x32xf32> to vector<16x32xf32>
    %cst_71 = arith.constant dense<0.000000e+00> : vector<16x32xf32>
    %532 = tpu.matmul %531, %528, %cst_71 {dimension_numbers = #tpu.dot_dimension_numbers<[1], [0], [0], [1], [0, 0, 1, 1], [], []>} : vector<16x32xf32>, vector<32x32xf32>, vector<16x32xf32> -> vector<16x32xf32>
    %533 = vector.broadcast %529 : vector<1x32xf32> to vector<16x32xf32>
    %534 = arith.addf %532, %533 : vector<16x32xf32>
    %535 = math.tanh %534 : vector<16x32xf32>
    %536 = vector.shape_cast %535 : vector<16x32xf32> to vector<2x8x32xf32>
    %537 = vector.shape_cast %530 : vector<1x32xf32> to vector<1x1x32xf32>
    %538 = vector.broadcast %537 : vector<1x1x32xf32> to vector<2x8x32xf32>
    %539 = arith.mulf %536, %538 : vector<2x8x32xf32>
    %cst_72 = arith.constant dense<0.000000e+00> : vector<2x8xf32>
    %540 = vector.multi_reduction <add>, %539, %cst_72 [2] : vector<2x8x32xf32> to vector<2x8xf32>
    %c0_i32_73 = arith.constant 0 : i32
    %541 = vector.broadcast %c0_i32_73 : i32 to vector<2x8xi32>
    %542 = arith.cmpi eq, %0, %541 : vector<2x8xi32>
    %cst_74 = arith.constant -1.000000e+30 : f32
    %543 = vector.broadcast %cst_74 : f32 to vector<2x8xf32>
    %544 = arith.select %542, %543, %540 : vector<2x8xi1>, vector<2x8xf32>
    %cst_75 = arith.constant dense<0xFF800000> : vector<2xf32>
    %545 = vector.multi_reduction <maximumf>, %544, %cst_75 [1] : vector<2x8xf32> to vector<2xf32>
    %546 = vector.shape_cast %545 : vector<2xf32> to vector<2x1xf32>
    %547 = vector.broadcast %546 : vector<2x1xf32> to vector<2x8xf32>
    %548 = arith.subf %544, %547 : vector<2x8xf32>
    %549 = math.exp %548 : vector<2x8xf32>
    %cst_76 = arith.constant dense<0.000000e+00> : vector<2xf32>
    %550 = vector.multi_reduction <add>, %549, %cst_76 [1] : vector<2x8xf32> to vector<2xf32>
    %551 = vector.shape_cast %550 : vector<2xf32> to vector<2x1xf32>
    %552 = vector.broadcast %551 : vector<2x1xf32> to vector<2x8xf32>
    %553 = arith.divf %549, %552 : vector<2x8xf32>
    %554 = vector.shape_cast %553 : vector<2x8xf32> to vector<2x8x1xf32>
    %555 = vector.broadcast %554 : vector<2x8x1xf32> to vector<2x8x32xf32>
    %556 = arith.mulf %555, %527 : vector<2x8x32xf32>
    %cst_77 = arith.constant dense<0.000000e+00> : vector<2x32xf32>
    %557 = vector.multi_reduction <add>, %556, %cst_77 [1] : vector<2x8x32xf32> to vector<2x32xf32>
    %c32_78 = arith.constant 32 : index
    %c0_79 = arith.constant 0 : index
    %558 = vector.load %arg5[%c32_78, %c0_79] : memref<120x32xf32, #tpu.memory_space<vmem>>, vector<52x32xf32>
    %c7 = arith.constant 7 : index
    %c0_80 = arith.constant 0 : index
    %559 = vector.load %arg4[%c7, %c0_80] : memref<16x128xf32, #tpu.memory_space<vmem>>, vector<1x32xf32>
    %c8 = arith.constant 8 : index
    %c0_81 = arith.constant 0 : index
    %560 = vector.load %arg4[%c8, %c0_81] : memref<16x128xf32, #tpu.memory_space<vmem>>, vector<1x32xf32>
    %c9 = arith.constant 9 : index
    %c0_82 = arith.constant 0 : index
    %561 = vector.load %arg4[%c9, %c0_82] : memref<16x128xf32, #tpu.memory_space<vmem>>, vector<1x32xf32>
    %c88 = arith.constant 88 : index
    %c0_83 = arith.constant 0 : index
    %562 = vector.load %arg5[%c88, %c0_83] : memref<120x32xf32, #tpu.memory_space<vmem>>, vector<32x1xf32>
    %c10 = arith.constant 10 : index
    %c0_84 = arith.constant 0 : index
    %563 = vector.load %arg4[%c10, %c0_84] : memref<16x128xf32, #tpu.memory_space<vmem>>, vector<1x1xf32>
    %c0_85 = arith.constant 0 : index
    %c0_86 = arith.constant 0 : index
    %564 = vector.load %arg1[%c0_85, %c0_86] : memref<2x4xf32, #tpu.memory_space<vmem>>, vector<2x4xf32>
    %565 = tpu.concatenate %36, %557, %564 in 1 : vector<2x16xf32>, vector<2x32xf32>, vector<2x4xf32> -> vector<2x52xf32>
    %cst_87 = arith.constant dense<0.000000e+00> : vector<2x32xf32>
    %566 = tpu.matmul %565, %558, %cst_87 {dimension_numbers = #tpu.dot_dimension_numbers<[1], [0], [0], [1], [0, 0, 1, 1], [], []>} : vector<2x52xf32>, vector<52x32xf32>, vector<2x32xf32> -> vector<2x32xf32>
    %567 = vector.broadcast %559 : vector<1x32xf32> to vector<2x32xf32>
    %568 = arith.addf %566, %567 : vector<2x32xf32>
    %cst_88 = arith.constant dense<0.000000e+00> : vector<2xf32>
    %569 = vector.multi_reduction <add>, %568, %cst_88 [1] : vector<2x32xf32> to vector<2xf32>
    %570 = vector.shape_cast %569 : vector<2xf32> to vector<2x1xf32>
    %cst_89 = arith.constant 3.200000e+01 : f32
    %571 = vector.broadcast %cst_89 : f32 to vector<2x1xf32>
    %572 = arith.divf %570, %571 : vector<2x1xf32>
    %573 = vector.broadcast %572 : vector<2x1xf32> to vector<2x32xf32>
    %574 = arith.subf %568, %573 : vector<2x32xf32>
    %575 = arith.mulf %574, %574 : vector<2x32xf32>
    %cst_90 = arith.constant dense<0.000000e+00> : vector<2xf32>
    %576 = vector.multi_reduction <add>, %575, %cst_90 [1] : vector<2x32xf32> to vector<2xf32>
    %577 = vector.shape_cast %576 : vector<2xf32> to vector<2x1xf32>
    %cst_91 = arith.constant 3.200000e+01 : f32
    %578 = vector.broadcast %cst_91 : f32 to vector<2x1xf32>
    %579 = arith.divf %577, %578 : vector<2x1xf32>
    %580 = vector.broadcast %572 : vector<2x1xf32> to vector<2x32xf32>
    %581 = arith.subf %568, %580 : vector<2x32xf32>
    %cst_92 = arith.constant 9.99999974E-6 : f32
    %582 = vector.broadcast %cst_92 : f32 to vector<2x1xf32>
    %583 = arith.addf %579, %582 : vector<2x1xf32>
    %584 = math.rsqrt %583 : vector<2x1xf32>
    %585 = vector.broadcast %584 : vector<2x1xf32> to vector<2x32xf32>
    %586 = arith.mulf %581, %585 : vector<2x32xf32>
    %587 = vector.broadcast %560 : vector<1x32xf32> to vector<2x32xf32>
    %588 = arith.mulf %586, %587 : vector<2x32xf32>
    %589 = vector.broadcast %561 : vector<1x32xf32> to vector<2x32xf32>
    %590 = arith.addf %588, %589 : vector<2x32xf32>
    %cst_93 = arith.constant 0.000000e+00 : f32
    %591 = vector.broadcast %cst_93 : f32 to vector<2x32xf32>
    %592 = arith.maximumf %590, %591 : vector<2x32xf32>
    %cst_94 = arith.constant dense<0.000000e+00> : vector<2x1xf32>
    %593 = tpu.matmul %592, %562, %cst_94 {dimension_numbers = #tpu.dot_dimension_numbers<[1], [0], [0], [1], [0, 0, 1, 1], [], []>} : vector<2x32xf32>, vector<32x1xf32>, vector<2x1xf32> -> vector<2x1xf32>
    %594 = vector.broadcast %563 : vector<1x1xf32> to vector<2x1xf32>
    %595 = arith.addf %593, %594 : vector<2x1xf32>
    %c0_95 = arith.constant 0 : index
    %c0_96 = arith.constant 0 : index
    %596 = vector.load %arg6[%c0_95, %c0_96] : memref<2x1xf32, #tpu.memory_space<vmem>>, vector<2x1xf32>
    tpu.vector_store %arg6[%c0_95, %c0_96], %595 {strides = array<i32>} : memref<2x1xf32, #tpu.memory_space<vmem>>, vector<2x1xf32>,
    return
  }
}

</mosaic_0001>

<bundles_post_ra>
// kernel: _lambda_.1
= control target key start
LH: loop header
LB: loop body
LE: loop exit
PB: predicated region body
PF: predicated region fallthrough
CT: control target
= control target key end

     0   :  { %11 = vsyncpa [#allocation3], 0  ;;  %s4463_s0 = inlined_call_operand.hbm [shape: s32[2,8], index: 0, kind: input, shape index: {}]   ;;  %s4464_s1 = inlined_call_operand.vmem [shape: f32[2,4], index: 1, kind: input, shape index: {}]   ;;  %s4465_s2 = inlined_call_operand.hbm [shape: f32[112,16], index: 2, kind: input, shape index: {}]   ;;  %s4466_s3 = inlined_call_operand.hbm [shape: f32[112,128], index: 3, kind: input, shape index: {}]   ;;  %s4467_s4 = inlined_call_operand.hbm [shape: f32[16,128], index: 4, kind: input, shape index: {}]   ;;  %s4468_s5 = inlined_call_operand.hbm [shape: f32[120,32], index: 5, kind: input, shape index: {}]   ;;  %s4469_s6 = inlined_call_operand.vmem [shape: f32[2,1], index: 6, kind: output, shape index: {}]  }
   0x1   :  { %12 = vsyncpa [#allocation5], 0 }
   0x2   :  { %13 = vsyncpa [#allocation8], 0  ;;  %s3555_s21 = smov [#allocation4]   ;;  %s3439_s25 = scalar_lea.hbm %s4465_s2, 1792 }
   0x3   :  { %s31_s22 = sshll.u32 %s3555_s21, 4  ;;  %p3440_p0 = scmp.ne.s32.totalorder %s4465_s2, %s3439_s25  ;;  %s32_s22 = int_to_ptr.vmem [resolvable:$true] %s31_s22 }
   0x4   :  { %p3443_p1 = scmp.lt.u32.totalorder %s3439_s25, %s4465_s2 }
   0x6   :  { %p3445_p2 = pnand %p3443_p1, %p3440_p0 }
   0x8   :  { %3448 = shalt.err (!%p3445_p2)
}
   0x9   :  { %s3449_s30 = scalar_lea.vmem %s32_s22, 1792  ;;  %p3454_p4 = scmp.lt.s32.totalorder %s32_s22, %s32_s22 }
   0xa   :  { %p3450_p3 = scmp.ne.s32.totalorder %s32_s22, %s3449_s30  ;;  %p3455_p5 = scmp.lt.s32.totalorder %s3449_s30, %s3449_s30 }
   0xc   :  { %p3456_p6 = por %p3455_p5, %p3454_p4 }
   0xe   :  { %p3457_p7 = pnand %p3456_p6, %p3450_p3 }
  0x10   :  { %3460 = shalt.err (!%p3457_p7)
}
  0x11   :  { %s3556_s7 = smov 128   ;;  %s3557_s8 = smov 8  }
  0x12   :  { %37 = dma.hbm_to_vmem [thread:$0]  %s4465_s2, 1792, %s32_s22, [#allocation5], %s3556_s7, %s3556_s7, %s3557_s8  }
  0x13   :  { %s3558_s11 = smov [#allocation7]   ;;  %s3559_s13 = smov [#allocation2]  }
  0x14   :  { %s55_s12 = sshll.u32 %s3558_s11, 4  ;;  %s20_s14 = sshll.u32 %s3559_s13, 4  ;;  %s56_s12 = int_to_ptr.vmem [resolvable:$true] %s55_s12  ;;  %s21_s14 = int_to_ptr.vmem [resolvable:$true] %s20_s14 }
  0x15   :  { %s3461_s17 = scalar_lea.hbm %s4467_s4, 256 }
  0x16   :  { %p3462_p8 = scmp.ne.s32.totalorder %s4467_s4, %s3461_s17  ;;  %p3465_p9 = scmp.lt.u32.totalorder %s3461_s17, %s4467_s4 }
  0x18   :  { %p3467_p10 = pnand %p3465_p9, %p3462_p8 }
  0x1a   :  { %3470 = shalt.err (!%p3467_p10)
}
  0x1b   :  { %s3471_s2 = scalar_lea.vmem %s56_s12, 256  ;;  %p3476_p12 = scmp.lt.s32.totalorder %s56_s12, %s56_s12 }
  0x1c   :  { %p3472_p11 = scmp.ne.s32.totalorder %s56_s12, %s3471_s2  ;;  %p3477_p13 = scmp.lt.s32.totalorder %s3471_s2, %s3471_s2 }
  0x1e   :  { %p3478_p0 = por %p3477_p13, %p3476_p12 }
  0x20   :  { %p3479_p1 = pnand %p3478_p0, %p3472_p11 }
  0x22   :  { %3482 = shalt.err (!%p3479_p1)
}
  0x23   :  { %61 = dma.hbm_to_vmem [thread:$0]  %s4467_s4, 256, %s56_s12, [#allocation8], %s3556_s7, %s3556_s7, %s3557_s8  }
  0x24   :  { %s3483_s26 = scalar_lea.hbm %s4463_s0, 32 }
  0x25   :  { %p3484_p2 = scmp.ne.s32.totalorder %s4463_s0, %s3483_s26  ;;  %p3487_p3 = scmp.lt.u32.totalorder %s3483_s26, %s4463_s0 }
  0x27   :  { %p3489_p4 = pnand %p3487_p3, %p3484_p2 }
  0x29   :  { %3492 = shalt.err (!%p3489_p4)
}
  0x2a   :  { %s3493_s9 = scalar_lea.vmem %s21_s14, 32  ;;  %p3498_p6 = scmp.lt.s32.totalorder %s21_s14, %s21_s14 }
  0x2b   :  { %p3494_p5 = scmp.ne.s32.totalorder %s21_s14, %s3493_s9  ;;  %p3499_p7 = scmp.lt.s32.totalorder %s3493_s9, %s3493_s9 }
  0x2d   :  { %p3500_p8 = por %p3499_p7, %p3498_p6 }
  0x2f   :  { %p3501_p9 = pnand %p3500_p8, %p3494_p5 }
  0x31   :  { %3504 = shalt.err (!%p3501_p9)
}
  0x32   :  { %23 = dma.hbm_to_vmem [thread:$0]  %s4463_s0, 32, %s21_s14, [#allocation3]  }
  0x33   :  { %s3560_s11 = smov [#allocation6]   ;;  %s3561_s13 = smov [#allocation9]  }
  0x34   :  { %s43_s12 = sshll.u32 %s3560_s11, 4  ;;  %s67_s15 = sshll.u32 %s3561_s13, 4  ;;  %s44_s12 = int_to_ptr.vmem [resolvable:$true] %s43_s12  ;;  %s68_s15 = int_to_ptr.vmem [resolvable:$true] %s67_s15 }
  0x35   :  { %s3505_s18 = scalar_lea.hbm %s4466_s3, 1792 }
  0x36   :  { %p3506_p10 = scmp.ne.s32.totalorder %s4466_s3, %s3505_s18  ;;  %p3509_p11 = scmp.lt.u32.totalorder %s3505_s18, %s4466_s3 }
  0x38   :  { %p3511_p12 = pnand %p3509_p11, %p3506_p10 }
  0x3a   :  { %3514 = shalt.err (!%p3511_p12)
}
  0x3b   :  { %s3515_s0 = scalar_lea.vmem %s44_s12, 1792  ;;  %p3520_p0 = scmp.lt.s32.totalorder %s44_s12, %s44_s12 }
  0x3c   :  { %p3516_p13 = scmp.ne.s32.totalorder %s44_s12, %s3515_s0  ;;  %p3521_p1 = scmp.lt.s32.totalorder %s3515_s0, %s3515_s0 }
  0x3e   :  { %p3522_p2 = por %p3521_p1, %p3520_p0 }
  0x40   :  { %p3523_p3 = pnand %p3522_p2, %p3516_p13 }
  0x42   :  { %3526 = shalt.err (!%p3523_p3)
}
  0x43   :  { %49 = dma.hbm_to_vmem [thread:$0]  %s4466_s3, 1792, %s44_s12, [#allocation5], %s3556_s7, %s3556_s7, %s3557_s8  }
  0x44   :  { %s3527_s25 = scalar_lea.hbm %s4468_s5, 1920 }
  0x45   :  { %p3528_p4 = scmp.ne.s32.totalorder %s4468_s5, %s3527_s25  ;;  %p3531_p5 = scmp.lt.u32.totalorder %s3527_s25, %s4468_s5 }
  0x47   :  { %p3533_p6 = pnand %p3531_p5, %p3528_p4 }
  0x49   :  { %3536 = shalt.err (!%p3533_p6)
}
  0x4a   :  { %s3537_s30 = scalar_lea.vmem %s68_s15, 1920  ;;  %p3542_p8 = scmp.lt.s32.totalorder %s68_s15, %s68_s15 }
  0x4b   :  { %p3538_p7 = scmp.ne.s32.totalorder %s68_s15, %s3537_s30  ;;  %p3543_p9 = scmp.lt.s32.totalorder %s3537_s30, %s3537_s30 }
  0x4d   :  { %p3544_p10 = por %p3543_p9, %p3542_p8 }
  0x4f   :  { %p3545_p11 = pnand %p3544_p10, %p3538_p7 }
  0x51   :  { %3548 = shalt.err (!%p3545_p11)
}
  0x52   :  { %73 = dma.hbm_to_vmem [thread:$0]  %s4468_s5, 1920, %s68_s15, [#allocation8], %s3556_s7, %s3556_s7, %s3557_s8  }
  0x53   :  { %3549 = dma.done.wait [#allocation3], 32  }
  0x54   :  { %3550 = vsyncadd [#allocation3], 4294967264 }
  0x55   :  { %3551 = dma.done.wait [#allocation5], 3584  }
  0x56   :  { %3552 = vsyncadd [#allocation5], 4294963712 }
  0x57   :  { %3553 = dma.done.wait [#allocation8], 2176  }
  0x58   :  { %3554 = vsyncadd [#allocation8], 4294965120  ;;  %v91_v0 = vlaneseq  ;;  %v90_v4 = vld [vmem:[#allocation2] sm:$0x3]  ;;  %v113_v5 = vld [vmem:[#allocation4] sm:$0xff]  ;;  %vm117_vm0 = vcmask 261120  }
  0x59   :  { %v114_v6 = vld [vmem:[#allocation4 + $0x8] sm:$0xff]  ;;  %v115_v9 = vld [vmem:[#allocation4 + $0x10] sm:$0xff]  ;;  %v116_v10 = vld [vmem:[#allocation4 + $0x18] sm:$0xff]  ;;  %v3562_v18 = vmov 0.0   ;;  %vm250_vm3 = vcmask 130048   ;;  %vm202_vm4 = vcmask 1046528  }
  0x5a   :  { %v3679_v1 = vshrl.u32 %v91_v0, 7  ;;  %v3216_v8 = vpack.c.bf16 %v114_v6, %v113_v5  ;;  %v3220_v11 = vpack.c.bf16 %v116_v10, %v115_v9  ;;  %v395_v12 = vld [vmem:[#allocation6] sm:$0xff]  ;;  %v396_v13 = vld [vmem:[#allocation6 + $0x8] sm:$0xff]  ;;  %v3688_v16 = vand.u32 127, %v91_v0  ;;  %v397_v22 = vld [vmem:[#allocation6 + $0x10] sm:$0xff]  ;;  %s3565_s5 = smov 32  }
  0x5b   :  { %v3244_v15 = vpack.c.bf16 %v396_v13, %v395_v12  ;;  %v398_v23 = vld [vmem:[#allocation6 + $0x18] sm:$0xff]  ;;  %vm214_vm5 = vcmask 1045504   ;;  %v399_v26 = vld [vmem:[#allocation6 + $0x20] sm:$0xff]  ;;  %v400_v27 = vld [vmem:[#allocation6 + $0x28] sm:$0xff]  ;;  %vm226_vm6 = vcmask 1044480   ;;  %vm238_vm7 = vcmask 1043456  }
  0x5c   :  { %v3682_v2 = vsub.s32 0, %v3679_v1  ;;  %v102_v3 = vsub.s32 1, %v3679_v1  ;;  %3217 = vmatprep.subr.bf16.mxu0 %v3216_v8  ;;  %v3699_v25 = vpack.c.bf16 %v398_v23, %v397_v22  ;;  %v3715_v37 = vpack.c.bf16 %v400_v27, %v399_v26  ;;  %v2853_v44 = vld [vmem:[#allocation7] ss:$0 sm:$0xff]  ;;  %s3566_s7 = smov 64   ;;  %s3567_s8 = smov 16  }
  0x5d   :  { %3219 = vmatpush3.bf16.msra.mxu0 %v3216_v8  ;;  %vm3563_vm8 = vmmov 0   ;;  %v3564_v42 = vmov 0   ;;  %v385_v43 = vand.u32 31, %v3688_v16  ;;  %vm499_vm10 = vcmask 1041409   ;;  %s3568_s4 = smov 48  }
  0x5e   :  { %v96_v7 = vrot.slane %v90_v4, %v3682_v2  ;;  %v103_v14 = vrot.slane %v90_v4, %v102_v3  ;;  %3221 = vmatprep.subr.bf16.mxu0 %v3220_v11  ;;  %vm255_vm11 = vcmask 392192   ;;  %vm258_vm12 = vcmask 523264  }
  0x5f   :  { %vm3751_vm9 = vcmp.lt.s32.totalorder %v385_v43, 16  ;;  %vm276_vm13 = vcmask 654336   ;;  %vm1359_vm14 = vcmask 1040384   ;;  %vm362_vm15 = vcmp.lt.s32.totalorder %v3688_v16, 8 }
  0x60   :  { %98 = vbcast.lane.b32.xlu0 %v96_v7, 256 }
  0x61   :  { %3223 = vmatpush3.bf16.msra.mxu0 %v3220_v11 }
  0x62   :  { %3245 = vmatprep.subr.bf16.mxu0 %v3244_v15 }
  0x64   :  { %105 = vbcast.lane.b32.xlu0 %v103_v14, 256 }
  0xd2   :  { %v99_v17 = vpop.permute.xlu0 %98 }
  0xd3   :  { %vm107_vm1 = vcmp.eq.s32.totalorder %v99_v17, %v3688_v16 }
  0xd4   :  { %v2846_v19 = vsel %vm107_vm1, 1.0, %v3562_v18 }
  0xd5   :  { %3005 = vmatprep.mubr.msk.f32.mxu0 %vm117_vm0, %v2846_v19 }
  0xd6   :  { %v106_v20 = vpop.permute.xlu0 %105 }
  0xd7   :  { %vm108_vm2 = vcmp.eq.s32.totalorder %v106_v20, %v3688_v16 }
  0xd8   :  { %v2847_v21 = vsel %vm108_vm2, 1.0, %v3562_v18  ;;  %vm1362_vm2 = vcmask 1041408  }
  0xd9   :  { %3006 = vmatmul.mubr.msk.f32.vlgmr.msra.gmra.mrb[0].mxu0 %vm117_vm0, %v2847_v21 }
  0xda   :  { %3247 = vmatpush3.bf16.msra.mxu0 %v3244_v15 }
  0xdb   :  { %3038 = vmatprep.subr.bf16.mxu0 %v3562_v18 }
 0x1ac   :  { %v3697_v24 = vpop.f32.mrb[0].mxu0 }
 0x1ad   :  { %v3701_v28 = vpop.f32.mrb[1].mxu0  ;;  %v204_v29 = vrot.slane %v3697_v24, 1  ;;  %v216_v30 = vrot.slane %v3697_v24, 2  ;;  %v228_v31 = vrot.slane %v3697_v24, 3  ;;  %v240_v32 = vrot.slane %v3697_v24, 4 }
 0x1ae   :  { %3035 = vmatprep.mubr.msk.f32.mxu0 %vm250_vm3, %v3701_v28  ;;  %v203_v33 = vrot.slane %v3701_v28, 1  ;;  %v215_v34 = vrot.slane %v3701_v28, 2  ;;  %v227_v35 = vrot.slane %v3701_v28, 3  ;;  %v239_v36 = vrot.slane %v3701_v28, 4 }
 0x1af   :  { %3036 = vmatmul.mubr.msk.f32.vlgmr.msra.gmra.mrb[2].mxu0 %vm250_vm3, %v3697_v24 }
 0x1b0   :  { %3039 = vmatpush3.bf16.msra.mxu0 %v3699_v25  ;;  %3042 = vmatprep.mubr.msk.bf16.mxu0 %vm3563_vm8, %v3562_v18  ;;  %v3723_v38 = vsel %vm202_vm4, %v203_v33, %v204_v29  ;;  %v3728_v39 = vsel %vm214_vm5, %v215_v34, %v216_v30  ;;  %v3733_v40 = vsel %vm226_vm6, %v227_v35, %v228_v31 }
 0x1b1   :  { %3040 = vmatprep.subr.bf16.mxu0 %v3562_v18  ;;  %v3739_v41 = vsel %vm238_vm7, %v239_v36, %v240_v32 }
 0x1b4   :  { %3041 = vmatpush3.bf16.msra.mxu0 %v3715_v37 }
 0x1b5   :  { %3046 = vmatprep.subr.bf16.mxu0 %v3562_v18 }
 0x1b7   :  { %3043 = vmatmul.mubr.bf16.vlgmr.msra.gmra.mrb[4].mxu0 %v3564_v42 }
 0x1b8   :  { %3047 = vmatpush3.bf16.msra.mxu0 %v3699_v25  ;;  %3050 = vmatprep.mubr.msk.bf16.mxu0 %vm3563_vm8, %v3562_v18 }
 0x1b9   :  { %3048 = vmatprep.subr.bf16.mxu0 %v3562_v18 }
 0x1bc   :  { %3049 = vmatpush3.bf16.msra.mxu0 %v3715_v37 }
 0x1bd   :  { %3062 = vmatprep.subr.bf16.mxu0 %v3562_v18 }
 0x282   :  { %v3037_v45 = vpop.f32.mrb[2].mxu0 }
 0x283   :  { %v491_v46 = vadd.f32 %v3037_v45, %v2853_v44  ;;  %v485_v47 = vpop.f32.mrb[3].mxu0 }
 0x284   :  { %v486_v49 = vadd.f32 %v2853_v44, %v485_v47 }
 0x285   :  { %v498_v50 = vrot.slane %v491_v46, 7  ;;  %v503_v51 = vrot.slane %v491_v46, 6  ;;  %v578_v52 = vrot.slane %v491_v46, 5  ;;  %v654_v53 = vrot.slane %v491_v46, 1 }
 0x286   :  { %v502_v54 = vrot.slane %v486_v49, 7  ;;  %v574_v55 = vrot.slane %v486_v49, 1  ;;  %v577_v56 = vrot.slane %v486_v49, 6  ;;  %v653_v57 = vrot.slane %v486_v49, 2 }
 0x287   :  { %v3756_v58 = vsel %vm499_vm10, %v498_v50, %v486_v49  ;;  %v657_v59 = vrot.slane %v486_v49, 5  ;;  %v658_v60 = vrot.slane %v491_v46, 4  ;;  %v733_v61 = vrot.slane %v486_v49, 3 }
 0x288   :  { %v3759_v62 = vsel %vm499_vm10, %v503_v51, %v502_v54  ;;  %v3762_v63 = vsel %vm499_vm10, %v491_v46, %v574_v55  ;;  %v3765_v0 = vsel %vm499_vm10, %v578_v52, %v577_v56  ;;  %v3768_v4 = vsel %vm499_vm10, %v654_v53, %v653_v57 }
 0x289   :  { %v506_v5 = vsel %vm3751_vm9, %v3756_v58, %v3759_v62  ;;  %v581_v6 = vsel %vm3751_vm9, %v3762_v63, %v3765_v0  ;;  %v3779_v7 = vsel %vm499_vm10, %v658_v60, %v657_v59  ;;  %v734_v8 = vrot.slane %v491_v46, 2 }
 0x28a   :  { %v544_v9 = vpop.f32.mrb[4].mxu0  ;;  %v661_v10 = vsel %vm3751_vm9, %v3768_v4, %v3779_v7  ;;  %v737_v11 = vrot.slane %v486_v49, 4  ;;  %v738_v12 = vrot.slane %v491_v46, 3  ;;  %v885_v13 = vsel %vm3751_vm9, %v3779_v7, %v3768_v4 }
 0x28b   :  { %v545_v14 = vadd.f32 %v544_v9, %v506_v5  ;;  %v3044_v15 = vpop.f32.mrb[5].mxu0  ;;  %v3790_v17 = vsel %vm499_vm10, %v734_v8, %v733_v61  ;;  %v957_v19 = vsel %vm3751_vm9, %v3765_v0, %v3762_v63  ;;  %v1029_v20 = vsel %vm3751_vm9, %v3759_v62, %v3756_v58 }
 0x28c   :  { %v547_v21 = vpop.f32.mrb[6].mxu0  ;;  %v3801_v22 = vsel %vm499_vm10, %v738_v12, %v737_v11  ;;  %v262_v15 = vld [vmem:[#allocation4 + $0x28] sm:$0xff] }
 0x28d   :  { %3296 = vtanh.f32 %v545_v14  ;;  %v3045_v23 = vpop.f32.mrb[7].mxu0  ;;  %v741_v26 = vsel %vm3751_vm9, %v3790_v17, %v3801_v22  ;;  %v813_v27 = vsel %vm3751_vm9, %v3801_v22, %v3790_v17  ;;  %v2856_v34 = vmul.f32 -1.442695, %v545_v14 }
 0x28f   :  { %3298 = vpow2.f32 %v2856_v34  ;;  %v264_v34 = vld [vmem:[#allocation4 + $0x38] sm:$0xff] }
 0x297   :  { %v3297_v33 = vpop.eup %3296 }
 0x298   :  { %559 = vrot.lane.b32.xlu1 %v3297_v33, %s3565_s5  ;;  %v263_v33 = vld [vmem:[#allocation4 + $0x30] sm:$0xff] }
 0x299   :  { %v3299_v35 = vpop.eup %3298 }
 0x29a   :  { %v553_v36 = vadd.f32 1.0, %v3299_v35  ;;  %v3228_v35 = vpack.c.bf16 %v264_v34, %v263_v33 }
 0x29c   :  { %3300 = vrcp.f32 %v553_v36 }
 0x2a6   :  { %v3301_v43 = vpop.eup %3300 }
 0x2a7   :  { %v557_v46 = vmul.f32 0.0, %v3301_v43 }
 0x30a   :  { %v560_v44 = vpop.permute.xlu1 %559 }
 0x30b   :  { %v562_v45 = vmul.f32 %v3301_v43, %v560_v44  ;;  %v267_v44 = vld [vmem:[#allocation4 + $0x50] sm:$0xff] }
 0x30d   :  { %564 = vrot.lane.b32.xlu1 %v562_v45, %s3565_s5  ;;  %v268_v45 = vld [vmem:[#allocation4 + $0x58] sm:$0xff] }
 0x37f   :  { %v565_v47 = vpop.permute.xlu1 %564 }
 0x380   :  { %v567_v49 = vadd.f32 %v565_v47, %v557_v46  ;;  %v3236_v47 = vpack.c.bf16 %v268_v45, %v267_v44 }
 0x382   :  { %3302 = vtanh.f32 %v567_v49 }
 0x38c   :  { %v3303_v50 = vpop.eup %3302 }
 0x38d   :  { %570 = vrot.lane.b32.xlu0 %v3303_v50, %s3565_s5  ;;  %v270_v50 = vld [vmem:[#allocation4 + $0x68] sm:$0xff] }
 0x3ff   :  { %v571_v51 = vpop.permute.xlu0 %570 }
 0x400   :  { %v3814_v52 = vmul.f32 %v3301_v43, %v571_v51 }
 0x402   :  { %v582_v53 = vpack.c.bf16 %v3814_v52, %v3814_v52 }
 0x404   :  { %584 = vrot.lane.b32.xlu1 %v582_v53, %s3566_s7 }
 0x476   :  { %v585_v54 = vpop.permute.xlu1 %584 }
 0x477   :  { %3051 = vmatmul.mubr.msk.bf16.vlgmr.msra.gmra.mrb[8].mxu0 %vm117_vm0, %v585_v54 }
 0x478   :  { %3063 = vmatpush3.bf16.msra.mxu0 %v3699_v25  ;;  %3066 = vmatprep.mubr.msk.bf16.mxu0 %vm3563_vm8, %v3562_v18 }
 0x479   :  { %3064 = vmatprep.subr.bf16.mxu0 %v3562_v18 }
 0x47c   :  { %3065 = vmatpush3.bf16.msra.mxu0 %v3715_v37 }
 0x47d   :  { %3078 = vmatprep.subr.bf16.mxu0 %v3562_v18 }
 0x54a   :  { %v623_v55 = vpop.f32.mrb[8].mxu0 }
 0x54b   :  { %v624_v56 = vadd.f32 %v623_v55, %v581_v6  ;;  %v3052_v57 = vpop.f32.mrb[9].mxu0  ;;  %v261_v6 = vld [vmem:[#allocation4 + $0x20] sm:$0xff]  ;;  %v206_v55 = vrot.slane %v3562_v18, 1 }
 0x54c   :  { %v626_v59 = vpop.f32.mrb[10].mxu0  ;;  %v3224_v21 = vpack.c.bf16 %v262_v15, %v261_v6  ;;  %v3569_v6 = vmov 1966171168  }
 0x54d   :  { %3304 = vtanh.f32 %v624_v56  ;;  %v3053_v60 = vpop.f32.mrb[11].mxu0  ;;  %v2858_v5 = vmul.f32 -1.442695, %v624_v56 }
 0x54e   :  { %3225 = vmatprep.subr.bf16.mxu1 %v3224_v21 }
 0x54f   :  { %3306 = vpow2.f32 %v2858_v5  ;;  %3227 = vmatpush3.bf16.msra.mxu1 %v3224_v21 }
 0x550   :  { %3229 = vmatprep.subr.bf16.mxu1 %v3228_v35 }
 0x553   :  { %3231 = vmatpush3.bf16.msra.mxu1 %v3228_v35 }
 0x557   :  { %v3305_v61 = vpop.eup %3304 }
 0x558   :  { %638 = vrot.lane.b32.xlu0 %v3305_v61, %s3565_s5  ;;  %v207_v61 = vsel %vm202_vm4, %v204_v29, %v206_v55 }
 0x559   :  { %v3307_v8 = vpop.eup %3306 }
 0x55a   :  { %v632_v9 = vadd.f32 1.0, %v3307_v8 }
 0x55c   :  { %3308 = vrcp.f32 %v632_v9  ;;  %v230_v9 = vrot.slane %v3562_v18, 3 }
 0x55e   :  { %v231_v29 = vsel %vm226_vm6, %v228_v31, %v230_v9 }
 0x566   :  { %v3827_v11 = vpop.eup %3308 }
 0x567   :  { %v636_v23 = vmul.f32 %v3827_v11, %v567_v49  ;;  %v269_v49 = vld [vmem:[#allocation4 + $0x60] sm:$0xff] }
 0x568   :  { %v3240_v53 = vpack.c.bf16 %v270_v50, %v269_v49 }
 0x5ca   :  { %v639_v12 = vpop.permute.xlu0 %638 }
 0x5cb   :  { %v641_v14 = vmul.f32 %v3827_v11, %v639_v12  ;;  %v242_v12 = vrot.slane %v3562_v18, 4 }
 0x5cd   :  { %643 = vrot.lane.b32.xlu1 %v641_v14, %s3565_s5  ;;  %v243_v14 = vsel %vm238_vm7, %v240_v32, %v242_v12 }
 0x5d1   :  { %208 = vrot.lane.b32.xlu1 %v3723_v38, %s3567_s8 }
 0x5d5   :  { %220 = vrot.lane.b32.xlu1 %v3728_v39, %s3565_s5  ;;  %v265_v39 = vld [vmem:[#allocation4 + $0x40] sm:$0xff] }
 0x5d9   :  { %232 = vrot.lane.b32.xlu1 %v3733_v40, %s3568_s4  ;;  %v266_v40 = vld [vmem:[#allocation4 + $0x48] sm:$0xff] }
 0x5da   :  { %v3232_v43 = vpack.c.bf16 %v266_v40, %v265_v39 }
 0x5dc   :  { %3233 = vmatprep.subr.bf16.mxu1 %v3232_v43 }
 0x5dd   :  { %244 = vrot.lane.b32.xlu1 %v3739_v41, %s3566_s7  ;;  %3235 = vmatpush3.bf16.msra.mxu1 %v3232_v43 }
 0x5de   :  { %3237 = vmatprep.subr.bf16.mxu1 %v3236_v47 }
 0x5e1   :  { %3239 = vmatpush3.bf16.msra.mxu1 %v3236_v47 }
 0x5e2   :  { %3241 = vmatprep.subr.bf16.mxu1 %v3240_v53 }
 0x5e5   :  { %3243 = vmatpush3.bf16.msra.mxu1 %v3240_v53 }
 0x5e6   :  { %3054 = vmatprep.subr.bf16.mxu1 %v3562_v18 }
 0x63f   :  { %v644_v38 = vpop.permute.xlu1 %643 }
 0x640   :  { %v3840_v36 = vadd.f32 %v644_v38, %v636_v23 }
 0x642   :  { %3310 = vtanh.f32 %v3840_v36 }
 0x643   :  { %v209_v41 = vpop.permute.xlu1 %208 }
 0x644   :  { %v251_v56 = vsel %vm250_vm3, %v3701_v28, %v209_v41  ;;  %v218_v28 = vrot.slane %v3562_v18, 2 }
 0x646   :  { %v219_v8 = vsel %vm214_vm5, %v216_v30, %v218_v28  ;;  %v1103_v30 = vunpack.c.l.s4 %v3569_v6 }
 0x647   :  { %v221_v46 = vpop.permute.xlu1 %220 }
 0x648   :  { %v253_v57 = vsel %vm117_vm0, %v251_v56, %v221_v46  ;;  %v1104_v15 = vunpack.c.0.s8 %v1103_v30  ;;  %v2850_v56 = vld [vmem:[#allocation7 + $0x2] ss:$0 sm:$0xff] }
 0x64a   :  { %v3872_v21 = vsub.s32 %v1104_v15, %v3679_v1 }
 0x64b   :  { %v233_v51 = vpop.permute.xlu1 %232 }
 0x64c   :  { %v3311_v54 = vpop.eup %3310  ;;  %v256_v59 = vsel %vm255_vm11, %v253_v57, %v233_v51  ;;  %v1108_v31 = vrot.slane %v3814_v52, %v3872_v21  ;;  %v3570_v57 = vmov 4  }
 0x64d   :  { %649 = vrot.lane.b32.xlu0 %v3311_v54, %s3565_s5 }
 0x64e   :  { %v1109_v39 = vcombine.high %v1108_v31, %v1108_v31  ;;  %v3881_v41 = vrot.slane %v1108_v31, %v3872_v21 }
 0x64f   :  { %v245_v60 = vpop.permute.xlu1 %244 }
 0x650   :  { %v259_v5 = vsel %vm258_vm12, %v256_v59, %v245_v60  ;;  %v3888_v44 = vrot.slane %v1109_v39, %v3872_v21  ;;  %v363_v59 = vsel %vm362_vm15, 6, %v3570_v57 }
 0x651   :  { %210 = vrot.lane.b32.xlu0 %v207_v61, %s3567_s8  ;;  %3028 = vmatprep.mubr.msk.f32.mxu1 %vm276_vm13, %v259_v5  ;;  %vm364_vm1 = vcmp.lt.s32.totalorder %v3679_v1, %v363_v59 }
 0x655   :  { %222 = vrot.lane.b32.xlu0 %v219_v8, %s3565_s5 }
 0x659   :  { %234 = vrot.lane.b32.xlu0 %v231_v29, %s3568_s4 }
 0x65d   :  { %246 = vrot.lane.b32.xlu0 %v243_v14, %s3566_s7 }
 0x6bf   :  { %v650_v23 = vpop.permute.xlu0 %649 }
 0x6c0   :  { %v652_v33 = vmul.f32 %v3827_v11, %v650_v23 }
 0x6c2   :  { %v662_v34 = vpack.c.bf16 %v652_v33, %v652_v33  ;;  %v1133_v38 = vrot.slane %v652_v33, %v3872_v21 }
 0x6c3   :  { %v211_v35 = vpop.permute.xlu0 %210 }
 0x6c4   :  { %v1134_v32 = vcombine.high %v1133_v38, %v1133_v38  ;;  %v1141_v40 = vrot.slane %v1133_v38, %v3872_v21  ;;  %664 = vrot.lane.b32.xlu1 %v662_v34, %s3566_s7  ;;  %v252_v50 = vsel %vm250_vm3, %v3697_v24, %v211_v35 }
 0x6c6   :  { %v1148_v43 = vrot.slane %v1134_v32, %v3872_v21  ;;  %v3885_v52 = vrot.slane %v1141_v40, %v3682_v2 }
 0x6c7   :  { %v223_v11 = vpop.permute.xlu0 %222 }
 0x6c8   :  { %v3891_v45 = vrot.slane %v1148_v43, %v3682_v2  ;;  %v3896_v46 = vsel %vm1359_vm14, %v3881_v41, %v3885_v52  ;;  %v254_v51 = vsel %vm117_vm0, %v252_v50, %v223_v11 }
 0x6ca   :  { %v3901_v47 = vsel %vm1359_vm14, %v3888_v44, %v3891_v45 }
 0x6cb   :  { %v235_v49 = vpop.permute.xlu0 %234 }
 0x6cc   :  { %v257_v53 = vsel %vm255_vm11, %v254_v51, %v235_v49 }
 0x6cf   :  { %v247_v54 = vpop.permute.xlu0 %246 }
 0x6d0   :  { %v260_v55 = vsel %vm258_vm12, %v257_v53, %v247_v54  ;;  %vm1365_vm12 = vcmask 1042432  }
 0x6d1   :  { %3029 = vmatmul.mubr.msk.f32.vlgmr.msra.gmra.mrb[0].mxu1 %vm276_vm13, %v260_v55  ;;  %vm394_vm13 = vcmp.lt.s32.totalorder %v3688_v16, 16 }
 0x6d2   :  { %3055 = vmatpush3.bf16.msra.mxu1 %v3699_v25  ;;  %3058 = vmatprep.mubr.msk.bf16.mxu1 %vm3563_vm8, %v3562_v18 }
 0x6d3   :  { %3056 = vmatprep.subr.bf16.mxu1 %v3562_v18 }
 0x6d6   :  { %3057 = vmatpush3.bf16.msra.mxu1 %v3715_v37 }
 0x6d7   :  { %3070 = vmatprep.subr.bf16.mxu1 %v3562_v18 }
 0x736   :  { %v665_v24 = vpop.permute.xlu1 %664 }
 0x737   :  { %3059 = vmatmul.mubr.msk.bf16.vlgmr.msra.gmra.mrb[4].mxu1 %vm117_vm0, %v665_v24 }
 0x738   :  { %3071 = vmatpush3.bf16.msra.mxu1 %v3699_v25  ;;  %3074 = vmatprep.mubr.msk.bf16.mxu1 %vm3563_vm8, %v3562_v18 }
 0x739   :  { %3072 = vmatprep.subr.bf16.mxu1 %v3562_v18 }
 0x73c   :  { %3073 = vmatpush3.bf16.msra.mxu1 %v3715_v37 }
 0x73d   :  { %3086 = vmatprep.subr.bf16.mxu1 %v3562_v18 }
 0x7a4   :  { %v3030_v60 = vpop.f32.mrb[0].mxu1 }
 0x7a5   :  { %v355_v61 = vadd.f32 %v3030_v60, %v2850_v56  ;;  %v349_v5 = vpop.f32.mrb[1].mxu1 }
 0x7a6   :  { %v350_v28 = vadd.f32 %v2850_v56, %v349_v5 }
 0x7a7   :  { %v359_v8 = vmax.f32 %v355_v61, 0.0 }
 0x7a8   :  { %v358_v9 = vmax.f32 %v350_v28, 0.0 }
 0x7a9   :  { %v366_v29 = vsel %vm364_vm1, %v359_v8, 0.0 }
 0x7aa   :  { %v374_v12 = vsel %vm250_vm3, %v366_v29, -inf  ;;  %v365_v14 = vsel %vm364_vm1, %v358_v9, 0.0 }
 0x7ab   :  { %v375_v6 = vrot.slane %v374_v12, 4  ;;  %v367_v30 = vsel %vm250_vm3, %v365_v14, -inf }
 0x7ac   :  { %v368_v15 = vrot.slane %v367_v30, 4 }
 0x7ad   :  { %v376_v23 = vmax.f32 %v374_v12, %v375_v6 }
 0x7ae   :  { %v369_v31 = vmax.f32 %v367_v30, %v368_v15 }
 0x7af   :  { %v377_v33 = vrot.slane %v376_v23, 2 }
 0x7b0   :  { %v370_v34 = vrot.slane %v369_v31, 2 }
 0x7b1   :  { %v378_v38 = vmax.f32 %v376_v23, %v377_v33 }
 0x7b2   :  { %v371_v35 = vmax.f32 %v369_v31, %v370_v34 }
 0x7b3   :  { %v379_v39 = vrot.slane %v378_v38, 1 }
 0x7b4   :  { %v372_v32 = vrot.slane %v371_v35, 1 }
 0x7b5   :  { %v380_v40 = vmax.f32 %v378_v38, %v379_v39 }
 0x7b6   :  { %v373_v43 = vmax.f32 %v371_v35, %v372_v32 }
 0x7b8   :  { %v3927_v11 = vsel %vm499_vm10, %v380_v40, %v373_v43 }
 0x80a   :  { %v703_v49 = vpop.f32.mrb[4].mxu1 }
 0x80b   :  { %v704_v50 = vadd.f32 %v703_v49, %v661_v10  ;;  %v3060_v51 = vpop.f32.mrb[5].mxu1 }
 0x80c   :  { %v706_v53 = vpop.f32.mrb[6].mxu1 }
 0x80d   :  { %3312 = vtanh.f32 %v704_v50  ;;  %v3061_v54 = vpop.f32.mrb[7].mxu1  ;;  %v2860_v24 = vmul.f32 -1.442695, %v704_v50 }
 0x80f   :  { %3314 = vpow2.f32 %v2860_v24 }
 0x817   :  { %v3313_v55 = vpop.eup %3312 }
 0x818   :  { %718 = vrot.lane.b32.xlu0 %v3313_v55, %s3565_s5 }
 0x819   :  { %v3315_v56 = vpop.eup %3314 }
 0x81a   :  { %v712_v57 = vadd.f32 1.0, %v3315_v56 }
 0x81c   :  { %3316 = vrcp.f32 %v712_v57 }
 0x826   :  { %v3317_v59 = vpop.eup %3316 }
 0x827   :  { %v716_v5 = vmul.f32 %v3317_v59, %v3840_v36 }
 0x88a   :  { %v719_v60 = vpop.permute.xlu0 %718 }
 0x88b   :  { %v721_v61 = vmul.f32 %v3317_v59, %v719_v60 }
 0x88d   :  { %723 = vrot.lane.b32.xlu1 %v721_v61, %s3565_s5 }
 0x8ff   :  { %v724_v10 = vpop.permute.xlu1 %723 }
 0x900   :  { %v726_v28 = vadd.f32 %v724_v10, %v716_v5 }
 0x902   :  { %3318 = vtanh.f32 %v726_v28 }
 0x90c   :  { %v3319_v8 = vpop.eup %3318 }
 0x90d   :  { %729 = vrot.lane.b32.xlu0 %v3319_v8, %s3565_s5 }
 0x97f   :  { %v730_v9 = vpop.permute.xlu0 %729 }
 0x980   :  { %v732_v29 = vmul.f32 %v3317_v59, %v730_v9 }
 0x982   :  { %v742_v12 = vpack.c.bf16 %v732_v29, %v732_v29  ;;  %v1156_v14 = vrot.slane %v732_v29, %v3872_v21 }
 0x984   :  { %v1157_v6 = vcombine.high %v1156_v14, %v1156_v14  ;;  %v1164_v30 = vrot.slane %v1156_v14, %v3872_v21  ;;  %744 = vrot.lane.b32.xlu1 %v742_v12, %s3566_s7 }
 0x986   :  { %v1171_v15 = vrot.slane %v1157_v6, %v3872_v21  ;;  %v3943_v36 = vrot.slane %v1164_v30, %v3682_v2 }
 0x988   :  { %v3946_v23 = vrot.slane %v1171_v15, %v3682_v2  ;;  %v1363_v31 = vsel %vm1362_vm2, %v3896_v46, %v3943_v36 }
 0x98a   :  { %v1364_v33 = vsel %vm1362_vm2, %v3901_v47, %v3946_v23 }
 0x9f6   :  { %v745_v34 = vpop.permute.xlu1 %744 }
 0x9f7   :  { %3067 = vmatmul.mubr.msk.bf16.vlgmr.msra.gmra.mrb[12].mxu0 %vm117_vm0, %v745_v34 }
 0x9f8   :  { %3079 = vmatpush3.bf16.msra.mxu0 %v3699_v25  ;;  %3082 = vmatprep.mubr.msk.bf16.mxu0 %vm3563_vm8, %v3562_v18 }
 0x9f9   :  { %3080 = vmatprep.subr.bf16.mxu0 %v3562_v18 }
 0x9fc   :  { %3081 = vmatpush3.bf16.msra.mxu0 %v3715_v37 }
 0x9fd   :  { %3094 = vmatprep.subr.bf16.mxu0 %v3562_v18 }
 0xaca   :  { %v783_v38 = vpop.f32.mrb[12].mxu0 }
 0xacb   :  { %v784_v46 = vadd.f32 %v783_v38, %v741_v26  ;;  %v3068_v47 = vpop.f32.mrb[13].mxu0 }
 0xacc   :  { %v786_v35 = vpop.f32.mrb[14].mxu0 }
 0xacd   :  { %3320 = vtanh.f32 %v784_v46  ;;  %v3069_v39 = vpop.f32.mrb[15].mxu0  ;;  %v2862_v40 = vmul.f32 -1.442695, %v784_v46 }
 0xacf   :  { %3322 = vpow2.f32 %v2862_v40 }
 0xad7   :  { %v3321_v32 = vpop.eup %3320 }
 0xad8   :  { %798 = vrot.lane.b32.xlu0 %v3321_v32, %s3565_s5 }
 0xad9   :  { %v3323_v43 = vpop.eup %3322 }
 0xada   :  { %v792_v49 = vadd.f32 1.0, %v3323_v43 }
 0xadc   :  { %3324 = vrcp.f32 %v792_v49 }
 0xae6   :  { %v3325_v50 = vpop.eup %3324 }
 0xae7   :  { %v796_v54 = vmul.f32 %v3325_v50, %v726_v28 }
 0xb4a   :  { %v799_v51 = vpop.permute.xlu0 %798 }
 0xb4b   :  { %v801_v53 = vmul.f32 %v3325_v50, %v799_v51 }
 0xb4d   :  { %803 = vrot.lane.b32.xlu1 %v801_v53, %s3565_s5 }
 0xbbf   :  { %v804_v55 = vpop.permute.xlu1 %803 }
 0xbc0   :  { %v806_v26 = vadd.f32 %v804_v55, %v796_v54 }
 0xbc2   :  { %3326 = vtanh.f32 %v806_v26 }
 0xbcc   :  { %v3327_v24 = vpop.eup %3326 }
 0xbcd   :  { %809 = vrot.lane.b32.xlu0 %v3327_v24, %s3565_s5 }
 0xc3f   :  { %v810_v56 = vpop.permute.xlu0 %809 }
 0xc40   :  { %v812_v57 = vmul.f32 %v3325_v50, %v810_v56 }
 0xc42   :  { %v814_v59 = vpack.c.bf16 %v812_v57, %v812_v57  ;;  %v1179_v60 = vrot.slane %v812_v57, %v3872_v21 }
 0xc44   :  { %v1180_v61 = vcombine.high %v1179_v60, %v1179_v60  ;;  %v1187_v5 = vrot.slane %v1179_v60, %v3872_v21  ;;  %816 = vrot.lane.b32.xlu1 %v814_v59, %s3566_s7 }
 0xc46   :  { %v1194_v10 = vrot.slane %v1180_v61, %v3872_v21  ;;  %v3974_v28 = vrot.slane %v1187_v5, %v3682_v2 }
 0xc48   :  { %v3977_v8 = vrot.slane %v1194_v10, %v3682_v2  ;;  %v1366_v9 = vsel %vm1365_vm12, %v1363_v31, %v3974_v28 }
 0xc4a   :  { %v1367_v29 = vsel %vm1365_vm12, %v1364_v33, %v3977_v8 }
 0xcb6   :  { %v817_v12 = vpop.permute.xlu1 %816 }
 0xcb7   :  { %3075 = vmatmul.mubr.msk.bf16.vlgmr.msra.gmra.mrb[8].mxu1 %vm117_vm0, %v817_v12 }
 0xcb8   :  { %3087 = vmatpush3.bf16.msra.mxu1 %v3699_v25  ;;  %3090 = vmatprep.mubr.msk.bf16.mxu1 %vm3563_vm8, %v3562_v18 }
 0xcb9   :  { %3088 = vmatprep.subr.bf16.mxu1 %v3562_v18 }
 0xcbc   :  { %3089 = vmatpush3.bf16.msra.mxu1 %v3715_v37 }
 0xd8a   :  { %v855_v14 = vpop.f32.mrb[8].mxu1 }
 0xd8b   :  { %v856_v6 = vadd.f32 %v855_v14, %v813_v27  ;;  %v3076_v30 = vpop.f32.mrb[9].mxu1 }
 0xd8c   :  { %v858_v15 = vpop.f32.mrb[10].mxu1 }
 0xd8d   :  { %3328 = vtanh.f32 %v856_v6  ;;  %v3077_v31 = vpop.f32.mrb[11].mxu1  ;;  %v2864_v34 = vmul.f32 -1.442695, %v856_v6 }
 0xd8f   :  { %3330 = vpow2.f32 %v2864_v34 }
 0xd97   :  { %v3329_v33 = vpop.eup %3328 }
 0xd98   :  { %870 = vrot.lane.b32.xlu0 %v3329_v33, %s3565_s5 }
 0xd99   :  { %v3331_v38 = vpop.eup %3330 }
 0xd9a   :  { %v864_v46 = vadd.f32 1.0, %v3331_v38 }
 0xd9c   :  { %3332 = vrcp.f32 %v864_v46 }
 0xda6   :  { %v3333_v47 = vpop.eup %3332 }
 0xda7   :  { %v868_v32 = vmul.f32 %v3333_v47, %v806_v26 }
 0xe0a   :  { %v871_v35 = vpop.permute.xlu0 %870 }
 0xe0b   :  { %v873_v39 = vmul.f32 %v3333_v47, %v871_v35 }
 0xe0d   :  { %875 = vrot.lane.b32.xlu1 %v873_v39, %s3565_s5 }
 0xe7f   :  { %v876_v17 = vpop.permute.xlu1 %875 }
 0xe80   :  { %v878_v22 = vadd.f32 %v876_v17, %v868_v32 }
 0xe82   :  { %3334 = vtanh.f32 %v878_v22 }
 0xe8c   :  { %v3335_v27 = vpop.eup %3334 }
 0xe8d   :  { %881 = vrot.lane.b32.xlu0 %v3335_v27, %s3565_s5 }
 0xeff   :  { %v882_v40 = vpop.permute.xlu0 %881 }
 0xf00   :  { %v884_v43 = vmul.f32 %v3333_v47, %v882_v40 }
 0xf02   :  { %v886_v49 = vpack.c.bf16 %v884_v43, %v884_v43  ;;  %v1202_v50 = vrot.slane %v884_v43, %v3872_v21 }
 0xf04   :  { %v1203_v51 = vcombine.high %v1202_v50, %v1202_v50  ;;  %v1210_v53 = vrot.slane %v1202_v50, %v3872_v21  ;;  %888 = vrot.lane.b32.xlu1 %v886_v49, %s3566_s7 }
 0xf06   :  { %v1217_v54 = vrot.slane %v1203_v51, %v3872_v21  ;;  %v4002_v55 = vrot.slane %v1210_v53, %v3682_v2 }
 0xf08   :  { %v4005_v26 = vrot.slane %v1217_v54, %v3682_v2  ;;  %v1368_v24 = vsel %vm238_vm7, %v1366_v9, %v4002_v55 }
 0xf0a   :  { %v1369_v56 = vsel %vm238_vm7, %v1367_v29, %v4005_v26 }
 0xf76   :  { %v889_v57 = vpop.permute.xlu1 %888 }
 0xf77   :  { %3083 = vmatmul.mubr.msk.bf16.vlgmr.msra.gmra.mrb[16].mxu0 %vm117_vm0, %v889_v57 }
 0xf78   :  { %3095 = vmatpush3.bf16.msra.mxu0 %v3699_v25  ;;  %3098 = vmatprep.mubr.msk.bf16.mxu0 %vm3563_vm8, %v3562_v18 }
 0xf79   :  { %3096 = vmatprep.subr.bf16.mxu0 %v3562_v18 }
 0xf7c   :  { %3097 = vmatpush3.bf16.msra.mxu0 %v3715_v37 }
 0xf7d   :  { %3113 = vmatprep.subr.bf16.mxu0 %v3562_v18 }
0x104a   :  { %v927_v59 = vpop.f32.mrb[16].mxu0 }
0x104b   :  { %v928_v60 = vadd.f32 %v927_v59, %v885_v13  ;;  %v3084_v61 = vpop.f32.mrb[17].mxu0 }
0x104c   :  { %v930_v5 = vpop.f32.mrb[18].mxu0 }
0x104d   :  { %3336 = vtanh.f32 %v928_v60  ;;  %v3085_v25 = vpop.f32.mrb[19].mxu0  ;;  %v2866_v9 = vmul.f32 -1.442695, %v928_v60 }
0x104f   :  { %3338 = vpow2.f32 %v2866_v9 }
0x1057   :  { %v3337_v10 = vpop.eup %3336 }
0x1058   :  { %942 = vrot.lane.b32.xlu0 %v3337_v10, %s3565_s5 }
0x1059   :  { %v3339_v29 = vpop.eup %3338 }
0x105a   :  { %v936_v37 = vadd.f32 1.0, %v3339_v29 }
0x105c   :  { %3340 = vrcp.f32 %v936_v37 }
0x1066   :  { %v3341_v12 = vpop.eup %3340 }
0x1067   :  { %v940_v30 = vmul.f32 %v3341_v12, %v878_v22 }
0x10ca   :  { %v943_v14 = vpop.permute.xlu0 %942 }
0x10cb   :  { %v945_v6 = vmul.f32 %v3341_v12, %v943_v14 }
0x10cd   :  { %947 = vrot.lane.b32.xlu1 %v945_v6, %s3565_s5 }
0x113f   :  { %v948_v4 = vpop.permute.xlu1 %947 }
0x1140   :  { %v950_v7 = vadd.f32 %v948_v4, %v940_v30 }
0x1142   :  { %3342 = vtanh.f32 %v950_v7 }
0x114c   :  { %v3343_v13 = vpop.eup %3342 }
0x114d   :  { %953 = vrot.lane.b32.xlu0 %v3343_v13, %s3565_s5 }
0x11bf   :  { %v954_v15 = vpop.permute.xlu0 %953 }
0x11c0   :  { %v956_v31 = vmul.f32 %v3341_v12, %v954_v15 }
0x11c2   :  { %v958_v33 = vpack.c.bf16 %v956_v31, %v956_v31  ;;  %v1225_v34 = vrot.slane %v956_v31, %v3872_v21 }
0x11c4   :  { %v1226_v38 = vcombine.high %v1225_v34, %v1225_v34  ;;  %v1233_v46 = vrot.slane %v1225_v34, %v3872_v21  ;;  %960 = vrot.lane.b32.xlu1 %v958_v33, %s3566_s7 }
0x11c6   :  { %v1240_v47 = vrot.slane %v1226_v38, %v3872_v21  ;;  %v4031_v35 = vrot.slane %v1233_v46, %v3682_v2 }
0x11c8   :  { %v4034_v39 = vrot.slane %v1240_v47, %v3682_v2  ;;  %v1370_v32 = vsel %vm226_vm6, %v1368_v24, %v4031_v35 }
0x11ca   :  { %v1371_v17 = vsel %vm226_vm6, %v1369_v56, %v4034_v39 }
0x1236   :  { %v961_v22 = vpop.permute.xlu1 %960 }
0x1237   :  { %3091 = vmatmul.mubr.msk.bf16.vlgmr.msra.gmra.mrb[12].mxu1 %vm117_vm0, %v961_v22 }
0x130a   :  { %v999_v27 = vpop.f32.mrb[12].mxu1 }
0x130b   :  { %v1000_v40 = vadd.f32 %v999_v27, %v957_v19  ;;  %v3092_v43 = vpop.f32.mrb[13].mxu1 }
0x130c   :  { %v1002_v49 = vpop.f32.mrb[14].mxu1  ;;  %v402_v43 = vld [vmem:[#allocation6 + $0x38] sm:$0xff] }
0x130d   :  { %3344 = vtanh.f32 %v1000_v40  ;;  %v3093_v50 = vpop.f32.mrb[15].mxu1  ;;  %v2868_v53 = vmul.f32 -1.442695, %v1000_v40  ;;  %v401_v40 = vld [vmem:[#allocation6 + $0x30] sm:$0xff] }
0x130e   :  { %v3248_v49 = vpack.c.bf16 %v402_v43, %v401_v40 }
0x130f   :  { %3346 = vpow2.f32 %v2868_v53  ;;  %v403_v53 = vld [vmem:[#allocation6 + $0x40] sm:$0xff] }
0x1310   :  { %3249 = vmatprep.subr.bf16.mxu1 %v3248_v49 }
0x1311   :  { %3251 = vmatpush3.bf16.msra.mxu1 %v3248_v49 }
0x1317   :  { %v3345_v51 = vpop.eup %3344 }
0x1318   :  { %1014 = vrot.lane.b32.xlu0 %v3345_v51, %s3565_s5 }
0x1319   :  { %v3347_v54 = vpop.eup %3346 }
0x131a   :  { %v1008_v24 = vadd.f32 1.0, %v3347_v54  ;;  %v404_v54 = vld [vmem:[#allocation6 + $0x48] sm:$0xff] }
0x131c   :  { %3348 = vrcp.f32 %v1008_v24  ;;  %v3252_v24 = vpack.c.bf16 %v404_v54, %v403_v53 }
0x131e   :  { %3253 = vmatprep.subr.bf16.mxu1 %v3252_v24 }
0x131f   :  { %3255 = vmatpush3.bf16.msra.mxu1 %v3252_v24 }
0x1320   :  { %3121 = vmatprep.subr.bf16.mxu1 %v3562_v18 }
0x1326   :  { %v3349_v56 = vpop.eup %3348 }
0x1327   :  { %v1012_v60 = vmul.f32 %v3349_v56, %v950_v7 }
0x138a   :  { %v1015_v57 = vpop.permute.xlu0 %1014 }
0x138b   :  { %v1017_v59 = vmul.f32 %v3349_v56, %v1015_v57  ;;  %v406_v57 = vld [vmem:[#allocation6 + $0x58] sm:$0xff] }
0x138d   :  { %1019 = vrot.lane.b32.xlu1 %v1017_v59, %s3565_s5 }
0x13ff   :  { %v1020_v63 = vpop.permute.xlu1 %1019 }
0x1400   :  { %v1022_v0 = vadd.f32 %v1020_v63, %v1012_v60 }
0x1402   :  { %3350 = vtanh.f32 %v1022_v0 }
0x140c   :  { %v3351_v19 = vpop.eup %3350 }
0x140d   :  { %1025 = vrot.lane.b32.xlu0 %v3351_v19, %s3565_s5  ;;  %v407_v19 = vld [vmem:[#allocation6 + $0x60] sm:$0xff] }
0x147f   :  { %v1026_v61 = vpop.permute.xlu0 %1025 }
0x1480   :  { %v1028_v5 = vmul.f32 %v3349_v56, %v1026_v61  ;;  %v405_v56 = vld [vmem:[#allocation6 + $0x50] sm:$0xff]  ;;  %v408_v61 = vld [vmem:[#allocation6 + $0x68] sm:$0xff] }
0x1481   :  { %v4071_v60 = vpack.c.bf16 %v406_v57, %v405_v56 }
0x1482   :  { %v1030_v25 = vpack.c.bf16 %v1028_v5, %v1028_v5  ;;  %v1248_v10 = vrot.slane %v1028_v5, %v3872_v21 }
0x1484   :  { %v1249_v9 = vcombine.high %v1248_v10, %v1248_v10  ;;  %v1256_v29 = vrot.slane %v1248_v10, %v3872_v21  ;;  %1032 = vrot.lane.b32.xlu1 %v1030_v25, %s3566_s7 }
0x1486   :  { %v1263_v37 = vrot.slane %v1249_v9, %v3872_v21  ;;  %v1342_v12 = vrot.slane %v1256_v29, %v3682_v2  ;;  %v4080_v9 = vpack.c.bf16 %v408_v61, %v407_v19 }
0x1488   :  { %v1372_v14 = vsel %vm214_vm5, %v1370_v32, %v1342_v12  ;;  %v1346_v6 = vrot.slane %v1263_v37, %v3682_v2 }
0x148a   :  { %v4057_v30 = vsel %vm214_vm5, %v1371_v17, %v1346_v6 }
0x14f6   :  { %v1033_v4 = vpop.permute.xlu1 %1032 }
0x14f7   :  { %3099 = vmatmul.mubr.msk.bf16.vlgmr.msra.gmra.mrb[20].mxu0 %vm117_vm0, %v1033_v4 }
0x14f8   :  { %3117 = vmatprep.mubr.msk.bf16.mxu0 %vm3563_vm8, %v3562_v18  ;;  %3114 = vmatpush3.bf16.msra.mxu0 %v4071_v60 }
0x14f9   :  { %3115 = vmatprep.subr.bf16.mxu0 %v3562_v18 }
0x14fc   :  { %3116 = vmatpush3.bf16.msra.mxu0 %v4080_v9 }
0x14fd   :  { %3129 = vmatprep.subr.bf16.mxu0 %v3562_v18 }
0x14ff   :  { %3118 = vmatmul.mubr.bf16.vlgmr.msra.gmra.mrb[24].mxu0 %v3564_v42 }
0x1500   :  { %3130 = vmatpush3.bf16.msra.mxu0 %v4071_v60  ;;  %3133 = vmatprep.mubr.msk.bf16.mxu0 %vm3563_vm8, %v3562_v18 }
0x1501   :  { %3131 = vmatprep.subr.bf16.mxu0 %v3562_v18 }
0x1504   :  { %3132 = vmatpush3.bf16.msra.mxu0 %v4080_v9 }
0x1505   :  { %3145 = vmatprep.subr.bf16.mxu0 %v3562_v18 }
0x15ca   :  { %v1071_v7 = vpop.f32.mrb[20].mxu0 }
0x15cb   :  { %v1072_v13 = vadd.f32 %v1071_v7, %v1029_v20  ;;  %v3100_v15 = vpop.f32.mrb[21].mxu0 }
0x15cc   :  { %v1074_v31 = vpop.f32.mrb[22].mxu0 }
0x15cd   :  { %3352 = vtanh.f32 %v1072_v13  ;;  %v3101_v33 = vpop.f32.mrb[23].mxu0  ;;  %v2870_v38 = vmul.f32 -1.442695, %v1072_v13 }
0x15cf   :  { %3354 = vpow2.f32 %v2870_v38 }
0x15d2   :  { %v1549_v33 = vpop.f32.mrb[24].mxu0 }
0x15d7   :  { %v3353_v34 = vpop.eup %3352 }
0x15d8   :  { %1086 = vrot.lane.b32.xlu0 %v3353_v34, %s3565_s5  ;;  %v3119_v34 = vpop.f32.mrb[25].mxu0 }
0x15d9   :  { %v3355_v46 = vpop.eup %3354  ;;  %v1552_v38 = vpop.f32.mrb[26].mxu0 }
0x15da   :  { %v1080_v47 = vadd.f32 1.0, %v3355_v46  ;;  %v3120_v46 = vpop.f32.mrb[27].mxu0 }
0x15dc   :  { %3356 = vrcp.f32 %v1080_v47  ;;  %v2871_v47 = vld [vmem:[#allocation7 + $0x1] ss:$0 sm:$0xff] }
0x15e6   :  { %v3357_v32 = vpop.eup %3356 }
0x15e7   :  { %v1084_v27 = vmul.f32 %v3357_v32, %v1022_v0 }
0x164a   :  { %v1087_v17 = vpop.permute.xlu0 %1086 }
0x164b   :  { %v1089_v22 = vmul.f32 %v3357_v32, %v1087_v17 }
0x164d   :  { %1091 = vrot.lane.b32.xlu1 %v1089_v22, %s3565_s5 }
0x16bf   :  { %v1092_v58 = vpop.permute.xlu1 %1091 }
0x16c0   :  { %v1094_v62 = vadd.f32 %v1092_v58, %v1084_v27 }
0x16c2   :  { %3358 = vtanh.f32 %v1094_v62 }
0x16cc   :  { %v3359_v20 = vpop.eup %3358 }
0x16cd   :  { %1097 = vrot.lane.b32.xlu0 %v3359_v20, %s3565_s5 }
0x173f   :  { %v1098_v50 = vpop.permute.xlu0 %1097 }
0x1740   :  { %v1100_v51 = vmul.f32 %v3357_v32, %v1098_v50 }
0x1742   :  { %v1271_v59 = vrot.slane %v1100_v51, %v3872_v21 }
0x1744   :  { %v1272_v63 = vcombine.high %v1271_v59, %v1271_v59  ;;  %v1279_v0 = vrot.slane %v1271_v59, %v3872_v21 }
0x1746   :  { %v1286_v5 = vrot.slane %v1272_v63, %v3872_v21  ;;  %v1386_v25 = vsel %vm1359_vm14, %v1279_v0, %v1342_v12  ;;  %v1352_v10 = vrot.slane %v1279_v0, %v3682_v2 }
0x1747   :  { %v1388_v29 = vsel %vm1362_vm2, %v1386_v25, %v4031_v35  ;;  %v1379_v35 = vrot.slane %v3881_v41, %v3682_v2 }
0x1748   :  { %v1374_v37 = vsel %vm202_vm4, %v1372_v14, %v1352_v10  ;;  %v1390_v4 = vsel %vm1365_vm12, %v1388_v29, %v4002_v55  ;;  %v1356_v7 = vrot.slane %v1286_v5, %v3682_v2  ;;  %v1387_v13 = vsel %vm1359_vm14, %v1286_v5, %v1346_v6 }
0x1749   :  { %1402 = vrot.lane.b32.xlu1 %v1374_v37, %s3566_s7  ;;  %v1392_v12 = vsel %vm238_vm7, %v1390_v4, %v3974_v28  ;;  %v1389_v15 = vsel %vm1362_vm2, %v1387_v13, %v4034_v39  ;;  %v1383_v28 = vrot.slane %v3888_v44, %v3682_v2 }
0x174a   :  { %v1394_v55 = vsel %vm226_vm6, %v1392_v12, %v3943_v36  ;;  %v1391_v14 = vsel %vm1365_vm12, %v1389_v15, %v4005_v26  ;;  %v1375_v41 = vsel %vm202_vm4, %v4057_v30, %v1356_v7 }
0x174b   :  { %v1396_v6 = vsel %vm214_vm5, %v1394_v55, %v3885_v52  ;;  %v1393_v39 = vsel %vm238_vm7, %v1391_v14, %v3977_v8 }
0x174c   :  { %v1398_v31 = vsel %vm202_vm4, %v1396_v6, %v1379_v35  ;;  %v1395_v36 = vsel %vm226_vm6, %v1393_v39, %v3946_v23 }
0x174d   :  { %1410 = vrot.lane.b32.xlu0 %v1398_v31, %s3566_s7  ;;  %1404 = vrot.lane.b32.xlu1 %v1375_v41, %s3566_s7  ;;  %v1397_v42 = vsel %vm214_vm5, %v1395_v36, %v3891_v45 }
0x174e   :  { %v1399_v52 = vsel %vm202_vm4, %v1397_v42, %v1383_v28 }
0x1751   :  { %1412 = vrot.lane.b32.xlu0 %v1399_v52, %s3566_s7 }
0x17bb   :  { %v1403_v44 = vpop.permute.xlu1 %1402 }
0x17bf   :  { %v1411_v23 = vpop.permute.xlu0 %1410  ;;  %v1405_v45 = vpop.permute.xlu1 %1404 }
0x17c0   :  { %v1416_v8 = vsel %vm394_vm13, %v1403_v44, %v1411_v23 }
0x17c1   :  { %3110 = vmatprep.mubr.msk.f32.mxu1 %vm117_vm0, %v1416_v8 }
0x17c3   :  { %v1413_v26 = vpop.permute.xlu0 %1412 }
0x17c4   :  { %v1417_v30 = vsel %vm394_vm13, %v1405_v45, %v1413_v26 }
0x17c5   :  { %3111 = vmatmul.mubr.msk.f32.vlgmr.msra.gmra.mrb[2].mxu1 %vm117_vm0, %v1417_v30 }
0x17c6   :  { %3122 = vmatpush3.bf16.msra.mxu1 %v4071_v60  ;;  %3125 = vmatprep.mubr.msk.bf16.mxu1 %vm3563_vm8, %v3562_v18 }
0x17c7   :  { %3123 = vmatprep.subr.bf16.mxu1 %v3562_v18 }
0x17ca   :  { %3124 = vmatpush3.bf16.msra.mxu1 %v4080_v9 }
0x17cb   :  { %3137 = vmatprep.subr.bf16.mxu1 %v3562_v18 }
0x1898   :  { %v3112_v32 = vpop.f32.mrb[2].mxu1 }
0x1899   :  { %v1500_v17 = vadd.f32 %v3112_v32, %v2871_v47  ;;  %v1494_v22 = vpop.f32.mrb[3].mxu1 }
0x189a   :  { %v1495_v27 = vadd.f32 %v2871_v47, %v1494_v22 }
0x189b   :  { %v1507_v58 = vrot.slane %v1500_v17, 7  ;;  %v1511_v62 = vrot.slane %v1500_v17, 6  ;;  %v1583_v20 = vrot.slane %v1500_v17, 5  ;;  %v1659_v40 = vrot.slane %v1500_v17, 1 }
0x189c   :  { %v1510_v43 = vrot.slane %v1495_v27, 7  ;;  %v1579_v49 = vrot.slane %v1495_v27, 1  ;;  %v1582_v50 = vrot.slane %v1495_v27, 6  ;;  %v1658_v51 = vrot.slane %v1495_v27, 2 }
0x189d   :  { %v4140_v53 = vsel %vm499_vm10, %v1507_v58, %v1495_v27  ;;  %v1662_v54 = vrot.slane %v1495_v27, 5  ;;  %v1663_v24 = vrot.slane %v1500_v17, 4  ;;  %v1738_v56 = vrot.slane %v1495_v27, 3 }
0x189e   :  { %v4143_v57 = vsel %vm499_vm10, %v1511_v62, %v1510_v43  ;;  %v4146_v59 = vsel %vm499_vm10, %v1500_v17, %v1579_v49  ;;  %v4149_v63 = vsel %vm499_vm10, %v1583_v20, %v1582_v50  ;;  %v4152_v0 = vsel %vm499_vm10, %v1659_v40, %v1658_v51 }
0x189f   :  { %v1514_v19 = vsel %vm3751_vm9, %v4140_v53, %v4143_v57  ;;  %v1586_v61 = vsel %vm3751_vm9, %v4146_v59, %v4149_v63  ;;  %v4163_v5 = vsel %vm499_vm10, %v1663_v24, %v1662_v54  ;;  %v1739_v25 = vrot.slane %v1500_v17, 2 }
0x18a0   :  { %v1550_v10 = vadd.f32 %v1549_v33, %v1514_v19  ;;  %v1666_v29 = vsel %vm3751_vm9, %v4152_v0, %v4163_v5  ;;  %v1742_v37 = vrot.slane %v1495_v27, 4  ;;  %v1743_v4 = vrot.slane %v1500_v17, 3 }
0x18a1   :  { %v4170_v7 = vsel %vm499_vm10, %v1739_v25, %v1738_v56  ;;  %v1890_v13 = vsel %vm3751_vm9, %v4163_v5, %v4152_v0  ;;  %v1962_v12 = vsel %vm3751_vm9, %v4149_v63, %v4146_v59  ;;  %v2034_v15 = vsel %vm3751_vm9, %v4143_v57, %v4140_v53 }
0x18a2   :  { %3360 = vtanh.f32 %v1550_v10  ;;  %v4185_v35 = vsel %vm499_vm10, %v1743_v4, %v1742_v37  ;;  %v2874_v28 = vmul.f32 -1.442695, %v1550_v10 }
0x18a3   :  { %v1746_v55 = vsel %vm3751_vm9, %v4170_v7, %v4185_v35  ;;  %v1818_v14 = vsel %vm3751_vm9, %v4185_v35, %v4170_v7 }
0x18a4   :  { %3362 = vpow2.f32 %v2874_v28 }
0x18ac   :  { %v3361_v6 = vpop.eup %3360 }
0x18ad   :  { %1564 = vrot.lane.b32.xlu1 %v3361_v6, %s3565_s5 }
0x18ae   :  { %v3363_v39 = vpop.eup %3362 }
0x18af   :  { %v1558_v31 = vadd.f32 1.0, %v3363_v39 }
0x18b1   :  { %3364 = vrcp.f32 %v1558_v31 }
0x18bb   :  { %v3365_v41 = vpop.eup %3364 }
0x18bc   :  { %v1562_v52 = vmul.f32 0.0, %v3365_v41 }
0x191f   :  { %v1565_v36 = vpop.permute.xlu1 %1564 }
0x1920   :  { %v1567_v42 = vmul.f32 %v3365_v41, %v1565_v36 }
0x1922   :  { %1569 = vrot.lane.b32.xlu0 %v1567_v42, %s3565_s5 }
0x1994   :  { %v1570_v44 = vpop.permute.xlu0 %1569 }
0x1995   :  { %v1572_v23 = vadd.f32 %v1570_v44, %v1562_v52 }
0x1997   :  { %3366 = vtanh.f32 %v1572_v23 }
0x19a1   :  { %v3367_v8 = vpop.eup %3366 }
0x19a2   :  { %1575 = vrot.lane.b32.xlu1 %v3367_v8, %s3565_s5 }
0x1a14   :  { %v1576_v45 = vpop.permute.xlu1 %1575 }
0x1a15   :  { %v1578_v26 = vmul.f32 %v3365_v41, %v1576_v45 }
0x1a17   :  { %v1587_v30 = vpack.c.bf16 %v1578_v26, %v1578_v26  ;;  %v2113_v24 = vrot.slane %v1578_v26, %v3872_v21 }
0x1a19   :  { %1589 = vrot.lane.b32.xlu0 %v1587_v30, %s3566_s7  ;;  %v2114_v25 = vcombine.high %v2113_v24, %v2113_v24  ;;  %v4214_v4 = vrot.slane %v2113_v24, %v3872_v21 }
0x1a1b   :  { %v4221_v39 = vrot.slane %v2114_v25, %v3872_v21 }
0x1a8b   :  { %v1590_v33 = vpop.permute.xlu0 %1589 }
0x1a8c   :  { %3126 = vmatmul.mubr.msk.bf16.vlgmr.msra.gmra.mrb[16].mxu1 %vm117_vm0, %v1590_v33 }
0x1a8d   :  { %3138 = vmatpush3.bf16.msra.mxu1 %v4071_v60  ;;  %3141 = vmatprep.mubr.msk.bf16.mxu1 %vm3563_vm8, %v3562_v18 }
0x1a8e   :  { %3139 = vmatprep.subr.bf16.mxu1 %v3562_v18 }
0x1a91   :  { %3140 = vmatpush3.bf16.msra.mxu1 %v4080_v9 }
0x1a92   :  { %3153 = vmatprep.subr.bf16.mxu1 %v3562_v18 }
0x1b5f   :  { %v1628_v34 = vpop.f32.mrb[16].mxu1 }
0x1b60   :  { %v1629_v38 = vadd.f32 %v1628_v34, %v1586_v61  ;;  %v3127_v46 = vpop.f32.mrb[17].mxu1 }
0x1b61   :  { %v1631_v47 = vpop.f32.mrb[18].mxu1 }
0x1b62   :  { %3368 = vtanh.f32 %v1629_v38  ;;  %v3128_v32 = vpop.f32.mrb[19].mxu1  ;;  %v2876_v22 = vmul.f32 -1.442695, %v1629_v38 }
0x1b64   :  { %3370 = vpow2.f32 %v2876_v22 }
0x1b6c   :  { %v3369_v17 = vpop.eup %3368 }
0x1b6d   :  { %1643 = vrot.lane.b32.xlu1 %v3369_v17, %s3565_s5 }
0x1b6e   :  { %v3371_v27 = vpop.eup %3370 }
0x1b6f   :  { %v1637_v58 = vadd.f32 1.0, %v3371_v27 }
0x1b71   :  { %3372 = vrcp.f32 %v1637_v58 }
0x1b7b   :  { %v3373_v62 = vpop.eup %3372 }
0x1b7c   :  { %v1641_v43 = vmul.f32 %v3373_v62, %v1572_v23 }
0x1bdf   :  { %v1644_v20 = vpop.permute.xlu1 %1643 }
0x1be0   :  { %v1646_v40 = vmul.f32 %v3373_v62, %v1644_v20 }
0x1be2   :  { %1648 = vrot.lane.b32.xlu0 %v1646_v40, %s3565_s5 }
0x1c54   :  { %v1649_v49 = vpop.permute.xlu0 %1648 }
0x1c55   :  { %v1651_v50 = vadd.f32 %v1649_v49, %v1641_v43 }
0x1c57   :  { %3374 = vtanh.f32 %v1651_v50 }
0x1c61   :  { %v3375_v51 = vpop.eup %3374 }
0x1c62   :  { %1654 = vrot.lane.b32.xlu1 %v3375_v51, %s3565_s5 }
0x1cd4   :  { %v1655_v54 = vpop.permute.xlu1 %1654 }
0x1cd5   :  { %v1657_v56 = vmul.f32 %v3373_v62, %v1655_v54 }
0x1cd7   :  { %v1667_v19 = vpack.c.bf16 %v1657_v56, %v1657_v56  ;;  %v2138_v61 = vrot.slane %v1657_v56, %v3872_v21 }
0x1cd9   :  { %v2139_v10 = vcombine.high %v2138_v61, %v2138_v61  ;;  %v2146_v37 = vrot.slane %v2138_v61, %v3872_v21  ;;  %1669 = vrot.lane.b32.xlu0 %v1667_v19, %s3566_s7 }
0x1cdb   :  { %v2153_v6 = vrot.slane %v2139_v10, %v3872_v21  ;;  %v4218_v28 = vrot.slane %v2146_v37, %v3682_v2 }
0x1cdd   :  { %v4224_v31 = vrot.slane %v2153_v6, %v3682_v2  ;;  %v2364_v41 = vsel %vm1359_vm14, %v4214_v4, %v4218_v28 }
0x1cdf   :  { %v2365_v36 = vsel %vm1359_vm14, %v4221_v39, %v4224_v31 }
0x1d4b   :  { %v1670_v42 = vpop.permute.xlu0 %1669 }
0x1d4c   :  { %3134 = vmatmul.mubr.msk.bf16.vlgmr.msra.gmra.mrb[28].mxu0 %vm117_vm0, %v1670_v42 }
0x1d4d   :  { %3146 = vmatpush3.bf16.msra.mxu0 %v4071_v60  ;;  %3149 = vmatprep.mubr.msk.bf16.mxu0 %vm3563_vm8, %v3562_v18 }
0x1d4e   :  { %3147 = vmatprep.subr.bf16.mxu0 %v3562_v18 }
0x1d51   :  { %3148 = vmatpush3.bf16.msra.mxu0 %v4080_v9 }
0x1d52   :  { %3161 = vmatprep.subr.bf16.mxu0 %v3562_v18 }
0x1e1f   :  { %v1708_v52 = vpop.f32.mrb[28].mxu0 }
0x1e20   :  { %v1709_v44 = vadd.f32 %v1708_v52, %v1666_v29  ;;  %v3135_v23 = vpop.f32.mrb[29].mxu0 }
0x1e21   :  { %v1711_v8 = vpop.f32.mrb[30].mxu0 }
0x1e22   :  { %3376 = vtanh.f32 %v1709_v44  ;;  %v3136_v45 = vpop.f32.mrb[31].mxu0  ;;  %v2878_v30 = vmul.f32 -1.442695, %v1709_v44 }
0x1e24   :  { %3378 = vpow2.f32 %v2878_v30 }
0x1e2c   :  { %v3377_v26 = vpop.eup %3376 }
0x1e2d   :  { %1723 = vrot.lane.b32.xlu1 %v3377_v26, %s3565_s5 }
0x1e2e   :  { %v3379_v33 = vpop.eup %3378 }
0x1e2f   :  { %v1717_v34 = vadd.f32 1.0, %v3379_v33 }
0x1e31   :  { %3380 = vrcp.f32 %v1717_v34 }
0x1e3b   :  { %v3381_v38 = vpop.eup %3380 }
0x1e3c   :  { %v1721_v32 = vmul.f32 %v3381_v38, %v1651_v50 }
0x1e9f   :  { %v1724_v46 = vpop.permute.xlu1 %1723 }
0x1ea0   :  { %v1726_v47 = vmul.f32 %v3381_v38, %v1724_v46 }
0x1ea2   :  { %1728 = vrot.lane.b32.xlu0 %v1726_v47, %s3565_s5 }
0x1f14   :  { %v1729_v17 = vpop.permute.xlu0 %1728 }
0x1f15   :  { %v1731_v29 = vadd.f32 %v1729_v17, %v1721_v32 }
0x1f17   :  { %3382 = vtanh.f32 %v1731_v29 }
0x1f21   :  { %v3383_v22 = vpop.eup %3382 }
0x1f22   :  { %1734 = vrot.lane.b32.xlu1 %v3383_v22, %s3565_s5 }
0x1f94   :  { %v1735_v27 = vpop.permute.xlu1 %1734 }
0x1f95   :  { %v1737_v58 = vmul.f32 %v3381_v38, %v1735_v27 }
0x1f97   :  { %v1747_v62 = vpack.c.bf16 %v1737_v58, %v1737_v58  ;;  %v2161_v20 = vrot.slane %v1737_v58, %v3872_v21 }
0x1f99   :  { %v2162_v40 = vcombine.high %v2161_v20, %v2161_v20  ;;  %v2169_v43 = vrot.slane %v2161_v20, %v3872_v21  ;;  %1749 = vrot.lane.b32.xlu0 %v1747_v62, %s3566_s7 }
0x1f9b   :  { %v2176_v49 = vrot.slane %v2162_v40, %v3872_v21  ;;  %v4252_v50 = vrot.slane %v2169_v43, %v3682_v2 }
0x1f9d   :  { %v4255_v51 = vrot.slane %v2176_v49, %v3682_v2  ;;  %v2366_v54 = vsel %vm1362_vm2, %v2364_v41, %v4252_v50 }
0x1f9f   :  { %v2367_v24 = vsel %vm1362_vm2, %v2365_v36, %v4255_v51 }
0x200b   :  { %v1750_v56 = vpop.permute.xlu0 %1749 }
0x200c   :  { %3142 = vmatmul.mubr.msk.bf16.vlgmr.msra.gmra.mrb[20].mxu1 %vm117_vm0, %v1750_v56 }
0x200d   :  { %3154 = vmatpush3.bf16.msra.mxu1 %v4071_v60  ;;  %3157 = vmatprep.mubr.msk.bf16.mxu1 %vm3563_vm8, %v3562_v18 }
0x200e   :  { %3155 = vmatprep.subr.bf16.mxu1 %v3562_v18 }
0x2011   :  { %3156 = vmatpush3.bf16.msra.mxu1 %v4080_v9 }
0x2012   :  { %3169 = vmatprep.subr.bf16.mxu1 %v3562_v18 }
0x20df   :  { %v1788_v19 = vpop.f32.mrb[20].mxu1 }
0x20e0   :  { %v1789_v61 = vadd.f32 %v1788_v19, %v1746_v55  ;;  %v3143_v25 = vpop.f32.mrb[21].mxu1 }
0x20e1   :  { %v1791_v10 = vpop.f32.mrb[22].mxu1 }
0x20e2   :  { %3384 = vtanh.f32 %v1789_v61  ;;  %v3144_v37 = vpop.f32.mrb[23].mxu1  ;;  %v2880_v41 = vmul.f32 -1.442695, %v1789_v61 }
0x20e4   :  { %3386 = vpow2.f32 %v2880_v41 }
0x20ec   :  { %v3385_v6 = vpop.eup %3384 }
0x20ed   :  { %1803 = vrot.lane.b32.xlu1 %v3385_v6, %s3565_s5 }
0x20ee   :  { %v3387_v36 = vpop.eup %3386 }
0x20ef   :  { %v1797_v42 = vadd.f32 1.0, %v3387_v36 }
0x20f1   :  { %3388 = vrcp.f32 %v1797_v42 }
0x20fb   :  { %v3389_v52 = vpop.eup %3388 }
0x20fc   :  { %v1801_v8 = vmul.f32 %v3389_v52, %v1731_v29 }
0x215f   :  { %v1804_v44 = vpop.permute.xlu1 %1803 }
0x2160   :  { %v1806_v23 = vmul.f32 %v3389_v52, %v1804_v44 }
0x2162   :  { %1808 = vrot.lane.b32.xlu0 %v1806_v23, %s3565_s5 }
0x21d4   :  { %v1809_v45 = vpop.permute.xlu0 %1808 }
0x21d5   :  { %v1811_v55 = vadd.f32 %v1809_v45, %v1801_v8 }
0x21d7   :  { %3390 = vtanh.f32 %v1811_v55 }
0x21e1   :  { %v3391_v26 = vpop.eup %3390 }
0x21e2   :  { %1814 = vrot.lane.b32.xlu1 %v3391_v26, %s3565_s5 }
0x2254   :  { %v1815_v30 = vpop.permute.xlu1 %1814 }
0x2255   :  { %v1817_v33 = vmul.f32 %v3389_v52, %v1815_v30 }
0x2257   :  { %v1819_v34 = vpack.c.bf16 %v1817_v33, %v1817_v33  ;;  %v2184_v38 = vrot.slane %v1817_v33, %v3872_v21 }
0x2259   :  { %v2185_v46 = vcombine.high %v2184_v38, %v2184_v38  ;;  %v2192_v47 = vrot.slane %v2184_v38, %v3872_v21  ;;  %1821 = vrot.lane.b32.xlu0 %v1819_v34, %s3566_s7 }
0x225b   :  { %v2199_v32 = vrot.slane %v2185_v46, %v3872_v21  ;;  %v4281_v17 = vrot.slane %v2192_v47, %v3682_v2 }
0x225d   :  { %v4284_v29 = vrot.slane %v2199_v32, %v3682_v2  ;;  %v2368_v22 = vsel %vm1365_vm12, %v2366_v54, %v4281_v17 }
0x225f   :  { %v2369_v27 = vsel %vm1365_vm12, %v2367_v24, %v4284_v29 }
0x22cb   :  { %v1822_v58 = vpop.permute.xlu0 %1821 }
0x22cc   :  { %3150 = vmatmul.mubr.msk.bf16.vlgmr.msra.gmra.mrb[32].mxu0 %vm117_vm0, %v1822_v58 }
0x22cd   :  { %3162 = vmatpush3.bf16.msra.mxu0 %v4071_v60  ;;  %3165 = vmatprep.mubr.msk.bf16.mxu0 %vm3563_vm8, %v3562_v18 }
0x22ce   :  { %3163 = vmatprep.subr.bf16.mxu0 %v3562_v18 }
0x22d1   :  { %3164 = vmatpush3.bf16.msra.mxu0 %v4080_v9 }
0x239f   :  { %v1860_v62 = vpop.f32.mrb[32].mxu0 }
0x23a0   :  { %v1861_v20 = vadd.f32 %v1860_v62, %v1818_v14  ;;  %v3151_v40 = vpop.f32.mrb[33].mxu0 }
0x23a1   :  { %v1863_v43 = vpop.f32.mrb[34].mxu0 }
0x23a2   :  { %3392 = vtanh.f32 %v1861_v20  ;;  %v3152_v49 = vpop.f32.mrb[35].mxu0  ;;  %v2882_v24 = vmul.f32 -1.442695, %v1861_v20 }
0x23a4   :  { %3394 = vpow2.f32 %v2882_v24 }
0x23ac   :  { %v3393_v54 = vpop.eup %3392 }
0x23ad   :  { %1875 = vrot.lane.b32.xlu1 %v3393_v54, %s3565_s5 }
0x23ae   :  { %v3395_v56 = vpop.eup %3394 }
0x23af   :  { %v1869_v19 = vadd.f32 1.0, %v3395_v56 }
0x23b1   :  { %3396 = vrcp.f32 %v1869_v19 }
0x23bb   :  { %v3397_v61 = vpop.eup %3396 }
0x23bc   :  { %v1873_v37 = vmul.f32 %v3397_v61, %v1811_v55 }
0x241f   :  { %v1876_v25 = vpop.permute.xlu1 %1875 }
0x2420   :  { %v1878_v10 = vmul.f32 %v3397_v61, %v1876_v25 }
0x2422   :  { %1880 = vrot.lane.b32.xlu0 %v1878_v10, %s3565_s5 }
0x2494   :  { %v1881_v7 = vpop.permute.xlu0 %1880 }
0x2495   :  { %v1883_v35 = vadd.f32 %v1881_v7, %v1873_v37 }
0x2497   :  { %3398 = vtanh.f32 %v1883_v35 }
0x24a1   :  { %v3399_v14 = vpop.eup %3398 }
0x24a2   :  { %1886 = vrot.lane.b32.xlu1 %v3399_v14, %s3565_s5 }
0x2514   :  { %v1887_v6 = vpop.permute.xlu1 %1886 }
0x2515   :  { %v1889_v41 = vmul.f32 %v3397_v61, %v1887_v6 }
0x2517   :  { %v1891_v36 = vpack.c.bf16 %v1889_v41, %v1889_v41  ;;  %v2207_v42 = vrot.slane %v1889_v41, %v3872_v21 }
0x2519   :  { %v2208_v52 = vcombine.high %v2207_v42, %v2207_v42  ;;  %v2215_v44 = vrot.slane %v2207_v42, %v3872_v21  ;;  %1893 = vrot.lane.b32.xlu0 %v1891_v36, %s3566_s7 }
0x251b   :  { %v2222_v23 = vrot.slane %v2208_v52, %v3872_v21  ;;  %v4309_v8 = vrot.slane %v2215_v44, %v3682_v2 }
0x251d   :  { %v4312_v45 = vrot.slane %v2222_v23, %v3682_v2  ;;  %v2370_v55 = vsel %vm238_vm7, %v2368_v22, %v4309_v8 }
0x251f   :  { %v2371_v26 = vsel %vm238_vm7, %v2369_v27, %v4312_v45 }
0x258b   :  { %v1894_v30 = vpop.permute.xlu0 %1893 }
0x258c   :  { %3158 = vmatmul.mubr.msk.bf16.vlgmr.msra.gmra.mrb[24].mxu1 %vm117_vm0, %v1894_v30 }
0x258d   :  { %3170 = vmatpush3.bf16.msra.mxu1 %v4071_v60  ;;  %3173 = vmatprep.mubr.msk.bf16.mxu1 %vm3563_vm8, %v3562_v18 }
0x258e   :  { %3171 = vmatprep.subr.bf16.mxu1 %v3562_v18 }
0x2591   :  { %3172 = vmatpush3.bf16.msra.mxu1 %v4080_v9 }
0x265f   :  { %v1932_v33 = vpop.f32.mrb[24].mxu1 }
0x2660   :  { %v1933_v34 = vadd.f32 %v1932_v33, %v1890_v13  ;;  %v3159_v38 = vpop.f32.mrb[25].mxu1 }
0x2661   :  { %v1935_v46 = vpop.f32.mrb[26].mxu1 }
0x2662   :  { %3400 = vtanh.f32 %v1933_v34  ;;  %v3160_v47 = vpop.f32.mrb[27].mxu1  ;;  %v2884_v60 = vmul.f32 -1.442695, %v1933_v34 }
0x2664   :  { %3402 = vpow2.f32 %v2884_v60 }
0x266c   :  { %v3401_v32 = vpop.eup %3400 }
0x266d   :  { %1947 = vrot.lane.b32.xlu1 %v3401_v32, %s3565_s5 }
0x266e   :  { %v3403_v22 = vpop.eup %3402 }
0x266f   :  { %v1941_v27 = vadd.f32 1.0, %v3403_v22 }
0x2671   :  { %3404 = vrcp.f32 %v1941_v27 }
0x267b   :  { %v3405_v9 = vpop.eup %3404 }
0x267c   :  { %v1945_v20 = vmul.f32 %v3405_v9, %v1883_v35 }
0x26df   :  { %v1948_v58 = vpop.permute.xlu1 %1947 }
0x26e0   :  { %v1950_v62 = vmul.f32 %v3405_v9, %v1948_v58 }
0x26e2   :  { %1952 = vrot.lane.b32.xlu0 %v1950_v62, %s3565_s5 }
0x2754   :  { %v1953_v0 = vpop.permute.xlu0 %1952 }
0x2755   :  { %v1955_v5 = vadd.f32 %v1953_v0, %v1945_v20 }
0x2757   :  { %3406 = vtanh.f32 %v1955_v5 }
0x2761   :  { %v3407_v13 = vpop.eup %3406 }
0x2762   :  { %1958 = vrot.lane.b32.xlu1 %v3407_v13, %s3565_s5 }
0x27d4   :  { %v1959_v40 = vpop.permute.xlu1 %1958 }
0x27d5   :  { %v1961_v43 = vmul.f32 %v3405_v9, %v1959_v40 }
0x27d7   :  { %v1963_v49 = vpack.c.bf16 %v1961_v43, %v1961_v43  ;;  %v2230_v54 = vrot.slane %v1961_v43, %v3872_v21 }
0x27d9   :  { %v2231_v24 = vcombine.high %v2230_v54, %v2230_v54  ;;  %v2238_v56 = vrot.slane %v2230_v54, %v3872_v21  ;;  %1965 = vrot.lane.b32.xlu0 %v1963_v49, %s3566_s7 }
0x27db   :  { %v2245_v19 = vrot.slane %v2231_v24, %v3872_v21  ;;  %v4337_v61 = vrot.slane %v2238_v56, %v3682_v2 }
0x27dd   :  { %v4340_v25 = vrot.slane %v2245_v19, %v3682_v2  ;;  %v2372_v10 = vsel %vm226_vm6, %v2370_v55, %v4337_v61 }
0x27df   :  { %v2373_v37 = vsel %vm226_vm6, %v2371_v26, %v4340_v25 }
0x284b   :  { %v1966_v7 = vpop.permute.xlu0 %1965 }
0x284c   :  { %3166 = vmatmul.mubr.msk.bf16.vlgmr.msra.gmra.mrb[36].mxu0 %vm117_vm0, %v1966_v7 }
0x291f   :  { %v2004_v35 = vpop.f32.mrb[36].mxu0 }
0x2920   :  { %v2005_v14 = vadd.f32 %v2004_v35, %v1962_v12  ;;  %v3167_v6 = vpop.f32.mrb[37].mxu0 }
0x2921   :  { %v2007_v41 = vpop.f32.mrb[38].mxu0 }
0x2922   :  { %3408 = vtanh.f32 %v2005_v14  ;;  %v3168_v36 = vpop.f32.mrb[39].mxu0  ;;  %v2886_v52 = vmul.f32 -1.442695, %v2005_v14 }
0x2924   :  { %3410 = vpow2.f32 %v2886_v52 }
0x292c   :  { %v3409_v42 = vpop.eup %3408 }
0x292d   :  { %2019 = vrot.lane.b32.xlu1 %v3409_v42, %s3565_s5 }
0x292e   :  { %v3411_v44 = vpop.eup %3410 }
0x292f   :  { %v2013_v23 = vadd.f32 1.0, %v3411_v44 }
0x2931   :  { %3412 = vrcp.f32 %v2013_v23 }
0x293b   :  { %v3413_v55 = vpop.eup %3412 }
0x293c   :  { %v2017_v33 = vmul.f32 %v3413_v55, %v1955_v5 }
0x299f   :  { %v2020_v26 = vpop.permute.xlu1 %2019 }
0x29a0   :  { %v2022_v30 = vmul.f32 %v3413_v55, %v2020_v26 }
0x29a2   :  { %2024 = vrot.lane.b32.xlu0 %v2022_v30, %s3565_s5 }
0x2a14   :  { %v2025_v59 = vpop.permute.xlu0 %2024 }
0x2a15   :  { %v2027_v63 = vadd.f32 %v2025_v59, %v2017_v33 }
0x2a17   :  { %3414 = vtanh.f32 %v2027_v63 }
0x2a21   :  { %v3415_v12 = vpop.eup %3414 }
0x2a22   :  { %2030 = vrot.lane.b32.xlu1 %v3415_v12, %s3565_s5 }
0x2a94   :  { %v2031_v34 = vpop.permute.xlu1 %2030 }
0x2a95   :  { %v2033_v38 = vmul.f32 %v3413_v55, %v2031_v34 }
0x2a97   :  { %v2035_v46 = vpack.c.bf16 %v2033_v38, %v2033_v38  ;;  %v2253_v47 = vrot.slane %v2033_v38, %v3872_v21 }
0x2a99   :  { %v2254_v32 = vcombine.high %v2253_v47, %v2253_v47  ;;  %v2261_v60 = vrot.slane %v2253_v47, %v3872_v21  ;;  %2037 = vrot.lane.b32.xlu0 %v2035_v46, %s3566_s7 }
0x2a9b   :  { %v2268_v22 = vrot.slane %v2254_v32, %v3872_v21  ;;  %v2347_v27 = vrot.slane %v2261_v60, %v3682_v2 }
0x2a9d   :  { %v2374_v9 = vsel %vm214_vm5, %v2372_v10, %v2347_v27  ;;  %v2351_v58 = vrot.slane %v2268_v22, %v3682_v2 }
0x2a9f   :  { %v2375_v62 = vsel %vm214_vm5, %v2373_v37, %v2351_v58 }
0x2b0b   :  { %v2038_v20 = vpop.permute.xlu0 %2037 }
0x2b0c   :  { %3174 = vmatmul.mubr.msk.bf16.vlgmr.msra.gmra.mrb[28].mxu1 %vm117_vm0, %v2038_v20 }
0x2b0d   :  { %3202 = vmatprep.mubr.msk.f32.mxu1 %vm3563_vm8, %v3562_v18 }
0x2bdf   :  { %v2076_v0 = vpop.f32.mrb[28].mxu1 }
0x2be0   :  { %v2077_v5 = vadd.f32 %v2076_v0, %v2034_v15  ;;  %v3175_v13 = vpop.f32.mrb[29].mxu1 }
0x2be1   :  { %v2079_v40 = vpop.f32.mrb[30].mxu1  ;;  %v2461_v13 = vld [vmem:[#allocation9] sm:$0xff] }
0x2be2   :  { %3416 = vtanh.f32 %v2077_v5  ;;  %v3176_v43 = vpop.f32.mrb[31].mxu1  ;;  %v2888_v54 = vmul.f32 -1.442695, %v2077_v5  ;;  %v2462_v40 = vld [vmem:[#allocation9 + $0x8] sm:$0xff] }
0x2be3   :  { %v2463_v43 = vld [vmem:[#allocation9 + $0x10] sm:$0xff] }
0x2be4   :  { %3418 = vpow2.f32 %v2888_v54  ;;  %v2464_v54 = vld [vmem:[#allocation9 + $0x18] sm:$0xff] }
0x2bec   :  { %v3417_v49 = vpop.eup %3416 }
0x2bed   :  { %2091 = vrot.lane.b32.xlu1 %v3417_v49, %s3565_s5  ;;  %v3256_v49 = vpack.c.bf16 %v2462_v40, %v2461_v13 }
0x2bee   :  { %v3419_v24 = vpop.eup %3418 }
0x2bef   :  { %v2085_v56 = vadd.f32 1.0, %v3419_v24  ;;  %v3260_v24 = vpack.c.bf16 %v2464_v54, %v2463_v43  ;;  %3257 = vmatprep.subr.bf16.mxu0 %v3256_v49 }
0x2bf0   :  { %3259 = vmatpush3.bf16.msra.mxu0 %v3256_v49 }
0x2bf1   :  { %3420 = vrcp.f32 %v2085_v56  ;;  %3261 = vmatprep.subr.bf16.mxu0 %v3260_v24 }
0x2bf4   :  { %3263 = vmatpush3.bf16.msra.mxu0 %v3260_v24 }
0x2bfb   :  { %v3421_v19 = vpop.eup %3420 }
0x2bfc   :  { %v2089_v48 = vmul.f32 %v3421_v19, %v2027_v63 }
0x2c5f   :  { %v2092_v10 = vpop.permute.xlu1 %2091 }
0x2c60   :  { %v2094_v37 = vmul.f32 %v3421_v19, %v2092_v10 }
0x2c62   :  { %2096 = vrot.lane.b32.xlu0 %v2094_v37, %s3565_s5 }
0x2cd4   :  { %v2097_v53 = vpop.permute.xlu0 %2096 }
0x2cd5   :  { %v2099_v57 = vadd.f32 %v2097_v53, %v2089_v48 }
0x2cd7   :  { %3422 = vtanh.f32 %v2099_v57 }
0x2ce1   :  { %v3423_v15 = vpop.eup %3422 }
0x2ce2   :  { %2102 = vrot.lane.b32.xlu1 %v3423_v15, %s3565_s5  ;;  %v2889_v15 = vld [vmem:[#allocation7 + $0x3] ss:$0 sm:$0xff] }
0x2d54   :  { %v2103_v7 = vpop.permute.xlu1 %2102 }
0x2d55   :  { %v2105_v35 = vmul.f32 %v3421_v19, %v2103_v7 }
0x2d57   :  { %v2276_v14 = vrot.slane %v2105_v35, %v3872_v21  ;;  %v2890_v35 = vld [vmem:[#allocation7 + $0x4] ss:$0 sm:$0xff] }
0x2d59   :  { %v2277_v6 = vcombine.high %v2276_v14, %v2276_v14  ;;  %v2284_v41 = vrot.slane %v2276_v14, %v3872_v21 }
0x2d5b   :  { %v2291_v36 = vrot.slane %v2277_v6, %v3872_v21  ;;  %v2388_v42 = vsel %vm1359_vm14, %v2284_v41, %v2347_v27  ;;  %v2357_v52 = vrot.slane %v2284_v41, %v3682_v2 }
0x2d5c   :  { %v2390_v44 = vsel %vm1362_vm2, %v2388_v42, %v4337_v61  ;;  %v2381_v61 = vrot.slane %v4214_v4, %v3682_v2 }
0x2d5d   :  { %v2376_v23 = vsel %vm202_vm4, %v2374_v9, %v2357_v52  ;;  %v2392_v55 = vsel %vm1365_vm12, %v2390_v44, %v4309_v8  ;;  %v2361_v26 = vrot.slane %v2291_v36, %v3682_v2  ;;  %v2389_v30 = vsel %vm1359_vm14, %v2291_v36, %v2351_v58  ;;  %v2891_v44 = vld [vmem:[#allocation7 + $0x5] ss:$0 sm:$0xff] }
0x2d5e   :  { %2404 = vrot.lane.b32.xlu0 %v2376_v23, %s3566_s7  ;;  %v2394_v21 = vsel %vm238_vm7, %v2392_v55, %v4281_v17  ;;  %v2391_v33 = vsel %vm1362_vm2, %v2389_v30, %v4340_v25  ;;  %v2385_v25 = vrot.slane %v4221_v39, %v3682_v2 }
0x2d5f   :  { %v2396_v59 = vsel %vm226_vm6, %v2394_v21, %v4252_v50  ;;  %v2393_v8 = vsel %vm1365_vm12, %v2391_v33, %v4312_v45  ;;  %v2377_v34 = vsel %vm202_vm4, %v2375_v62, %v2361_v26  ;;  %v2894_v21 = vld [vmem:[#allocation7 + $0x6] ss:$0 sm:$0xff] }
0x2d60   :  { %v2398_v63 = vsel %vm214_vm5, %v2396_v59, %v4218_v28  ;;  %v2395_v12 = vsel %vm238_vm7, %v2393_v8, %v4284_v29 }
0x2d61   :  { %v2400_v17 = vsel %vm202_vm4, %v2398_v63, %v2381_v61  ;;  %v2397_v4 = vsel %vm226_vm6, %v2395_v12, %v4255_v51  ;;  %vm2658_vm6 = vcmask 424960  }
0x2d62   :  { %2412 = vrot.lane.b32.xlu1 %v2400_v17, %s3566_s7  ;;  %2406 = vrot.lane.b32.xlu0 %v2377_v34, %s3566_s7  ;;  %v2399_v28 = vsel %vm214_vm5, %v2397_v4, %v4224_v31  ;;  %v2571_v17 = vsub.s32 %v3688_v16, %v3679_v1  ;;  %vm2580_vm5 = vcmask 58368   ;;  %v2626_v1 = vld [vmem:[#allocation9 + $0x40] sm:$0xff] }
0x2d63   :  { %v2401_v50 = vsel %vm202_vm4, %v2399_v28, %v2385_v25 }
0x2d66   :  { %2414 = vrot.lane.b32.xlu1 %v2401_v50, %s3566_s7  ;;  %v3438_v50 = vld [vmem:[#allocation2] sm:$0x3] }
0x2d67   :  { %vm2566_vm4 = vcmp.eq.s32.totalorder %v3438_v50, 0 }
0x2dd0   :  { %v2405_v29 = vpop.permute.xlu0 %2404 }
0x2dd4   :  { %v2413_v45 = vpop.permute.xlu1 %2412  ;;  %v2407_v51 = vpop.permute.xlu0 %2406 }
0x2dd5   :  { %v2418_v38 = vsel %vm394_vm13, %v2405_v29, %v2413_v45 }
0x2dd6   :  { %v2422_v39 = vsel %vm117_vm0, %v2418_v38, 0.0 }
0x2dd7   :  { %2423 = vadd.xlane.f32.xlu0 %v2422_v39 }
0x2dd8   :  { %v2415_v46 = vpop.permute.xlu1 %2414 }
0x2dd9   :  { %v2419_v47 = vsel %vm394_vm13, %v2407_v51, %v2415_v46 }
0x2dda   :  { %v2425_v32 = vsel %vm117_vm0, %v2419_v47, 0.0 }
0x2ddb   :  { %2426 = vadd.xlane.f32.xlu1 %v2425_v32 }
0x2e64   :  { %v2424_v31 = vpop.xlane.xlu0 %2423 }
0x2e65   :  { %v2429_v60 = vmul.f32 0.03125, %v2424_v31 }
0x2e67   :  { %v2431_v22 = vsub.f32 %v2418_v38, %v2429_v60 }
0x2e68   :  { %v2427_v27 = vpop.xlane.xlu1 %2426 }
0x2e69   :  { %v2430_v9 = vmul.f32 0.03125, %v2427_v27  ;;  %v2433_v58 = vmul.f32 %v2431_v22, %v2431_v22 }
0x2e6b   :  { %v2432_v62 = vsub.f32 %v2419_v47, %v2430_v9  ;;  %v2435_v20 = vsel %vm117_vm0, %v2433_v58, 0.0  ;;  %v2622_v9 = vld [vmem:[#allocation9 + $0x20] sm:$0xff]  ;;  %v2623_v58 = vld [vmem:[#allocation9 + $0x28] sm:$0xff] }
0x2e6c   :  { %2436 = vadd.xlane.f32.xlu0 %v2435_v20  ;;  %v3571_v20 = vmov 0.0|0.0  }
0x2e6d   :  { %v2434_v0 = vmul.f32 %v2432_v62, %v2432_v62  ;;  %3264 = vmatprep.subr.bf16.mxu1 %v3571_v20  ;;  %3273 = vmatprep.subr.bf16.mxu0 %v3571_v20 }
0x2e6f   :  { %v2438_v5 = vsel %vm117_vm0, %v2434_v0, 0.0  ;;  %v3265_v0 = vpack.c.bf16 %v2623_v58, %v2622_v9 }
0x2e70   :  { %2439 = vadd.xlane.f32.xlu0 %v2438_v5  ;;  %v2625_v5 = vld [vmem:[#allocation9 + $0x38] sm:$0xff] }
0x2e71   :  { %3266 = vmatpush3.bf16.msra.mxu1 %v3265_v0 }
0x2e72   :  { %3267 = vmatprep.subr.bf16.mxu1 %v3571_v20 }
0x2ef9   :  { %v2437_v56 = vpop.xlane.xlu0 %2436 }
0x2efa   :  { %v2441_v19 = vmul.f32 0.03125, %v2437_v56 }
0x2efc   :  { %v2443_v10 = vadd.f32 1e-05, %v2441_v19 }
0x2efd   :  { %v2440_v37 = vpop.xlane.xlu0 %2439 }
0x2efe   :  { %3424 = vrsqrt.f32 %v2443_v10  ;;  %v2442_v48 = vmul.f32 0.03125, %v2440_v37  ;;  %v2628_v37 = vld [vmem:[#allocation9 + $0x50] sm:$0xf] }
0x2f00   :  { %v2444_v53 = vadd.f32 1e-05, %v2442_v48 }
0x2f02   :  { %3426 = vrsqrt.f32 %v2444_v53 }
0x2f08   :  { %v3425_v57 = vpop.eup %3424 }
0x2f09   :  { %v2447_v7 = vmul.f32 %v3425_v57, %v2431_v22 }
0x2f0b   :  { %v2453_v14 = vmul.f32 %v2889_v15, %v2447_v7 }
0x2f0c   :  { %v3427_v6 = vpop.eup %3426 }
0x2f0d   :  { %v2448_v41 = vmul.f32 %v3427_v6, %v2432_v62  ;;  %v4421_v36 = vadd.f32 %v2890_v35, %v2453_v14  ;;  %v2624_v62 = vld [vmem:[#allocation9 + $0x30] sm:$0xff] }
0x2f0e   :  { %v3268_v13 = vpack.c.bf16 %v2625_v5, %v2624_v62 }
0x2f0f   :  { %v2454_v42 = vmul.f32 %v2889_v15, %v2448_v41  ;;  %3185 = vmatprep.mubr.msk.f32.mxu0 %vm117_vm0, %v4421_v36 }
0x2f10   :  { %3269 = vmatpush3.bf16.msra.mxu1 %v3268_v13 }
0x2f11   :  { %v4425_v52 = vadd.f32 %v2890_v35, %v2454_v42  ;;  %3270 = vmatprep.subr.bf16.mxu1 %v3571_v20  ;;  %v2637_v42 = vld [vmem:[%s4464_s1] sm:$0x3] }
0x2f13   :  { %3186 = vmatmul.mubr.msk.f32.vlgmr.msra.gmra.mrb[40].mxu0 %vm117_vm0, %v4425_v52 }
0x2f14   :  { %3213 = vmatprep.mubr.msk.f32.mxu0 %vm3563_vm8, %v3562_v18 }
0x2fe6   :  { %v3187_v23 = vpop.f32.mrb[40].mxu0 }
0x2fe7   :  { %v2549_v55 = vadd.f32 %v3187_v23, %v2891_v44  ;;  %v2543_v26 = vpop.f32.mrb[41].mxu0 }
0x2fe8   :  { %v2544_v30 = vadd.f32 %v2891_v44, %v2543_v26  ;;  %v2895_v26 = vld [vmem:[#allocation7 + $0x7] ss:$0 sm:$0xff] }
0x2fe9   :  { %3428 = vtanh.f32 %v2549_v55 }
0x2fea   :  { %3430 = vtanh.f32 %v2544_v30 }
0x2ff3   :  { %v3429_v33 = vpop.eup %3428 }
0x2ff4   :  { %v3431_v61 = vpop.eup %3430  ;;  %v2559_v59 = vmul.f32 %v3429_v33, %v2894_v21 }
0x2ff5   :  { %v2558_v8 = vmul.f32 %v3431_v61, %v2894_v21 }
0x2ff6   :  { %v2563_v63 = vsel %vm117_vm0, %v2559_v59, 0.0 }
0x2ff7   :  { %2564 = vadd.xlane.f32.xlu0 %v2563_v63  ;;  %v2560_v12 = vsel %vm117_vm0, %v2558_v8, 0.0 }
0x2ff8   :  { %2561 = vadd.xlane.f32.xlu1 %v2560_v12 }
0x3084   :  { %v2565_v34 = vpop.xlane.xlu0 %2564 }
0x3085   :  { %v2576_v25 = vrot.slane %v2565_v34, %v2571_v17  ;;  %v2562_v4 = vpop.xlane.xlu1 %2561  ;;  %v2632_v34 = vld [vmem:[#allocation9 + $0x58] sm:$0xff] }
0x3086   :  { %v2572_v28 = vrot.slane %v2562_v4, %v2571_v17 }
0x3088   :  { %v2577_v29 = vsel %vm499_vm10, %v2576_v25, %v2572_v28  ;;  %v2633_v25 = vld [vmem:[#allocation9 + $0x60] sm:$0xff]  ;;  %v2635_v28 = vld [vmem:[#allocation9 + $0x70] sm:$0xff] }
0x3089   :  { %v2579_v45 = vsel %vm2566_vm4, -1e+30, %v2577_v29  ;;  %v3274_v4 = vpack.c.bf16 %v2633_v25, %v2632_v34 }
0x308a   :  { %v2581_v38 = vsel %vm2580_vm5, %v2579_v45, -inf }
0x308b   :  { %2582 = vmax.xlane.f32.xlu1 %v2581_v38  ;;  %3275 = vmatpush3.bf16.msra.mxu0 %v3274_v4 }
0x308c   :  { %3276 = vmatprep.subr.bf16.mxu0 %v3571_v20 }
0x3118   :  { %v2583_v39 = vpop.xlane.xlu1 %2582 }
0x3119   :  { %v2584_v51 = vsub.f32 %v2579_v45, %v2583_v39 }
0x311b   :  { %v2585_v46 = vmul.f32 1.442695, %v2584_v51  ;;  %v2898_v51 = vld [vmem:[#allocation7 + $0x8] ss:$0 sm:$0xff] }
0x311d   :  { %3432 = vpow2.f32 %v2585_v46 }
0x3127   :  { %v3433_v47 = vpop.eup %3432 }
0x3128   :  { %v2587_v32 = vsel %vm2580_vm5, %v3433_v47, 0.0 }
0x3129   :  { %2588 = vadd.xlane.f32.xlu0 %v2587_v32 }
0x31b6   :  { %v2589_v16 = vpop.xlane.xlu0 %2588 }
0x31b7   :  { %3434 = vrcp.f32 %v2589_v16 }
0x31c1   :  { %v3435_v31 = vpop.eup %3434 }
0x31c2   :  { %v2591_v60 = vmul.f32 %v3435_v31, %v3433_v47  ;;  %v2899_v47 = vld [vmem:[#allocation7 + $0x9] ss:$0 sm:$0xff] }
0x31c4   :  { %v2602_v22 = vrot.slane %v2591_v60, %v102_v3  ;;  %v2595_v27 = vrot.slane %v2591_v60, %v3682_v2  ;;  %v2627_v3 = vld [vmem:[#allocation9 + $0x48] sm:$0xff]  ;;  %v2900_v60 = vld [vmem:[#allocation7 + $0xa] ss:$0 sm:$0xff] }
0x31c5   :  { %v3271_v2 = vpack.c.bf16 %v2627_v3, %v2626_v1 }
0x31c6   :  { %2604 = vbcast.lane.b32.xlu0 %v2602_v22, 256  ;;  %2597 = vbcast.lane.b32.xlu1 %v2595_v27, 256 }
0x31c7   :  { %3272 = vmatpush3.bf16.msra.mxu1 %v3271_v2 }
0x31c8   :  { %3200 = vmatprep.subr.mxu1 %v3562_v18 }
0x31cb   :  { %3201 = vmatpush3.msk.msra.mxu1 %vm238_vm7, %v2628_v37  ;;  %vm2735_vm7 = vcmask 254976  }
0x3238   :  { %v2605_v40 = vpop.permute.xlu0 %2604  ;;  %v2598_v43 = vpop.permute.xlu1 %2597 }
0x3239   :  { %v2607_v49 = vmul.f32 %v2605_v40, %v4425_v52  ;;  %v2606_v54 = vmul.f32 %v2598_v43, %v4421_v36 }
0x323b   :  { %v2615_v24 = vsel %vm117_vm0, %v2607_v49, 0.0  ;;  %v2608_v56 = vsel %vm117_vm0, %v2606_v54, 0.0 }
0x323c   :  { %v2616_v19 = vrot.slane %v2615_v24, 4  ;;  %v2609_v10 = vrot.slane %v2608_v56, 4 }
0x323e   :  { %v2617_v48 = vadd.f32 %v2616_v19, %v2615_v24  ;;  %v2610_v53 = vadd.f32 %v2609_v10, %v2608_v56 }
0x3240   :  { %v2618_v57 = vrot.slane %v2617_v48, 2  ;;  %v2611_v15 = vrot.slane %v2610_v53, 2 }
0x3242   :  { %v2619_v18 = vadd.f32 %v2618_v57, %v2617_v48  ;;  %v2612_v7 = vadd.f32 %v2611_v15, %v2610_v53 }
0x3244   :  { %v2620_v35 = vrot.slane %v2619_v18, 1  ;;  %v2613_v14 = vrot.slane %v2612_v7, 1 }
0x3246   :  { %v2614_v6 = vadd.f32 %v2613_v14, %v2612_v7  ;;  %v2621_v41 = vadd.f32 %v2620_v35, %v2619_v18 }
0x3248   :  { %v2644_v36 = vsel %vm499_vm10, %v2621_v41, %v2614_v6 }
0x3249   :  { %2645 = vrot.lane.b32.xlu1 %v2644_v36, %s3567_s8 }
0x324d   :  { %2649 = vrot.lane.b32.xlu1 %v2637_v42, %s3568_s4 }
0x32bb   :  { %v2646_v52 = vpop.permute.xlu1 %2645 }
0x32bc   :  { %v2652_v44 = vsel %vm250_vm3, %v3927_v11, %v2646_v52  ;;  %v2634_v11 = vld [vmem:[#allocation9 + $0x68] sm:$0xff]  ;;  %vm2837_vm3 = vcmask 1024  }
0x32bd   :  { %v3277_v50 = vpack.c.bf16 %v2635_v28, %v2634_v11 }
0x32bf   :  { %v2650_v23 = vpop.permute.xlu1 %2649  ;;  %3278 = vmatpush3.bf16.msra.mxu0 %v3277_v50 }
0x32c0   :  { %v2653_v55 = vsel %vm255_vm11, %v2652_v44, %v2650_v23 }
0x32c1   :  { %3203 = vmatmul.mubr.msk.f32.vlgmr.msra.gmra.mrb[32].mxu1 %vm2658_vm6, %v2653_v55 }
0x3394   :  { %v2731_v30 = vpop.f32.mrb[32].mxu1 }
0x3395   :  { %v2732_v21 = vadd.f32 %v2895_v26, %v2731_v30  ;;  %v3204_v33 = vpop.f32.mrb[33].mxu1 }
0x3397   :  { %v2736_v61 = vsel %vm2735_vm7, %v2732_v21, 0.0 }
0x3398   :  { %2737 = vadd.xlane.f32.xlu0 %v2736_v61 }
0x3425   :  { %v2738_v59 = vpop.xlane.xlu0 %2737 }
0x3426   :  { %v2739_v8 = vmul.f32 0.03125, %v2738_v59 }
0x3428   :  { %v2740_v63 = vsub.f32 %v2732_v21, %v2739_v8 }
0x342a   :  { %v2741_v12 = vmul.f32 %v2740_v63, %v2740_v63 }
0x342c   :  { %v2742_v17 = vsel %vm2735_vm7, %v2741_v12, 0.0 }
0x342d   :  { %2743 = vadd.xlane.f32.xlu1 %v2742_v17 }
0x34ba   :  { %v2744_v29 = vpop.xlane.xlu1 %2743 }
0x34bb   :  { %v2745_v45 = vmul.f32 0.03125, %v2744_v29 }
0x34bd   :  { %v2746_v38 = vadd.f32 1e-05, %v2745_v45 }
0x34bf   :  { %3436 = vrsqrt.f32 %v2746_v38 }
0x34c9   :  { %v3437_v39 = vpop.eup %3436 }
0x34ca   :  { %v2748_v46 = vmul.f32 %v3437_v39, %v2740_v63 }
0x34cc   :  { %v2753_v32 = vmul.f32 %v2898_v51, %v2748_v46 }
0x34ce   :  { %v2758_v16 = vadd.f32 %v2899_v47, %v2753_v32 }
0x34d0   :  { %v2759_v31 = vmax.f32 %v2758_v16, 0.0 }
0x34d2   :  { %3214 = vmatmul.mubr.msk.f32.vlgmr.msra.gmra.mrb[42].mxu0 %vm117_vm0, %v2759_v31 }
0x35a5   :  { %v2833_v22 = vpop.f32.mrb[42].mxu0 }
0x35a6   :  { %v2834_v27 = vadd.f32 %v2900_v60, %v2833_v22  ;;  %v3215_v9 = vpop.f32.mrb[43].mxu0 }
0x35a8   :  { %2838 = vst.msk [vmem:[%s4469_s6] sm:$0x3] %vm2837_vm3, %v2834_v27 }
0x35a9   :  { %2843 = vsyncpa [#allocation3], 1 }
0x35aa   :  { %2844 = vsyncpa [#allocation5], 1 }
0x35ab   :  { %2845 = vsyncpa [#allocation8], 1 }

</bundles_post_ra>
